<compile_context>
chip_gen: v6e
topology: v6e:2x2x1
jax: 0.10.0
libtpu: 0.0.40
codegen_flags: <defaults>
</compile_context>

<pallas_src>
import jax
import jax.numpy as jnp
from jax.experimental import pallas as pl
from jax.experimental.pallas import tpu as pltpu

C_IN = 1152    # channels of x211 / x215 / conv2d75 output
C_MID = 192    # channels of conv2d74 output / x205
H = W = 7
N = 1
P = N * H * W  # 49
EPS = 1e-5


def _fused_kernel(gate_ref, x211_ref, x205_ref, w1_ref, gamma_ref, beta_ref,
                  w2_ref, out_ref):
    # x216 = sigmoid(x215) ; x217 = x211 * x216          (all in [C, P] layout)
    gate = jax.nn.sigmoid(gate_ref[...])                       # [C_IN, 1]  f32
    x = (x211_ref[...] * gate).astype(jnp.bfloat16)            # [C_IN, P]  bf16
    # x218 = conv2d74(x217): 1x1 conv == matmul over channels (MXU, bf16 in,
    # f32 accumulate)
    h = jnp.dot(w1_ref[...], x,
                preferred_element_type=jnp.float32)            # [C_MID, P] f32
    # x219 = batchnorm2d44(x218), training mode: batch stats over N*H*W.
    # Two-pass (centered) variance for numerical robustness when |mean|>>std.
    inv_p = jnp.float32(1.0 / P)
    mean = jnp.sum(h, axis=1, keepdims=True) * inv_p           # [C_MID, 1]
    centered = h - mean                                        # [C_MID, P]
    var = jnp.sum(centered * centered, axis=1, keepdims=True) * inv_p
    scale = gamma_ref[...] * jax.lax.rsqrt(var + EPS)          # [C_MID, 1]
    # x220 = x219 + x205
    y = centered * scale + beta_ref[...] + x205_ref[...]       # [C_MID, P] f32
    # x221 = conv2d75(x220): do the matmul in the lane-dense orientation
    # [P, C_MID] @ [C_MID, C_IN] (full N=1152 amortizes the wide MXU), then
    # transpose the f32 result in-VMEM so the stored output is already NCHW.
    y_pc = jnp.transpose(y).astype(jnp.bfloat16)               # [P, C_MID] bf16
    out_pc = jnp.dot(y_pc, w2_ref[...],
                     preferred_element_type=jnp.float32)       # [P, C_IN]  f32
    out_ref[...] = jnp.transpose(out_pc)                       # [C_IN, P]  f32


@jax.jit
def fused_forward(x215, x211, x205, w1, gamma, beta, w2):
    """x215:[N,C_IN,1,1], x211:[N,C_IN,H,W], x205:[N,C_MID,H,W] (NCHW, f32).
    w1: [C_MID, C_IN] bf16 (conv2d74.weight), w2: [C_MID, C_IN] bf16
    (conv2d75.weight, pre-transposed once at weight-prep time).
    Returns [N, C_IN, H, W] f32."""
    # zero-cost reshapes (no host transposes) from NCHW into [C, P] slabs
    gate_cp = x215.reshape(C_IN, 1)
    x211_cp = x211.reshape(C_IN, P)
    x205_cp = x205.reshape(C_MID, P)
    gamma_c = gamma.reshape(C_MID, 1)
    beta_c = beta.reshape(C_MID, 1)

    out_cp = pl.pallas_call(
        _fused_kernel,
        out_shape=jax.ShapeDtypeStruct((C_IN, P), jnp.float32),
        grid=(1,),
        in_specs=[
            pl.BlockSpec((C_IN, 1), lambda i: (0, 0)),       # gate (x215)
            pl.BlockSpec((C_IN, P), lambda i: (0, 0)),       # x211
            pl.BlockSpec((C_MID, P), lambda i: (0, 0)),      # x205
            pl.BlockSpec((C_MID, C_IN), lambda i: (0, 0)),   # w1 (bf16)
            pl.BlockSpec((C_MID, 1), lambda i: (0, 0)),      # gamma
            pl.BlockSpec((C_MID, 1), lambda i: (0, 0)),      # beta
            pl.BlockSpec((C_MID, C_IN), lambda i: (0, 0)),   # w2^T (bf16)
        ],
        out_specs=pl.BlockSpec((C_IN, P), lambda i: (0, 0)),
        compiler_params=pltpu.CompilerParams(
            dimension_semantics=("arbitrary",)),
        cost_estimate=pl.CostEstimate(
            flops=43_352_064,          # two 192x1152x49 matmuls
            transcendentals=1_344,     # 1152 sigmoid + 192 rsqrt
            bytes_accessed=1_380_096), # f32 acts + bf16 weights + f32 out
    )(gate_cp, x211_cp, x205_cp, w1, gamma_c, beta_c, w2)

    # out_cp is already channel-major -> zero-cost reshape to NCHW.
    return out_cp.reshape(N, C_IN, H, W)


def reference_forward(x215, x211, x205, w1, gamma, beta, w2):
    """Pure-JAX reference of the PyTorch forward (training-mode BN), using the
    same bf16 weights / bf16 matmul inputs as the kernel."""
    gate = jax.nn.sigmoid(x215)                                    # [N,C_IN,1,1]
    x = (x211 * gate).reshape(C_IN, P).astype(jnp.bfloat16)
    h = jnp.dot(w1, x, preferred_element_type=jnp.float32)         # [C_MID, P]
    mean = jnp.mean(h, axis=1, keepdims=True)
    var = jnp.mean((h - mean) ** 2, axis=1, keepdims=True)
    hn = (h - mean) * jax.lax.rsqrt(var + EPS) * gamma.reshape(-1, 1) \
        + beta.reshape(-1, 1)
    y = hn + x205.reshape(C_MID, P)
    out = jnp.dot(y.astype(jnp.bfloat16).T, w2,
                  preferred_element_type=jnp.float32)              # [P, C_IN]
    return jnp.transpose(out).reshape(N, C_IN, H, W)


if __name__ == "__main__":
    key = jax.random.PRNGKey(0)
    k1, k2, k3, k4, k5, k6, k7 = jax.random.split(key, 7)

    # Activations (shapes implied by the module's forward), NCHW as in PyTorch.
    x215 = jax.random.normal(k1, (N, C_IN, 1, 1), jnp.float32)
    x211 = jax.random.normal(k2, (N, C_IN, H, W), jnp.float32)
    x205 = jax.random.normal(k3, (N, C_MID, H, W), jnp.float32)

    # Parameters.  Conv weights are prepared once, host-side, in the layout the
    # kernel consumes ([C_MID, C_IN]) and in bf16 (MXU-native dtype).
    w1_torch = 0.05 * jax.random.normal(k4, (C_MID, C_IN), jnp.float32)  # conv2d74.weight [out,in]
    w2_torch = 0.05 * jax.random.normal(k5, (C_IN, C_MID), jnp.float32)  # conv2d75.weight [out,in]
    gamma = 1.0 + 0.1 * jax.random.normal(k6, (C_MID,), jnp.float32)
    beta = 0.1 * jax.random.normal(k7, (C_MID,), jnp.float32)

    w1 = w1_torch.astype(jnp.bfloat16)                    # [C_MID, C_IN]
    w2 = jnp.transpose(w2_torch).astype(jnp.bfloat16)     # [C_MID, C_IN]

    out = fused_forward(x215, x211, x205, w1, gamma, beta, w2)
    jax.block_until_ready(out)

    ref = reference_forward(x215, x211, x205, w1, gamma, beta, w2)
    assert out.shape == (N, C_IN, H, W)
    assert jnp.allclose(out, ref, atol=5e-3, rtol=5e-3), "mismatch vs reference"

    print("KERNEL_OK")
</pallas_src>

<mosaic_0001>
module attributes {stable_mosaic.version = 11 : i64} {
  func.func @_fused_kernel(%arg0: i32, %arg1: memref<1152x1xf32, #tpu.memory_space<vmem>>, %arg2: memref<1152x49xf32, #tpu.memory_space<vmem>>, %arg3: memref<192x49xf32, #tpu.memory_space<vmem>>, %arg4: memref<192x1152xbf16, #tpu.memory_space<vmem>>, %arg5: memref<192x1xf32, #tpu.memory_space<vmem>>, %arg6: memref<192x1xf32, #tpu.memory_space<vmem>>, %arg7: memref<192x1152xbf16, #tpu.memory_space<vmem>>, %arg8: memref<1152x49xf32, #tpu.memory_space<vmem>>) attributes {dimension_semantics = [#tpu.dimension_semantics<arbitrary>], iteration_bounds = array<i64: 1>, scalar_prefetch = 0 : i64, scratch_operands = 0 : i64, tpu.core_type = #tpu.core_type<tc>, window_params = [{pipeline_mode = #tpu.pipeline_mode<synchronous>, transform_indices = @transform_0, window_bounds = array<i64: 1152, 1>}, {pipeline_mode = #tpu.pipeline_mode<synchronous>, transform_indices = @transform_1, window_bounds = array<i64: 1152, 49>}, {pipeline_mode = #tpu.pipeline_mode<synchronous>, transform_indices = @transform_2, window_bounds = array<i64: 192, 49>}, {pipeline_mode = #tpu.pipeline_mode<synchronous>, transform_indices = @transform_3, window_bounds = array<i64: 192, 1152>}, {pipeline_mode = #tpu.pipeline_mode<synchronous>, transform_indices = @transform_4, window_bounds = array<i64: 192, 1>}, {pipeline_mode = #tpu.pipeline_mode<synchronous>, transform_indices = @transform_5, window_bounds = array<i64: 192, 1>}, {pipeline_mode = #tpu.pipeline_mode<synchronous>, transform_indices = @transform_6, window_bounds = array<i64: 192, 1152>}, {pipeline_mode = #tpu.pipeline_mode<synchronous>, transform_indices = @transform_7, window_bounds = array<i64: 1152, 49>}]} {
    %c0 = arith.constant 0 : index
    %c0_0 = arith.constant 0 : index
    %0 = vector.load %arg1[%c0, %c0_0] : memref<1152x1xf32, #tpu.memory_space<vmem>>, vector<1152x1xf32>
    %1 = arith.negf %0 : vector<1152x1xf32>
    %2 = math.exp %1 : vector<1152x1xf32>
    %cst = arith.constant 1.000000e+00 : f32
    %3 = vector.broadcast %cst : f32 to vector<1152x1xf32>
    %4 = arith.addf %3, %2 : vector<1152x1xf32>
    %5 = arith.divf %3, %4 : vector<1152x1xf32>
    %c0_1 = arith.constant 0 : index
    %c0_2 = arith.constant 0 : index
    %6 = vector.load %arg2[%c0_1, %c0_2] : memref<1152x49xf32, #tpu.memory_space<vmem>>, vector<1152x49xf32>
    %7 = vector.broadcast %5 : vector<1152x1xf32> to vector<1152x49xf32>
    %8 = arith.mulf %6, %7 : vector<1152x49xf32>
    %9 = arith.truncf %8 : vector<1152x49xf32> to vector<1152x49xbf16>
    %c0_3 = arith.constant 0 : index
    %c0_4 = arith.constant 0 : index
    %10 = vector.load %arg4[%c0_3, %c0_4] : memref<192x1152xbf16, #tpu.memory_space<vmem>>, vector<192x1152xbf16>
    %cst_5 = arith.constant dense<0.000000e+00> : vector<192x49xf32>
    %11 = tpu.matmul %10, %9, %cst_5 {dimension_numbers = #tpu.dot_dimension_numbers<[1], [0], [0], [1], [0, 0, 1, 1], [], []>} : vector<192x1152xbf16>, vector<1152x49xbf16>, vector<192x49xf32> -> vector<192x49xf32>
    %cst_6 = arith.constant dense<0.000000e+00> : vector<192xf32>
    %12 = vector.multi_reduction <add>, %11, %cst_6 [1] : vector<192x49xf32> to vector<192xf32>
    %13 = vector.shape_cast %12 : vector<192xf32> to vector<192x1xf32>
    %cst_7 = arith.constant 0.0204081628 : f32
    %14 = vector.broadcast %cst_7 : f32 to vector<192x1xf32>
    %15 = arith.mulf %13, %14 : vector<192x1xf32>
    %16 = vector.broadcast %15 : vector<192x1xf32> to vector<192x49xf32>
    %17 = arith.subf %11, %16 : vector<192x49xf32>
    %18 = arith.mulf %17, %17 : vector<192x49xf32>
    %cst_8 = arith.constant dense<0.000000e+00> : vector<192xf32>
    %19 = vector.multi_reduction <add>, %18, %cst_8 [1] : vector<192x49xf32> to vector<192xf32>
    %20 = vector.shape_cast %19 : vector<192xf32> to vector<192x1xf32>
    %cst_9 = arith.constant 0.0204081628 : f32
    %21 = vector.broadcast %cst_9 : f32 to vector<192x1xf32>
    %22 = arith.mulf %20, %21 : vector<192x1xf32>
    %c0_10 = arith.constant 0 : index
    %c0_11 = arith.constant 0 : index
    %23 = vector.load %arg5[%c0_10, %c0_11] : memref<192x1xf32, #tpu.memory_space<vmem>>, vector<192x1xf32>
    %cst_12 = arith.constant 9.99999974E-6 : f32
    %24 = vector.broadcast %cst_12 : f32 to vector<192x1xf32>
    %25 = arith.addf %22, %24 : vector<192x1xf32>
    %26 = math.rsqrt %25 : vector<192x1xf32>
    %27 = arith.mulf %23, %26 : vector<192x1xf32>
    %28 = vector.broadcast %27 : vector<192x1xf32> to vector<192x49xf32>
    %29 = arith.mulf %17, %28 : vector<192x49xf32>
    %c0_13 = arith.constant 0 : index
    %c0_14 = arith.constant 0 : index
    %30 = vector.load %arg6[%c0_13, %c0_14] : memref<192x1xf32, #tpu.memory_space<vmem>>, vector<192x1xf32>
    %31 = vector.broadcast %30 : vector<192x1xf32> to vector<192x49xf32>
    %32 = arith.addf %29, %31 : vector<192x49xf32>
    %c0_15 = arith.constant 0 : index
    %c0_16 = arith.constant 0 : index
    %33 = vector.load %arg3[%c0_15, %c0_16] : memref<192x49xf32, #tpu.memory_space<vmem>>, vector<192x49xf32>
    %34 = arith.addf %32, %33 : vector<192x49xf32>
    %35 = tpu.transpose %34, [1, 0] : vector<192x49xf32> -> vector<49x192xf32>
    %36 = arith.truncf %35 : vector<49x192xf32> to vector<49x192xbf16>
    %c0_17 = arith.constant 0 : index
    %c0_18 = arith.constant 0 : index
    %37 = vector.load %arg7[%c0_17, %c0_18] : memref<192x1152xbf16, #tpu.memory_space<vmem>>, vector<192x1152xbf16>
    %cst_19 = arith.constant dense<0.000000e+00> : vector<49x1152xf32>
    %38 = tpu.matmul %36, %37, %cst_19 {dimension_numbers = #tpu.dot_dimension_numbers<[1], [0], [0], [1], [0, 0, 1, 1], [], []>} : vector<49x192xbf16>, vector<192x1152xbf16>, vector<49x1152xf32> -> vector<49x1152xf32>
    %39 = tpu.transpose %38, [1, 0] : vector<49x1152xf32> -> vector<1152x49xf32>
    %c0_20 = arith.constant 0 : index
    %c0_21 = arith.constant 0 : index
    %40 = vector.load %arg8[%c0_20, %c0_21] : memref<1152x49xf32, #tpu.memory_space<vmem>>, vector<1152x49xf32>
    tpu.vector_store %arg8[%c0_20, %c0_21], %39 {strides = array<i32>} : memref<1152x49xf32, #tpu.memory_space<vmem>>, vector<1152x49xf32>,
    return
  }
  func.func @transform_0(%arg0: i32) -> (i32, i32) {
    %c0_i32 = arith.constant 0 : i32
    %c0_i32_0 = arith.constant 0 : i32
    %c0_i32_1 = arith.constant 0 : i32
    return %c0_i32, %c0_i32_0 : i32, i32
  }
  func.func @transform_1(%arg0: i32) -> (i32, i32) {
    %c0_i32 = arith.constant 0 : i32
    %c0_i32_0 = arith.constant 0 : i32
    %c0_i32_1 = arith.constant 0 : i32
    return %c0_i32, %c0_i32_0 : i32, i32
  }
  func.func @transform_2(%arg0: i32) -> (i32, i32) {
    %c0_i32 = arith.constant 0 : i32
    %c0_i32_0 = arith.constant 0 : i32
    %c0_i32_1 = arith.constant 0 : i32
    return %c0_i32, %c0_i32_0 : i32, i32
  }
  func.func @transform_3(%arg0: i32) -> (i32, i32) {
    %c0_i32 = arith.constant 0 : i32
    %c0_i32_0 = arith.constant 0 : i32
    %c0_i32_1 = arith.constant 0 : i32
    return %c0_i32, %c0_i32_0 : i32, i32
  }
  func.func @transform_4(%arg0: i32) -> (i32, i32) {
    %c0_i32 = arith.constant 0 : i32
    %c0_i32_0 = arith.constant 0 : i32
    %c0_i32_1 = arith.constant 0 : i32
    return %c0_i32, %c0_i32_0 : i32, i32
  }
  func.func @transform_5(%arg0: i32) -> (i32, i32) {
    %c0_i32 = arith.constant 0 : i32
    %c0_i32_0 = arith.constant 0 : i32
    %c0_i32_1 = arith.constant 0 : i32
    return %c0_i32, %c0_i32_0 : i32, i32
  }
  func.func @transform_6(%arg0: i32) -> (i32, i32) {
    %c0_i32 = arith.constant 0 : i32
    %c0_i32_0 = arith.constant 0 : i32
    %c0_i32_1 = arith.constant 0 : i32
    return %c0_i32, %c0_i32_0 : i32, i32
  }
  func.func @transform_7(%arg0: i32) -> (i32, i32) {
    %c0_i32 = arith.constant 0 : i32
    %c0_i32_0 = arith.constant 0 : i32
    %c0_i32_1 = arith.constant 0 : i32
    return %c0_i32, %c0_i32_0 : i32, i32
  }
}

</mosaic_0001>

<bundles_post_ra>
// kernel: fused_forward.1
= control target key start
LH: loop header
LB: loop body
LE: loop exit
PB: predicated region body
PF: predicated region fallthrough
CT: control target
= control target key end

     0   :  { %v10613_v0 = vmov 0   ;;  %vm3432_vm0 = vcmask 400384   ;;  %vm4873_vm1 = vcmask 523264   ;;  %s10605_s0 = inlined_call_operand.vmem [shape: f32[1152,1], index: 0, kind: input, shape index: {}]   ;;  %s10606_s3 = inlined_call_operand.vmem [shape: bf16[192,1152], index: 3, kind: input, shape index: {}]   ;;  %s10607_s1 = inlined_call_operand.vmem [shape: f32[1152,49], index: 1, kind: input, shape index: {}]   ;;  %s10608_s5 = inlined_call_operand.vmem [shape: f32[192,1], index: 5, kind: input, shape index: {}]   ;;  %s10609_s4 = inlined_call_operand.vmem [shape: f32[192,1], index: 4, kind: input, shape index: {}]   ;;  %s10610_s6 = inlined_call_operand.vmem [shape: bf16[192,1152], index: 6, kind: input, shape index: {}]   ;;  %s10611_s2 = inlined_call_operand.vmem [shape: f32[192,49], index: 2, kind: input, shape index: {}]   ;;  %s10612_s7 = inlined_call_operand.vmem [shape: f32[1152,49], index: 7, kind: output, shape index: {}]  }
   0x1   :  { %6465 = vset.pattern.permute.xlu1 %v10613_v0  ;;  %6464 = vset.pattern.permute.xlu0 %v10613_v0  ;;  %v29_v1 = vld [vmem:[%s10605_s0 + $0x10] sm:$0xff]  ;;  %v27_v2 = vld [vmem:[%s10605_s0] sm:$0xff]  ;;  %v30_v3 = vld [vmem:[%s10605_s0 + $0x18] sm:$0xff] }
   0x2   :  { %v5672_v4 = vmul.f32 -1.442695, %v29_v1  ;;  %v5670_v5 = vmul.f32 -1.442695, %v27_v2  ;;  %v5673_v6 = vmul.f32 -1.442695, %v30_v3 }
   0x3   :  { %v28_v7 = vld [vmem:[%s10605_s0 + $0x8] sm:$0xff]  ;;  %v31_v9 = vld [vmem:[%s10605_s0 + $0x20] sm:$0xff]  ;;  %v34_v13 = vld [vmem:[%s10605_s0 + $0x38] sm:$0xff] }
   0x4   :  { %v32_v8 = vld [vmem:[%s10605_s0 + $0x28] sm:$0xff]  ;;  %6778 = vpow2.f32 %v5672_v4  ;;  %v5671_v10 = vmul.f32 -1.442695, %v28_v7  ;;  %v5674_v12 = vmul.f32 -1.442695, %v31_v9  ;;  %v33_v14 = vld [vmem:[%s10605_s0 + $0x30] sm:$0xff] }
   0x5   :  { %v5675_v11 = vmul.f32 -1.442695, %v32_v8  ;;  %6780 = vpow2.f32 %v5670_v5  ;;  %v57_v15 = vld [vmem:[%s10605_s0 + $0xf0] sm:$0xff]  ;;  %v5677_v16 = vmul.f32 -1.442695, %v34_v13  ;;  %v35_v18 = vld [vmem:[%s10605_s0 + $0x40] sm:$0xff] }
   0x6   :  { %6782 = vpow2.f32 %v5673_v6  ;;  %v5676_v17 = vmul.f32 -1.442695, %v33_v14  ;;  %v41_v19 = vld [vmem:[%s10605_s0 + $0x70] sm:$0xff]  ;;  %v5700_v20 = vmul.f32 -1.442695, %v57_v15  ;;  %v58_v21 = vld [vmem:[%s10605_s0 + $0xf8] sm:$0xff] }
   0x7   :  { %6784 = vpow2.f32 %v5671_v10  ;;  %v5678_v22 = vmul.f32 -1.442695, %v35_v18  ;;  %v55_v23 = vld [vmem:[%s10605_s0 + $0xe0] sm:$0xff]  ;;  %v5684_v24 = vmul.f32 -1.442695, %v41_v19  ;;  %v42_v25 = vld [vmem:[%s10605_s0 + $0x78] sm:$0xff] }
   0x8   :  { %6786 = vpow2.f32 %v5675_v11  ;;  %v5701_v26 = vmul.f32 -1.442695, %v58_v21  ;;  %v39_v27 = vld [vmem:[%s10605_s0 + $0x60] sm:$0xff]  ;;  %v5698_v28 = vmul.f32 -1.442695, %v55_v23  ;;  %v56_v29 = vld [vmem:[%s10605_s0 + $0xe8] sm:$0xff] }
   0x9   :  { %6788 = vpow2.f32 %v5674_v12  ;;  %v5685_v30 = vmul.f32 -1.442695, %v42_v25  ;;  %v5682_v31 = vmul.f32 -1.442695, %v39_v27  ;;  %v5699_v32 = vmul.f32 -1.442695, %v56_v29 }
   0xa   :  { %6790 = vpow2.f32 %v5677_v16  ;;  %v53_v58 = vld [vmem:[%s10605_s0 + $0xd0] sm:$0xff]  ;;  %v40_v61 = vld [vmem:[%s10605_s0 + $0x68] sm:$0xff]  ;;  %v54_v5 = vld [vmem:[%s10605_s0 + $0xd8] sm:$0xff] }
   0xb   :  { %6792 = vpow2.f32 %v5676_v17  ;;  %v37_v1 = vld [vmem:[%s10605_s0 + $0x50] sm:$0xff]  ;;  %v5696_v4 = vmul.f32 -1.442695, %v53_v58  ;;  %v5683_v8 = vmul.f32 -1.442695, %v40_v61  ;;  %v51_v9 = vld [vmem:[%s10605_s0 + $0xc0] sm:$0xff] }
   0xc   :  { %6794 = vpow2.f32 %v5700_v20  ;;  %v5680_v11 = vmul.f32 -1.442695, %v37_v1  ;;  %v38_v12 = vld [vmem:[%s10605_s0 + $0x58] sm:$0xff]  ;;  %v5697_v14 = vmul.f32 -1.442695, %v54_v5  ;;  %v36_v15 = vld [vmem:[%s10605_s0 + $0x48] sm:$0xff] }
   0xd   :  { %6796 = vpow2.f32 %v5678_v22  ;;  %v5694_v17 = vmul.f32 -1.442695, %v51_v9  ;;  %v52_v18 = vld [vmem:[%s10605_s0 + $0xc8] sm:$0xff]  ;;  %v5681_v20 = vmul.f32 -1.442695, %v38_v12  ;;  %v50_v21 = vld [vmem:[%s10605_s0 + $0xb8] sm:$0xff] }
   0xe   :  { %6798 = vpow2.f32 %v5684_v24  ;;  %v5679_v23 = vmul.f32 -1.442695, %v36_v15  ;;  %v49_v24 = vld [vmem:[%s10605_s0 + $0xb0] sm:$0xff]  ;;  %v48_v27 = vld [vmem:[%s10605_s0 + $0xa8] sm:$0xff]  ;;  %v5693_v29 = vmul.f32 -1.442695, %v50_v21 }
   0xf   :  { %6800 = vpow2.f32 %v5701_v26  ;;  %v5695_v26 = vmul.f32 -1.442695, %v52_v18  ;;  %v90_v12 = vld [vmem:[%s10605_s0 + $0x1f8] sm:$0xff]  ;;  %v89_v15 = vld [vmem:[%s10605_s0 + $0x1f0] sm:$0xff] }
  0x10   :  { %6802 = vpow2.f32 %v5698_v28  ;;  %v74_v18 = vld [vmem:[%s10605_s0 + $0x178] sm:$0xff]  ;;  %v5733_v21 = vmul.f32 -1.442695, %v90_v12 }
  0x11   :  { %v6779_v33 = vpop.eup %6778  ;;  %6804 = vpow2.f32 %v5685_v30  ;;  %v47_v30 = vld [vmem:[%s10605_s0 + $0xa0] sm:$0xff] }
  0x12   :  { %v6781_v34 = vpop.eup %6780  ;;  %v605_v35 = vadd.f32 1.0, %v6779_v33  ;;  %6806 = vpow2.f32 %v5682_v31  ;;  %v46_v33 = vld [vmem:[%s10605_s0 + $0x98] sm:$0xff] }
  0x13   :  { %v6783_v36 = vpop.eup %6782  ;;  %v603_v37 = vadd.f32 1.0, %v6781_v34  ;;  %6808 = vpow2.f32 %v5699_v32  ;;  %v5692_v32 = vmul.f32 -1.442695, %v49_v24 }
  0x14   :  { %v6785_v38 = vpop.eup %6784  ;;  %6810 = vrcp.f32 %v605_v35  ;;  %v606_v39 = vadd.f32 1.0, %v6783_v36  ;;  %v5691_v35 = vmul.f32 -1.442695, %v48_v27  ;;  %v45_v36 = vld [vmem:[%s10605_s0 + $0x90] sm:$0xff] }
  0x15   :  { %v6787_v40 = vpop.eup %6786  ;;  %6812 = vrcp.f32 %v603_v37  ;;  %v604_v41 = vadd.f32 1.0, %v6785_v38  ;;  %v5690_v38 = vmul.f32 -1.442695, %v47_v30 }
  0x16   :  { %v6789_v42 = vpop.eup %6788  ;;  %6814 = vrcp.f32 %v606_v39  ;;  %v608_v43 = vadd.f32 1.0, %v6787_v40  ;;  %v44_v39 = vld [vmem:[%s10605_s0 + $0x88] sm:$0xff] }
  0x17   :  { %v6791_v44 = vpop.eup %6790  ;;  %6816 = vrcp.f32 %v604_v41  ;;  %v607_v45 = vadd.f32 1.0, %v6789_v42  ;;  %v5689_v41 = vmul.f32 -1.442695, %v46_v33  ;;  %v43_v42 = vld [vmem:[%s10605_s0 + $0x80] sm:$0xff] }
  0x18   :  { %v6793_v46 = vpop.eup %6792  ;;  %6818 = vrcp.f32 %v608_v43  ;;  %v610_v47 = vadd.f32 1.0, %v6791_v44  ;;  %v5688_v44 = vmul.f32 -1.442695, %v45_v36 }
  0x19   :  { %v6795_v48 = vpop.eup %6794  ;;  %6820 = vrcp.f32 %v607_v45  ;;  %v609_v49 = vadd.f32 1.0, %v6793_v46  ;;  %v5687_v46 = vmul.f32 -1.442695, %v44_v39 }
  0x1a   :  { %v6797_v50 = vpop.eup %6796  ;;  %6822 = vrcp.f32 %v610_v47  ;;  %v633_v51 = vadd.f32 1.0, %v6795_v48  ;;  %v5686_v48 = vmul.f32 -1.442695, %v43_v42 }
  0x1b   :  { %v6799_v52 = vpop.eup %6798  ;;  %6824 = vrcp.f32 %v609_v49  ;;  %v611_v53 = vadd.f32 1.0, %v6797_v50 }
  0x1c   :  { %v6801_v54 = vpop.eup %6800  ;;  %6826 = vrcp.f32 %v633_v51  ;;  %v617_v55 = vadd.f32 1.0, %v6799_v52 }
  0x1d   :  { %v6803_v56 = vpop.eup %6802  ;;  %6828 = vrcp.f32 %v611_v53  ;;  %v634_v57 = vadd.f32 1.0, %v6801_v54 }
  0x1e   :  { %v6805_v59 = vpop.eup %6804  ;;  %6830 = vrcp.f32 %v617_v55  ;;  %v631_v60 = vadd.f32 1.0, %v6803_v56 }
  0x1f   :  { %v6807_v62 = vpop.eup %6806  ;;  %6832 = vrcp.f32 %v634_v57  ;;  %v618_v63 = vadd.f32 1.0, %v6805_v59 }
  0x20   :  { %v6809_v2 = vpop.eup %6808  ;;  %6834 = vrcp.f32 %v631_v60  ;;  %v615_v3 = vadd.f32 1.0, %v6807_v62 }
  0x21   :  { %v6811_v6 = vpop.eup %6810  ;;  %6836 = vrcp.f32 %v618_v63  ;;  %v632_v7 = vadd.f32 1.0, %v6809_v2 }
  0x22   :  { %v6813_v10 = vpop.eup %6812  ;;  %1191 = vperm.xlu1 %6465, %v6811_v6   ;;  %6838 = vrcp.f32 %v615_v3 }
  0x23   :  { %v6815_v13 = vpop.eup %6814  ;;  %1181 = vperm.xlu0 %6464, %v6813_v10   ;;  %6840 = vrcp.f32 %v632_v7 }
  0x24   :  { %v6817_v16 = vpop.eup %6816  ;;  %6842 = vpow2.f32 %v5696_v4 }
  0x25   :  { %v6819_v19 = vpop.eup %6818  ;;  %6844 = vpow2.f32 %v5683_v8 }
  0x26   :  { %v6821_v22 = vpop.eup %6820  ;;  %1196 = vperm.xlu1 %6465, %v6815_v13   ;;  %6846 = vpow2.f32 %v5680_v11 }
  0x27   :  { %v6823_v25 = vpop.eup %6822  ;;  %1186 = vperm.xlu0 %6464, %v6817_v16   ;;  %6848 = vpow2.f32 %v5697_v14 }
  0x28   :  { %v6825_v28 = vpop.eup %6824  ;;  %6850 = vpow2.f32 %v5694_v17 }
  0x29   :  { %v6827_v31 = vpop.eup %6826  ;;  %6852 = vpow2.f32 %v5681_v20 }
  0x2a   :  { %v6829_v34 = vpop.eup %6828  ;;  %1206 = vperm.xlu1 %6465, %v6819_v19   ;;  %6854 = vpow2.f32 %v5679_v23 }
  0x2b   :  { %v6831_v37 = vpop.eup %6830  ;;  %1201 = vperm.xlu0 %6464, %v6821_v22   ;;  %6856 = vpow2.f32 %v5695_v26  ;;  %v73_v22 = vld [vmem:[%s10605_s0 + $0x170] sm:$0xff]  ;;  %v88_v26 = vld [vmem:[%s10605_s0 + $0x1e8] sm:$0xff] }
  0x2c   :  { %v6833_v40 = vpop.eup %6832  ;;  %6858 = vpow2.f32 %v5693_v29  ;;  %v87_v29 = vld [vmem:[%s10605_s0 + $0x1e0] sm:$0xff] }
  0x2d   :  { %v6835_v43 = vpop.eup %6834  ;;  %6860 = vpow2.f32 %v5692_v32  ;;  %v72_v32 = vld [vmem:[%s10605_s0 + $0x168] sm:$0xff] }
  0x2e   :  { %v6837_v45 = vpop.eup %6836  ;;  %1216 = vperm.xlu1 %6465, %v6823_v25   ;;  %6862 = vpow2.f32 %v5691_v35  ;;  %v5732_v25 = vmul.f32 -1.442695, %v89_v15  ;;  %v71_v35 = vld [vmem:[%s10605_s0 + $0x160] sm:$0xff] }
  0x2f   :  { %v6839_v47 = vpop.eup %6838  ;;  %1211 = vperm.xlu0 %6464, %v6825_v28   ;;  %6864 = vpow2.f32 %v5690_v38  ;;  %v5717_v28 = vmul.f32 -1.442695, %v74_v18  ;;  %v86_v38 = vld [vmem:[%s10605_s0 + $0x1d8] sm:$0xff] }
  0x30   :  { %v6841_v49 = vpop.eup %6840  ;;  %6866 = vpow2.f32 %v5689_v41  ;;  %v85_v41 = vld [vmem:[%s10605_s0 + $0x1d0] sm:$0xff] }
  0x31   :  { %v6843_v50 = vpop.eup %6842  ;;  %6868 = vpow2.f32 %v5688_v44  ;;  %v70_v44 = vld [vmem:[%s10605_s0 + $0x158] sm:$0xff] }
  0x32   :  { %v6845_v51 = vpop.eup %6844  ;;  %1331 = vperm.xlu1 %6465, %v6827_v31   ;;  %v629_v52 = vadd.f32 1.0, %v6843_v50  ;;  %6870 = vpow2.f32 %v5687_v46  ;;  %v5716_v31 = vmul.f32 -1.442695, %v73_v22  ;;  %v5729_v46 = vmul.f32 -1.442695, %v86_v38  ;;  %v84_v50 = vld [vmem:[%s10605_s0 + $0x1c8] sm:$0xff] }
  0x33   :  { %v6847_v53 = vpop.eup %6846  ;;  %1221 = vperm.xlu0 %6464, %v6829_v34   ;;  %v616_v54 = vadd.f32 1.0, %v6845_v51  ;;  %6872 = vpow2.f32 %v5686_v48  ;;  %v5731_v34 = vmul.f32 -1.442695, %v88_v26 }
  0x34   :  { %v6849_v55 = vpop.eup %6848  ;;  %6874 = vrcp.f32 %v629_v52  ;;  %v613_v56 = vadd.f32 1.0, %v6847_v53  ;;  %v5713_v52 = vmul.f32 -1.442695, %v70_v44  ;;  %v83_v53 = vld [vmem:[%s10605_s0 + $0x1c0] sm:$0xff] }
  0x35   :  { %v6851_v57 = vpop.eup %6850  ;;  %6876 = vrcp.f32 %v616_v54  ;;  %v630_v58 = vadd.f32 1.0, %v6849_v55 }
  0x36   :  { %v6853_v59 = vpop.eup %6852  ;;  %1251 = vperm.xlu1 %6465, %v6831_v37   ;;  %6878 = vrcp.f32 %v613_v56  ;;  %v627_v60 = vadd.f32 1.0, %v6851_v57  ;;  %v5730_v37 = vmul.f32 -1.442695, %v87_v29  ;;  %v68_v56 = vld [vmem:[%s10605_s0 + $0x148] sm:$0xff]  ;;  %v82_v29 = vld [vmem:[%s10605_s0 + $0x1b8] sm:$0xff] }
  0x37   :  { %v6855_v61 = vpop.eup %6854  ;;  %1336 = vperm.xlu0 %6464, %v6833_v40   ;;  %6880 = vrcp.f32 %v630_v58  ;;  %v614_v62 = vadd.f32 1.0, %v6853_v59  ;;  %v5715_v40 = vmul.f32 -1.442695, %v72_v32  ;;  %v5727_v58 = vmul.f32 -1.442695, %v84_v50  ;;  %v67_v59 = vld [vmem:[%s10605_s0 + $0x140] sm:$0xff] }
  0x38   :  { %v6857_v63 = vpop.eup %6856  ;;  %6882 = vrcp.f32 %v627_v60  ;;  %v612_v1 = vadd.f32 1.0, %v6855_v61  ;;  %v5726_v61 = vmul.f32 -1.442695, %v83_v53  ;;  %v81_v32 = vld [vmem:[%s10605_s0 + $0x1b0] sm:$0xff]  ;;  %v5725_v38 = vmul.f32 -1.442695, %v82_v29 }
  0x39   :  { %v6859_v2 = vpop.eup %6858  ;;  %6884 = vrcp.f32 %v614_v62  ;;  %v628_v3 = vadd.f32 1.0, %v6857_v63  ;;  %v5711_v63 = vmul.f32 -1.442695, %v68_v56 }
  0x3a   :  { %v6861_v4 = vpop.eup %6860  ;;  %1321 = vperm.xlu1 %6465, %v6835_v43   ;;  %6886 = vrcp.f32 %v612_v1  ;;  %v626_v5 = vadd.f32 1.0, %v6859_v2  ;;  %v5714_v43 = vmul.f32 -1.442695, %v71_v35  ;;  %v5710_v2 = vmul.f32 -1.442695, %v67_v59  ;;  %v66_v35 = vld [vmem:[%s10605_s0 + $0x138] sm:$0xff] }
  0x3b   :  { %v6863_v6 = vpop.eup %6862  ;;  %1256 = vperm.xlu0 %6464, %v6837_v45   ;;  %6888 = vrcp.f32 %v628_v3  ;;  %v625_v7 = vadd.f32 1.0, %v6861_v4 }
  0x3c   :  { %v6865_v8 = vpop.eup %6864  ;;  %6890 = vrcp.f32 %v626_v5  ;;  %v624_v9 = vadd.f32 1.0, %v6863_v6 }
  0x3d   :  { %v6867_v10 = vpop.eup %6866  ;;  %6892 = vrcp.f32 %v625_v7  ;;  %v623_v11 = vadd.f32 1.0, %v6865_v8 }
  0x3e   :  { %v6869_v13 = vpop.eup %6868  ;;  %1241 = vperm.xlu1 %6465, %v6839_v47   ;;  %6894 = vrcp.f32 %v624_v9  ;;  %v622_v14 = vadd.f32 1.0, %v6867_v10  ;;  %v69_v47 = vld [vmem:[%s10605_s0 + $0x150] sm:$0xff] }
  0x3f   :  { %v6871_v16 = vpop.eup %6870  ;;  %1326 = vperm.xlu0 %6464, %v6841_v49   ;;  %6896 = vrcp.f32 %v623_v11  ;;  %v621_v17 = vadd.f32 1.0, %v6869_v13  ;;  %v5728_v49 = vmul.f32 -1.442695, %v85_v41  ;;  %v5712_v55 = vmul.f32 -1.442695, %v69_v47 }
  0x40   :  { %v6873_v19 = vpop.eup %6872  ;;  %6898 = vrcp.f32 %v622_v14  ;;  %v620_v20 = vadd.f32 1.0, %v6871_v16 }
  0x41   :  { %v6875_v23 = vpop.eup %6874  ;;  %6900 = vrcp.f32 %v621_v17  ;;  %v619_v24 = vadd.f32 1.0, %v6873_v19 }
  0x42   :  { %v6877_v27 = vpop.eup %6876  ;;  %1311 = vperm.xlu1 %6465, %v6875_v23   ;;  %6902 = vrcp.f32 %v620_v20 }
  0x43   :  { %v6879_v30 = vpop.eup %6878  ;;  %1246 = vperm.xlu0 %6464, %v6877_v27   ;;  %6904 = vrcp.f32 %v619_v24 }
  0x44   :  { %v6881_v33 = vpop.eup %6880  ;;  %6906 = vpow2.f32 %v5733_v21 }
  0x45   :  { %v6883_v36 = vpop.eup %6882  ;;  %6908 = vpow2.f32 %v5732_v25 }
  0x46   :  { %v6885_v39 = vpop.eup %6884  ;;  %1231 = vperm.xlu1 %6465, %v6879_v30   ;;  %6910 = vpow2.f32 %v5717_v28 }
  0x47   :  { %v6887_v42 = vpop.eup %6886  ;;  %1316 = vperm.xlu0 %6464, %v6881_v33   ;;  %6912 = vpow2.f32 %v5716_v31 }
  0x48   :  { %v6889_v45 = vpop.eup %6888  ;;  %6914 = vpow2.f32 %v5731_v34 }
  0x49   :  { %v6891_v48 = vpop.eup %6890  ;;  %6916 = vpow2.f32 %v5730_v37 }
  0x4a   :  { %v6893_v51 = vpop.eup %6892  ;;  %1301 = vperm.xlu1 %6465, %v6883_v36   ;;  %6918 = vpow2.f32 %v5715_v40 }
  0x4b   :  { %v6895_v54 = vpop.eup %6894  ;;  %1236 = vperm.xlu0 %6464, %v6885_v39   ;;  %6920 = vpow2.f32 %v5714_v43  ;;  %v65_v39 = vld [vmem:[%s10605_s0 + $0x130] sm:$0xff]  ;;  %v80_v43 = vld [vmem:[%s10605_s0 + $0x1a8] sm:$0xff] }
  0x4c   :  { %v6897_v57 = vpop.eup %6896  ;;  %6922 = vpow2.f32 %v5729_v46  ;;  %v79_v46 = vld [vmem:[%s10605_s0 + $0x1a0] sm:$0xff] }
  0x4d   :  { %v6899_v60 = vpop.eup %6898  ;;  %6924 = vpow2.f32 %v5728_v49  ;;  %v64_v49 = vld [vmem:[%s10605_s0 + $0x128] sm:$0xff] }
  0x4e   :  { %v6901_v62 = vpop.eup %6900  ;;  %1226 = vperm.xlu1 %6465, %v6887_v42   ;;  %6926 = vpow2.f32 %v5713_v52  ;;  %v5724_v42 = vmul.f32 -1.442695, %v81_v32  ;;  %v63_v52 = vld [vmem:[%s10605_s0 + $0x120] sm:$0xff] }
  0x4f   :  { %v6903_v1 = vpop.eup %6902  ;;  %1306 = vperm.xlu0 %6464, %v6889_v45   ;;  %6928 = vpow2.f32 %v5712_v55  ;;  %v5709_v45 = vmul.f32 -1.442695, %v66_v35  ;;  %v78_v55 = vld [vmem:[%s10605_s0 + $0x198] sm:$0xff] }
  0x50   :  { %v6905_v3 = vpop.eup %6904  ;;  %6930 = vpow2.f32 %v5727_v58  ;;  %v77_v58 = vld [vmem:[%s10605_s0 + $0x190] sm:$0xff] }
  0x51   :  { %v6907_v4 = vpop.eup %6906  ;;  %6932 = vpow2.f32 %v5726_v61  ;;  %v62_v61 = vld [vmem:[%s10605_s0 + $0x118] sm:$0xff] }
  0x52   :  { %v6909_v5 = vpop.eup %6908  ;;  %1296 = vperm.xlu1 %6465, %v6891_v48   ;;  %v666_v6 = vadd.f32 1.0, %v6907_v4  ;;  %6934 = vpow2.f32 %v5711_v63  ;;  %v5708_v48 = vmul.f32 -1.442695, %v65_v39  ;;  %v5721_v63 = vmul.f32 -1.442695, %v78_v55  ;;  %v76_v4 = vld [vmem:[%s10605_s0 + $0x188] sm:$0xff] }
  0x53   :  { %v6911_v7 = vpop.eup %6910  ;;  %1291 = vperm.xlu0 %6464, %v6893_v51   ;;  %v665_v8 = vadd.f32 1.0, %v6909_v5  ;;  %6936 = vpow2.f32 %v5710_v2  ;;  %v5723_v51 = vmul.f32 -1.442695, %v80_v43 }
  0x54   :  { %v6913_v9 = vpop.eup %6912  ;;  %6938 = vrcp.f32 %v666_v6  ;;  %v650_v10 = vadd.f32 1.0, %v6911_v7  ;;  %v5705_v6 = vmul.f32 -1.442695, %v62_v61  ;;  %v75_v7 = vld [vmem:[%s10605_s0 + $0x180] sm:$0xff]  ;;  %v120_v61 = vld [vmem:[%s10605_s0 + $0x2e8] sm:$0xff] }
  0x55   :  { %v6915_v11 = vpop.eup %6914  ;;  %6940 = vrcp.f32 %v665_v8  ;;  %v649_v12 = vadd.f32 1.0, %v6913_v9 }
  0x56   :  { %v6917_v13 = vpop.eup %6916  ;;  %1286 = vperm.xlu1 %6465, %v6895_v54   ;;  %6942 = vrcp.f32 %v650_v10  ;;  %v664_v14 = vadd.f32 1.0, %v6915_v11  ;;  %v5722_v54 = vmul.f32 -1.442695, %v79_v46  ;;  %v60_v10 = vld [vmem:[%s10605_s0 + $0x108] sm:$0xff] }
  0x57   :  { %v6919_v15 = vpop.eup %6918  ;;  %1281 = vperm.xlu0 %6464, %v6897_v57   ;;  %6944 = vrcp.f32 %v649_v12  ;;  %v663_v16 = vadd.f32 1.0, %v6917_v13  ;;  %v5707_v57 = vmul.f32 -1.442695, %v64_v49  ;;  %v5719_v12 = vmul.f32 -1.442695, %v76_v4  ;;  %v59_v13 = vld [vmem:[%s10605_s0 + $0x100] sm:$0xff] }
  0x58   :  { %v6921_v17 = vpop.eup %6920  ;;  %6946 = vrcp.f32 %v664_v14  ;;  %v648_v18 = vadd.f32 1.0, %v6919_v15  ;;  %v5718_v15 = vmul.f32 -1.442695, %v75_v7  ;;  %v104_v4 = vld [vmem:[%s10605_s0 + $0x268] sm:$0xff]  ;;  %v5763_v7 = vmul.f32 -1.442695, %v120_v61 }
  0x59   :  { %v6923_v19 = vpop.eup %6922  ;;  %6948 = vrcp.f32 %v663_v16  ;;  %v647_v20 = vadd.f32 1.0, %v6921_v17  ;;  %v5703_v17 = vmul.f32 -1.442695, %v60_v10  ;;  %v118_v10 = vld [vmem:[%s10605_s0 + $0x2d8] sm:$0xff] }
  0x5a   :  { %v6925_v21 = vpop.eup %6924  ;;  %1276 = vperm.xlu1 %6465, %v6899_v60   ;;  %6950 = vrcp.f32 %v648_v18  ;;  %v662_v22 = vadd.f32 1.0, %v6923_v19  ;;  %v5706_v60 = vmul.f32 -1.442695, %v63_v52  ;;  %v5702_v19 = vmul.f32 -1.442695, %v59_v13  ;;  %v117_v13 = vld [vmem:[%s10605_s0 + $0x2d0] sm:$0xff] }
  0x5b   :  { %v6927_v23 = vpop.eup %6926  ;;  %1271 = vperm.xlu0 %6464, %v6901_v62   ;;  %6952 = vrcp.f32 %v647_v20  ;;  %v661_v24 = vadd.f32 1.0, %v6925_v21 }
  0x5c   :  { %v6929_v25 = vpop.eup %6928  ;;  %6954 = vrcp.f32 %v662_v22  ;;  %v646_v26 = vadd.f32 1.0, %v6927_v23 }
  0x5d   :  { %v6931_v27 = vpop.eup %6930  ;;  %6956 = vrcp.f32 %v661_v24  ;;  %v645_v28 = vadd.f32 1.0, %v6929_v25 }
  0x5e   :  { %v6933_v30 = vpop.eup %6932  ;;  %1266 = vperm.xlu1 %6465, %v6903_v1   ;;  %6958 = vrcp.f32 %v646_v26  ;;  %v660_v31 = vadd.f32 1.0, %v6931_v27  ;;  %v61_v1 = vld [vmem:[%s10605_s0 + $0x110] sm:$0xff] }
  0x5f   :  { %v6935_v33 = vpop.eup %6934  ;;  %1261 = vperm.xlu0 %6464, %v6905_v3   ;;  %6960 = vrcp.f32 %v645_v28  ;;  %v659_v34 = vadd.f32 1.0, %v6933_v30  ;;  %v5720_v3 = vmul.f32 -1.442695, %v77_v58  ;;  %v5704_v9 = vmul.f32 -1.442695, %v61_v1  ;;  %v119_v1 = vld [vmem:[%s10605_s0 + $0x2e0] sm:$0xff] }
  0x60   :  { %v6937_v36 = vpop.eup %6936  ;;  %6962 = vrcp.f32 %v660_v31  ;;  %v644_v37 = vadd.f32 1.0, %v6935_v33 }
  0x61   :  { %v6939_v40 = vpop.eup %6938  ;;  %6964 = vrcp.f32 %v659_v34  ;;  %v643_v41 = vadd.f32 1.0, %v6937_v36 }
  0x62   :  { %v6941_v44 = vpop.eup %6940  ;;  %1496 = vperm.xlu1 %6465, %v6939_v40   ;;  %6966 = vrcp.f32 %v644_v37 }
  0x63   :  { %v6943_v47 = vpop.eup %6942  ;;  %1491 = vperm.xlu0 %6464, %v6941_v44   ;;  %6968 = vrcp.f32 %v643_v41 }
  0x64   :  { %v6945_v50 = vpop.eup %6944  ;;  %6970 = vpow2.f32 %v5725_v38 }
  0x65   :  { %v6947_v53 = vpop.eup %6946  ;;  %6972 = vpow2.f32 %v5724_v42  ;;  %v6468_v42 = vld [vmem:[%s10606_s3 + $0x4] ss:$36 sps:$4 sm:$0xff]  }
  0x66   :  { %v6949_v56 = vpop.eup %6948  ;;  %1416 = vperm.xlu1 %6465, %v6943_v47   ;;  %6974 = vpow2.f32 %v5709_v45  ;;  %v122_v47 = vld [vmem:[%s10605_s0 + $0x2f8] sm:$0xff]  ;;  %2819 = vmatprep.mubr.bf16.mxu0 %v6468_v42 }
  0x67   :  { %v6951_v59 = vpop.eup %6950  ;;  %1411 = vperm.xlu0 %6464, %v6945_v50   ;;  %6976 = vpow2.f32 %v5708_v48  ;;  %v121_v50 = vld [vmem:[%s10605_s0 + $0x2f0] sm:$0xff] }
  0x68   :  { %v6953_v62 = vpop.eup %6952  ;;  %6978 = vpow2.f32 %v5723_v51 }
  0x69   :  { %v6955_v2 = vpop.eup %6954  ;;  %6980 = vpow2.f32 %v5722_v54 }
  0x6a   :  { %v6957_v5 = vpop.eup %6956  ;;  %1486 = vperm.xlu1 %6465, %v6947_v53   ;;  %6982 = vpow2.f32 %v5707_v57  ;;  %v106_v53 = vld [vmem:[%s10605_s0 + $0x278] sm:$0xff]  ;;  %v105_v57 = vld [vmem:[%s10605_s0 + $0x270] sm:$0xff] }
  0x6b   :  { %v6959_v8 = vpop.eup %6958  ;;  %1481 = vperm.xlu0 %6464, %v6949_v56   ;;  %6984 = vpow2.f32 %v5706_v60  ;;  %v5765_v56 = vmul.f32 -1.442695, %v122_v47  ;;  %v5764_v60 = vmul.f32 -1.442695, %v121_v50 }
  0x6c   :  { %v6961_v11 = vpop.eup %6960  ;;  %6986 = vpow2.f32 %v5721_v63  ;;  %v5749_v63 = vmul.f32 -1.442695, %v106_v53 }
  0x6d   :  { %v6963_v14 = vpop.eup %6962  ;;  %6988 = vpow2.f32 %v5720_v3  ;;  %v5748_v3 = vmul.f32 -1.442695, %v105_v57 }
  0x6e   :  { %v6965_v16 = vpop.eup %6964  ;;  %1406 = vperm.xlu1 %6465, %v6951_v59   ;;  %6990 = vpow2.f32 %v5705_v6 }
  0x6f   :  { %v6967_v18 = vpop.eup %6966  ;;  %1401 = vperm.xlu0 %6464, %v6953_v62   ;;  %6992 = vpow2.f32 %v5704_v9  ;;  %v5762_v9 = vmul.f32 -1.442695, %v119_v1 }
  0x70   :  { %v6969_v20 = vpop.eup %6968  ;;  %6994 = vpow2.f32 %v5719_v12  ;;  %v5747_v12 = vmul.f32 -1.442695, %v104_v4 }
  0x71   :  { %v6971_v21 = vpop.eup %6970  ;;  %6996 = vpow2.f32 %v5718_v15 }
  0x72   :  { %v6973_v22 = vpop.eup %6972  ;;  %1476 = vperm.xlu1 %6465, %v6955_v2   ;;  %v658_v23 = vadd.f32 1.0, %v6971_v21  ;;  %6998 = vpow2.f32 %v5703_v17  ;;  %v101_v17 = vld [vmem:[%s10605_s0 + $0x250] sm:$0xff]  ;;  %v5760_v21 = vmul.f32 -1.442695, %v117_v13 }
  0x73   :  { %v6975_v24 = vpop.eup %6974  ;;  %1471 = vperm.xlu0 %6464, %v6957_v5   ;;  %v657_v25 = vadd.f32 1.0, %v6973_v22  ;;  %7000 = vpow2.f32 %v5702_v19  ;;  %v103_v5 = vld [vmem:[%s10605_s0 + $0x260] sm:$0xff]  ;;  %v5761_v19 = vmul.f32 -1.442695, %v118_v10  ;;  %v116_v22 = vld [vmem:[%s10605_s0 + $0x2c8] sm:$0xff] }
  0x74   :  { %v6977_v26 = vpop.eup %6976  ;;  %7002 = vrcp.f32 %v658_v23  ;;  %v642_v27 = vadd.f32 1.0, %v6975_v24  ;;  %v6492_v10 = vld [vmem:[%s10606_s3 + $0xc] ss:$36 sps:$4 sm:$0xff]  }
  0x75   :  { %v6979_v28 = vpop.eup %6978  ;;  %7004 = vrcp.f32 %v657_v25  ;;  %v641_v29 = vadd.f32 1.0, %v6977_v26  ;;  %v115_v25 = vld [vmem:[%s10605_s0 + $0x2c0] sm:$0xff]  ;;  %2948 = vmatprep.mubr.bf16.mxu1 %v6492_v10 }
  0x76   :  { %v6981_v30 = vpop.eup %6980  ;;  %1396 = vperm.xlu1 %6465, %v6959_v8   ;;  %7006 = vrcp.f32 %v642_v27  ;;  %v656_v31 = vadd.f32 1.0, %v6979_v28  ;;  %v5744_v27 = vmul.f32 -1.442695, %v101_v17  ;;  %v100_v28 = vld [vmem:[%s10605_s0 + $0x248] sm:$0xff] }
  0x77   :  { %v6983_v32 = vpop.eup %6982  ;;  %1391 = vperm.xlu0 %6464, %v6961_v11   ;;  %7008 = vrcp.f32 %v641_v29  ;;  %v655_v33 = vadd.f32 1.0, %v6981_v30  ;;  %v99_v29 = vld [vmem:[%s10605_s0 + $0x240] sm:$0xff] }
  0x78   :  { %v6985_v34 = vpop.eup %6984  ;;  %7010 = vrcp.f32 %v656_v31  ;;  %v640_v35 = vadd.f32 1.0, %v6983_v32  ;;  %v5759_v31 = vmul.f32 -1.442695, %v116_v22 }
  0x79   :  { %v6987_v36 = vpop.eup %6986  ;;  %7012 = vrcp.f32 %v655_v33  ;;  %v639_v37 = vadd.f32 1.0, %v6985_v34  ;;  %v5758_v33 = vmul.f32 -1.442695, %v115_v25 }
  0x7a   :  { %v6989_v38 = vpop.eup %6988  ;;  %1466 = vperm.xlu1 %6465, %v6963_v14   ;;  %7014 = vrcp.f32 %v640_v35  ;;  %v654_v39 = vadd.f32 1.0, %v6987_v36  ;;  %v102_v14 = vld [vmem:[%s10605_s0 + $0x258] sm:$0xff]  ;;  %v5743_v35 = vmul.f32 -1.442695, %v100_v28 }
  0x7b   :  { %v6991_v40 = vpop.eup %6990  ;;  %1461 = vperm.xlu0 %6464, %v6965_v16   ;;  %7016 = vrcp.f32 %v639_v37  ;;  %v653_v41 = vadd.f32 1.0, %v6989_v38  ;;  %v5746_v16 = vmul.f32 -1.442695, %v103_v5  ;;  %v5745_v24 = vmul.f32 -1.442695, %v102_v14  ;;  %v97_v14 = vld [vmem:[%s10605_s0 + $0x230] sm:$0xff] }
  0x7c   :  { %v6993_v43 = vpop.eup %6992  ;;  %7018 = vrcp.f32 %v654_v39  ;;  %v638_v44 = vadd.f32 1.0, %v6991_v40  ;;  %v5742_v37 = vmul.f32 -1.442695, %v99_v29 }
  0x7d   :  { %v6995_v45 = vpop.eup %6994  ;;  %7020 = vrcp.f32 %v653_v41  ;;  %v637_v46 = vadd.f32 1.0, %v6993_v43 }
  0x7e   :  { %v6997_v48 = vpop.eup %6996  ;;  %1386 = vperm.xlu1 %6465, %v6967_v18   ;;  %7022 = vrcp.f32 %v638_v44  ;;  %v652_v49 = vadd.f32 1.0, %v6995_v45 }
  0x7f   :  { %v6999_v51 = vpop.eup %6998  ;;  %1381 = vperm.xlu0 %6464, %v6969_v20   ;;  %7024 = vrcp.f32 %v637_v46  ;;  %v651_v52 = vadd.f32 1.0, %v6997_v48 }
  0x80   :  { %v7001_v54 = vpop.eup %7000  ;;  %7026 = vrcp.f32 %v652_v49  ;;  %v636_v55 = vadd.f32 1.0, %v6999_v51 }
  0x81   :  { %v7003_v58 = vpop.eup %7002  ;;  %7028 = vrcp.f32 %v651_v52  ;;  %v635_v59 = vadd.f32 1.0, %v7001_v54 }
  0x82   :  { %v7005_v62 = vpop.eup %7004  ;;  %1456 = vperm.xlu1 %6465, %v7003_v58   ;;  %7030 = vrcp.f32 %v636_v55 }
  0x83   :  { %v7007_v2 = vpop.eup %7006  ;;  %1451 = vperm.xlu0 %6464, %v7005_v62   ;;  %7032 = vrcp.f32 %v635_v59 }
  0x84   :  { %v7009_v6 = vpop.eup %7008  ;;  %7034 = vpow2.f32 %v5765_v56 }
  0x85   :  { %v7011_v8 = vpop.eup %7010  ;;  %7036 = vpow2.f32 %v5764_v60 }
  0x86   :  { %v7013_v11 = vpop.eup %7012  ;;  %1376 = vperm.xlu1 %6465, %v7007_v2   ;;  %7038 = vpow2.f32 %v5749_v63  ;;  %v114_v2 = vld [vmem:[%s10605_s0 + $0x2b8] sm:$0xff] }
  0x87   :  { %v7015_v15 = vpop.eup %7014  ;;  %1371 = vperm.xlu0 %6464, %v7009_v6   ;;  %7040 = vpow2.f32 %v5748_v3  ;;  %v113_v6 = vld [vmem:[%s10605_s0 + $0x2b0] sm:$0xff]  ;;  %v5757_v13 = vmul.f32 -1.442695, %v114_v2 }
  0x88   :  { %v7017_v18 = vpop.eup %7016  ;;  %7042 = vpow2.f32 %v5763_v7 }
  0x89   :  { %v7019_v20 = vpop.eup %7018  ;;  %7044 = vpow2.f32 %v5762_v9  ;;  %v98_v9 = vld [vmem:[%s10605_s0 + $0x238] sm:$0xff] }
  0x8a   :  { %v7021_v23 = vpop.eup %7020  ;;  %1446 = vperm.xlu1 %6465, %v7011_v8   ;;  %7046 = vpow2.f32 %v5747_v12  ;;  %v5741_v22 = vmul.f32 -1.442695, %v98_v9 }
  0x8b   :  { %v7023_v26 = vpop.eup %7022  ;;  %1441 = vperm.xlu0 %6464, %v7013_v11   ;;  %7048 = vpow2.f32 %v5746_v16 }
  0x8c   :  { %v7025_v30 = vpop.eup %7024  ;;  %7050 = vpow2.f32 %v5761_v19  ;;  %v112_v19 = vld [vmem:[%s10605_s0 + $0x2a8] sm:$0xff] }
  0x8d   :  { %v7027_v32 = vpop.eup %7026  ;;  %7052 = vpow2.f32 %v5760_v21  ;;  %v5755_v29 = vmul.f32 -1.442695, %v112_v19 }
  0x8e   :  { %v7029_v34 = vpop.eup %7028  ;;  %1366 = vperm.xlu1 %6465, %v7015_v15   ;;  %7054 = vpow2.f32 %v5745_v24  ;;  %v96_v24 = vld [vmem:[%s10605_s0 + $0x228] sm:$0xff] }
  0x8f   :  { %v7031_v36 = vpop.eup %7030  ;;  %1361 = vperm.xlu0 %6464, %v7017_v18   ;;  %7056 = vpow2.f32 %v5744_v27  ;;  %v5756_v18 = vmul.f32 -1.442695, %v113_v6  ;;  %v95_v27 = vld [vmem:[%s10605_s0 + $0x220] sm:$0xff] }
  0x90   :  { %v7033_v38 = vpop.eup %7032  ;;  %7058 = vpow2.f32 %v5759_v31 }
  0x91   :  { %v7035_v39 = vpop.eup %7034  ;;  %7060 = vpow2.f32 %v5758_v33  ;;  %v110_v33 = vld [vmem:[%s10605_s0 + $0x298] sm:$0xff] }
  0x92   :  { %v7037_v40 = vpop.eup %7036  ;;  %1436 = vperm.xlu1 %6465, %v7019_v20   ;;  %v698_v41 = vadd.f32 1.0, %v7035_v39  ;;  %7062 = vpow2.f32 %v5743_v35  ;;  %v5738_v39 = vmul.f32 -1.442695, %v95_v27 }
  0x93   :  { %v7039_v42 = vpop.eup %7038  ;;  %1431 = vperm.xlu0 %6464, %v7021_v23   ;;  %v697_v43 = vadd.f32 1.0, %v7037_v40  ;;  %7064 = vpow2.f32 %v5742_v37  ;;  %v111_v23 = vld [vmem:[%s10605_s0 + $0x2a0] sm:$0xff]  ;;  %v109_v37 = vld [vmem:[%s10605_s0 + $0x290] sm:$0xff]  ;;  %v94_v40 = vld [vmem:[%s10605_s0 + $0x218] sm:$0xff] }
  0x94   :  { %v7041_v44 = vpop.eup %7040  ;;  %7066 = vrcp.f32 %v698_v41  ;;  %v682_v45 = vadd.f32 1.0, %v7039_v42  ;;  %v5753_v42 = vmul.f32 -1.442695, %v110_v33  ;;  %v1063_v33 = vld [vmem:[%s10607_s1 + $0xe0] sm:$0xff] }
  0x95   :  { %v7043_v46 = vpop.eup %7042  ;;  %7068 = vrcp.f32 %v697_v43  ;;  %v681_v47 = vadd.f32 1.0, %v7041_v44  ;;  %v93_v43 = vld [vmem:[%s10605_s0 + $0x210] sm:$0xff] }
  0x96   :  { %v7045_v48 = vpop.eup %7044  ;;  %1356 = vperm.xlu1 %6465, %v7023_v26   ;;  %7070 = vrcp.f32 %v682_v45  ;;  %v696_v49 = vadd.f32 1.0, %v7043_v46  ;;  %v5740_v26 = vmul.f32 -1.442695, %v97_v14  ;;  %v5752_v46 = vmul.f32 -1.442695, %v109_v37 }
  0x97   :  { %v7047_v50 = vpop.eup %7046  ;;  %1351 = vperm.xlu0 %6464, %v7025_v30   ;;  %7072 = vrcp.f32 %v681_v47  ;;  %v695_v51 = vadd.f32 1.0, %v7045_v48  ;;  %v108_v47 = vld [vmem:[%s10605_s0 + $0x288] sm:$0xff] }
  0x98   :  { %v7049_v52 = vpop.eup %7048  ;;  %7074 = vrcp.f32 %v696_v49  ;;  %v680_v53 = vadd.f32 1.0, %v7047_v50  ;;  %v5737_v50 = vmul.f32 -1.442695, %v94_v40 }
  0x99   :  { %v7051_v54 = vpop.eup %7050  ;;  %7076 = vrcp.f32 %v695_v51  ;;  %v679_v55 = vadd.f32 1.0, %v7049_v52  ;;  %v107_v51 = vld [vmem:[%s10605_s0 + $0x280] sm:$0xff]  ;;  %v92_v52 = vld [vmem:[%s10605_s0 + $0x208] sm:$0xff] }
  0x9a   :  { %v7053_v56 = vpop.eup %7052  ;;  %1426 = vperm.xlu1 %6465, %v7027_v32   ;;  %7078 = vrcp.f32 %v680_v53  ;;  %v694_v57 = vadd.f32 1.0, %v7051_v54  ;;  %v5754_v32 = vmul.f32 -1.442695, %v111_v23  ;;  %v5736_v54 = vmul.f32 -1.442695, %v93_v43 }
  0x9b   :  { %v7055_v58 = vpop.eup %7054  ;;  %1421 = vperm.xlu0 %6464, %v7029_v34   ;;  %7080 = vrcp.f32 %v679_v55  ;;  %v693_v59 = vadd.f32 1.0, %v7053_v56  ;;  %v91_v55 = vld [vmem:[%s10605_s0 + $0x200] sm:$0xff]  ;;  %v5735_v2 = vmul.f32 -1.442695, %v92_v52 }
  0x9c   :  { %v7057_v60 = vpop.eup %7056  ;;  %7082 = vrcp.f32 %v694_v57  ;;  %v678_v61 = vadd.f32 1.0, %v7055_v58  ;;  %v5751_v57 = vmul.f32 -1.442695, %v108_v47 }
  0x9d   :  { %v7059_v62 = vpop.eup %7058  ;;  %v7688_v63 = vpop.permute.xlu1 %1191  ;;  %7084 = vrcp.f32 %v693_v59  ;;  %v677_v1 = vadd.f32 1.0, %v7057_v60  ;;  %v5750_v60 = vmul.f32 -1.442695, %v107_v51 }
  0x9e   :  { %v7061_v3 = vpop.eup %7060  ;;  %v7693_v4 = vpop.permute.xlu0 %1181  ;;  %1346 = vperm.xlu1 %6465, %v7031_v36   ;;  %7086 = vrcp.f32 %v678_v61  ;;  %v692_v5 = vadd.f32 1.0, %v7059_v62  ;;  %v5739_v36 = vmul.f32 -1.442695, %v96_v24  ;;  %v1065_v62 = vld [vmem:[%s10607_s1 + $0xf0] sm:$0xff] }
  0x9f   :  { %v7063_v7 = vpop.eup %7062  ;;  %1341 = vperm.xlu0 %6464, %v7033_v38   ;;  %7088 = vrcp.f32 %v677_v1  ;;  %v691_v8 = vadd.f32 1.0, %v7061_v3 }
  0xa0   :  { %v7065_v11 = vpop.eup %7064  ;;  %7090 = vrcp.f32 %v692_v5  ;;  %v676_v12 = vadd.f32 1.0, %v7063_v7  ;;  %v5734_v5 = vmul.f32 -1.442695, %v91_v55  ;;  %v1066_v7 = vld [vmem:[%s10607_s1 + $0xf8] sm:$0xff] }
  0xa1   :  { %v7067_v15 = vpop.eup %7066  ;;  %v7707_v16 = vpop.permute.xlu1 %1196  ;;  %7092 = vrcp.f32 %v691_v8  ;;  %v675_v17 = vadd.f32 1.0, %v7065_v11  ;;  %v1049_v11 = vld [vmem:[%s10607_s1 + $0x70] sm:$0xff] }
  0xa2   :  { %v7069_v20 = vpop.eup %7068  ;;  %v7712_v21 = vpop.permute.xlu0 %1186  ;;  %1656 = vperm.xlu1 %6465, %v7067_v15   ;;  %7094 = vrcp.f32 %v676_v12 }
  0xa3   :  { %v7071_v25 = vpop.eup %7070  ;;  %1651 = vperm.xlu0 %6464, %v7069_v20   ;;  %7096 = vrcp.f32 %v675_v17 }
  0xa4   :  { %v7073_v28 = vpop.eup %7072  ;;  %7098 = vpow2.f32 %v5757_v13 }
  0xa5   :  { %v7075_v30 = vpop.eup %7074  ;;  %v7723_v31 = vpop.permute.xlu1 %1206  ;;  %7100 = vpow2.f32 %v5756_v18  ;;  %v1050_v18 = vld [vmem:[%s10607_s1 + $0x78] sm:$0xff] }
  0xa6   :  { %v7077_v34 = vpop.eup %7076  ;;  %v7728_v35 = vpop.permute.xlu0 %1201  ;;  %1576 = vperm.xlu1 %6465, %v7071_v25   ;;  %7102 = vpow2.f32 %v5741_v22 }
  0xa7   :  { %v7079_v38 = vpop.eup %7078  ;;  %1571 = vperm.xlu0 %6464, %v7073_v28   ;;  %7104 = vpow2.f32 %v5740_v26 }
  0xa8   :  { %v7081_v41 = vpop.eup %7080  ;;  %7106 = vpow2.f32 %v5755_v29 }
  0xa9   :  { %v7083_v44 = vpop.eup %7082  ;;  %v7739_v45 = vpop.permute.xlu1 %1216  ;;  %7108 = vpow2.f32 %v5754_v32 }
  0xaa   :  { %v7085_v48 = vpop.eup %7084  ;;  %v7744_v49 = vpop.permute.xlu0 %1211  ;;  %1646 = vperm.xlu1 %6465, %v7075_v30   ;;  %7110 = vpow2.f32 %v5739_v36 }
  0xab   :  { %v7087_v53 = vpop.eup %7086  ;;  %1641 = vperm.xlu0 %6464, %v7077_v34   ;;  %7112 = vpow2.f32 %v5738_v39 }
  0xac   :  { %v7089_v56 = vpop.eup %7088  ;;  %7114 = vpow2.f32 %v5753_v42 }
  0xad   :  { %v7755_v58 = vpop.eup %7090  ;;  %v1332_v59 = vpop.permute.xlu1 %1331  ;;  %7116 = vpow2.f32 %v5752_v46  ;;  %v1047_v46 = vld [vmem:[%s10607_s1 + $0x60] sm:$0xff] }
  0xae   :  { %v7757_v61 = vpop.eup %7092  ;;  %v7762_v1 = vpop.permute.xlu0 %1221  ;;  %1566 = vperm.xlu1 %6465, %v7079_v38   ;;  %7118 = vpow2.f32 %v5737_v50  ;;  %v1929_v15 = vmul.f32 %v1332_v59, %v1065_v62  ;;  %v1064_v38 = vld [vmem:[%s10607_s1 + $0xe8] sm:$0xff]  ;;  %v154_v50 = vld [vmem:[%s10605_s0 + $0x3f8] sm:$0xff] }
  0xaf   :  { %v7764_v3 = vpop.eup %7094  ;;  %1561 = vperm.xlu0 %6464, %v7081_v41   ;;  %7120 = vpow2.f32 %v5736_v54  ;;  %v1048_v54 = vld [vmem:[%s10607_s1 + $0x68] sm:$0xff] }
  0xb0   :  { %v7766_v6 = vpop.eup %7096  ;;  %7122 = vpow2.f32 %v5751_v57 }
  0xb1   :  { %v7099_v8 = vpop.eup %7098  ;;  %v1252_v9 = vpop.permute.xlu1 %1251  ;;  %7124 = vpow2.f32 %v5750_v60 }
  0xb2   :  { %v7101_v10 = vpop.eup %7100  ;;  %v1337_v12 = vpop.permute.xlu0 %1336  ;;  %1636 = vperm.xlu1 %6465, %v7083_v44   ;;  %v690_v13 = vadd.f32 1.0, %v7099_v8  ;;  %7126 = vpow2.f32 %v5735_v2  ;;  %v1913_v32 = vmul.f32 %v1252_v9, %v1049_v11  ;;  %v5797_v2 = vmul.f32 -1.442695, %v154_v50  ;;  %v1062_v8 = vld [vmem:[%s10607_s1 + $0xd8] sm:$0xff] }
  0xb3   :  { %v7103_v14 = vpop.eup %7102  ;;  %v1930_v17 = vmul.f32 %v1337_v12, %v1066_v7  ;;  %1631 = vperm.xlu0 %6464, %v7085_v48   ;;  %v689_v19 = vadd.f32 1.0, %v7101_v10  ;;  %7128 = vpow2.f32 %v5734_v5  ;;  %v153_v10 = vld [vmem:[%s10605_s0 + $0x3f0] sm:$0xff] }
  0xb4   :  { %v7105_v20 = vpop.eup %7104  ;;  %7130 = vrcp.f32 %v690_v13  ;;  %v674_v22 = vadd.f32 1.0, %v7103_v14 }
  0xb5   :  { %v7107_v23 = vpop.eup %7106  ;;  %v1322_v24 = vpop.permute.xlu1 %1321  ;;  %v2058_v25 = vpack.c.bf16 %v1930_v17, %v1929_v15  ;;  %7132 = vrcp.f32 %v689_v19  ;;  %v673_v26 = vadd.f32 1.0, %v7105_v20 }
  0xb6   :  { %v7109_v27 = vpop.eup %7108  ;;  %v1257_v28 = vpop.permute.xlu0 %1256  ;;  %1556 = vperm.xlu1 %6465, %v7087_v53   ;;  %7134 = vrcp.f32 %v674_v22  ;;  %v688_v29 = vadd.f32 1.0, %v7107_v23  ;;  %v1927_v52 = vmul.f32 %v1322_v24, %v1063_v33  ;;  %v152_v24 = vld [vmem:[%s10605_s0 + $0x3e8] sm:$0xff] }
  0xb7   :  { %v7111_v30 = vpop.eup %7110  ;;  %v1914_v34 = vmul.f32 %v1257_v28, %v1050_v18  ;;  %1551 = vperm.xlu0 %6464, %v7089_v56   ;;  %6050 = vmatprep.subr.bf16.mxu0 %v2058_v25  ;;  %7136 = vrcp.f32 %v673_v26  ;;  %v687_v36 = vadd.f32 1.0, %v7109_v27  ;;  %v137_v18 = vld [vmem:[%s10605_s0 + $0x370] sm:$0xff]  ;;  %v151_v28 = vld [vmem:[%s10605_s0 + $0x3e0] sm:$0xff] }
  0xb8   :  { %v7113_v37 = vpop.eup %7112  ;;  %7138 = vrcp.f32 %v688_v29  ;;  %v672_v39 = vadd.f32 1.0, %v7111_v30  ;;  %v5780_v33 = vmul.f32 -1.442695, %v137_v18 }
  0xb9   :  { %v7115_v40 = vpop.eup %7114  ;;  %v1242_v41 = vpop.permute.xlu1 %1241  ;;  %v2050_v42 = vpack.c.bf16 %v1914_v34, %v1913_v32  ;;  %7140 = vrcp.f32 %v687_v36  ;;  %v671_v43 = vadd.f32 1.0, %v7113_v37  ;;  %v136_v34 = vld [vmem:[%s10605_s0 + $0x368] sm:$0xff]  ;;  %v1045_v37 = vld [vmem:[%s10607_s1 + $0x50] sm:$0xff] }
  0xba   :  { %v7117_v44 = vpop.eup %7116  ;;  %v1327_v47 = vpop.permute.xlu0 %1326  ;;  %1626 = vperm.xlu1 %6465, %v7755_v58   ;;  %7142 = vrcp.f32 %v672_v39  ;;  %v686_v48 = vadd.f32 1.0, %v7115_v40  ;;  %v1911_v12 = vmul.f32 %v1242_v41, %v1047_v46  ;;  %v5795_v39 = vmul.f32 -1.442695, %v152_v24  ;;  %v135_v40 = vld [vmem:[%s10605_s0 + $0x360] sm:$0xff]  ;;  %v150_v46 = vld [vmem:[%s10605_s0 + $0x3d8] sm:$0xff] }
  0xbb   :  { %v7119_v51 = vpop.eup %7118  ;;  %v1928_v53 = vmul.f32 %v1327_v47, %v1064_v38  ;;  %1621 = vperm.xlu0 %6464, %v7757_v61   ;;  %6051 = vmatpush3.bf16.msra.mxu0 %v2050_v42  ;;  %7144 = vrcp.f32 %v671_v43  ;;  %v685_v55 = vadd.f32 1.0, %v7117_v44  ;;  %v1061_v61 = vld [vmem:[%s10607_s1 + $0xd0] sm:$0xff]  ;;  %v1046_v38 = vld [vmem:[%s10607_s1 + $0x58] sm:$0xff]  ;;  %v5794_v44 = vmul.f32 -1.442695, %v151_v28  ;;  %v131_v28 = vld [vmem:[%s10605_s0 + $0x340] sm:$0xff] }
  0xbc   :  { %v7121_v56 = vpop.eup %7120  ;;  %7146 = vrcp.f32 %v686_v48  ;;  %v670_v57 = vadd.f32 1.0, %v7119_v51  ;;  %v5779_v50 = vmul.f32 -1.442695, %v136_v34  ;;  %v149_v51 = vld [vmem:[%s10605_s0 + $0x3d0] sm:$0xff] }
  0xbd   :  { %v7123_v58 = vpop.eup %7122  ;;  %v2057_v59 = vpack.c.bf16 %v1928_v53, %v1927_v52  ;;  %v1312_v60 = vpop.permute.xlu1 %1311  ;;  %7148 = vrcp.f32 %v685_v55  ;;  %v669_v62 = vadd.f32 1.0, %v7121_v56  ;;  %v1043_v53 = vld [vmem:[%s10607_s1 + $0x40] sm:$0xff]  ;;  %v1044_v56 = vld [vmem:[%s10607_s1 + $0x48] sm:$0xff] }
  0xbe   :  { %v7125_v5 = vpop.eup %7124  ;;  %v1247_v7 = vpop.permute.xlu0 %1246  ;;  %1546 = vperm.xlu1 %6465, %v7764_v3   ;;  %7150 = vrcp.f32 %v670_v57  ;;  %v684_v9 = vadd.f32 1.0, %v7123_v58  ;;  %v138_v3 = vld [vmem:[%s10605_s0 + $0x378] sm:$0xff]  ;;  %v1925_v30 = vmul.f32 %v1312_v60, %v1061_v61  ;;  %v5778_v57 = vmul.f32 -1.442695, %v135_v40  ;;  %v1059_v60 = vld [vmem:[%s10607_s1 + $0xc0] sm:$0xff] }
  0xbf   :  { %v7127_v11 = vpop.eup %7126  ;;  %v1912_v13 = vmul.f32 %v1247_v7, %v1048_v54  ;;  %1541 = vperm.xlu0 %6464, %v7766_v6   ;;  %6052 = vmatprep.subr.bf16.mxu0 %v2057_v59  ;;  %7152 = vrcp.f32 %v669_v62  ;;  %v683_v14 = vadd.f32 1.0, %v7125_v5  ;;  %v5796_v6 = vmul.f32 -1.442695, %v153_v10  ;;  %v134_v58 = vld [vmem:[%s10605_s0 + $0x358] sm:$0xff]  ;;  %v1060_v62 = vld [vmem:[%s10607_s1 + $0xc8] sm:$0xff]  ;;  %v133_v5 = vld [vmem:[%s10605_s0 + $0x350] sm:$0xff] }
  0xc0   :  { %v7129_v15 = vpop.eup %7128  ;;  %7154 = vrcp.f32 %v684_v9  ;;  %v668_v17 = vadd.f32 1.0, %v7127_v11  ;;  %v5781_v27 = vmul.f32 -1.442695, %v138_v3  ;;  %v5792_v9 = vmul.f32 -1.442695, %v149_v51  ;;  %v148_v10 = vld [vmem:[%s10605_s0 + $0x3c8] sm:$0xff] }
  0xc1   :  { %v7131_v19 = vpop.eup %7130  ;;  %v2049_v20 = vpack.c.bf16 %v1912_v13, %v1911_v12  ;;  %v1232_v22 = vpop.permute.xlu1 %1231  ;;  %7156 = vrcp.f32 %v683_v14  ;;  %v667_v23 = vadd.f32 1.0, %v7129_v15  ;;  %v1907_v12 = vmul.f32 %v7762_v1, %v1043_v53  ;;  %v147_v15 = vld [vmem:[%s10605_s0 + $0x3c0] sm:$0xff]  ;;  %v1041_v1 = vld [vmem:[%s10607_s1 + $0x30] sm:$0xff] }
  0xc2   :  { %v7133_v25 = vpop.eup %7132  ;;  %v1317_v26 = vpop.permute.xlu0 %1316  ;;  %1616 = vperm.xlu1 %6465, %v7131_v19   ;;  %7158 = vrcp.f32 %v668_v17  ;;  %v1909_v54 = vmul.f32 %v1232_v22, %v1045_v37  ;;  %v5777_v3 = vmul.f32 -1.442695, %v134_v58  ;;  %v132_v17 = vld [vmem:[%s10605_s0 + $0x348] sm:$0xff]  ;;  %v1042_v19 = vld [vmem:[%s10607_s1 + $0x38] sm:$0xff]  ;;  %v1905_v40 = vmul.f32 %v7744_v49, %v1041_v1 }
  0xc3   :  { %v7135_v29 = vpop.eup %7134  ;;  %v1926_v32 = vmul.f32 %v1317_v26, %v1062_v8  ;;  %1611 = vperm.xlu0 %6464, %v7133_v25   ;;  %6053 = vmatpush3.bf16.msra.mxu0 %v2049_v20  ;;  %7160 = vrcp.f32 %v667_v23  ;;  %v1058_v23 = vld [vmem:[%s10607_s1 + $0xb8] sm:$0xff]  ;;  %v1057_v26 = vld [vmem:[%s10607_s1 + $0xb0] sm:$0xff]  ;;  %v5775_v34 = vmul.f32 -1.442695, %v132_v17  ;;  %v1040_v37 = vld [vmem:[%s10607_s1 + $0x28] sm:$0xff] }
  0xc4   :  { %v7137_v36 = vpop.eup %7136  ;;  %7162 = vpow2.f32 %v5797_v2  ;;  %v5793_v2 = vmul.f32 -1.442695, %v150_v46  ;;  %v1056_v46 = vld [vmem:[%s10607_s1 + $0xa8] sm:$0xff] }
  0xc5   :  { %v7139_v41 = vpop.eup %7138  ;;  %v2056_v42 = vpack.c.bf16 %v1926_v32, %v1925_v30  ;;  %v1302_v43 = vpop.permute.xlu1 %1301  ;;  %7164 = vpow2.f32 %v5796_v6  ;;  %v5776_v6 = vmul.f32 -1.442695, %v133_v5  ;;  %v1053_v5 = vld [vmem:[%s10607_s1 + $0x90] sm:$0xff] }
  0xc6   :  { %v7141_v47 = vpop.eup %7140  ;;  %v1237_v48 = vpop.permute.xlu0 %1236  ;;  %1536 = vperm.xlu1 %6465, %v7135_v29   ;;  %7166 = vpow2.f32 %v5781_v27  ;;  %v1923_v20 = vmul.f32 %v1302_v43, %v1059_v60  ;;  %v5791_v27 = vmul.f32 -1.442695, %v148_v10 }
  0xc7   :  { %v7143_v52 = vpop.eup %7142  ;;  %v1910_v55 = vmul.f32 %v1237_v48, %v1046_v38  ;;  %1531 = vperm.xlu0 %6464, %v7137_v36   ;;  %6054 = vmatprep.subr.bf16.mxu0 %v2056_v42  ;;  %7168 = vpow2.f32 %v5780_v33  ;;  %v5790_v33 = vmul.f32 -1.442695, %v147_v15  ;;  %v1039_v38 = vld [vmem:[%s10607_s1 + $0x20] sm:$0xff] }
  0xc8   :  { %v7145_v59 = vpop.eup %7144  ;;  %7170 = vpow2.f32 %v5795_v39  ;;  %v1906_v39 = vmul.f32 %v7739_v45, %v1042_v19  ;;  %v1055_v45 = vld [vmem:[%s10607_s1 + $0xa0] sm:$0xff]  ;;  %v1903_v51 = vmul.f32 %v7728_v35, %v1039_v38 }
  0xc9   :  { %v7853_v61 = vpop.eup %7146  ;;  %v2048_v7 = vpack.c.bf16 %v1910_v55, %v1909_v54  ;;  %v1227_v8 = vpop.permute.xlu1 %1226  ;;  %7172 = vpow2.f32 %v5794_v44  ;;  %v1038_v55 = vld [vmem:[%s10607_s1 + $0x18] sm:$0xff] }
  0xca   :  { %v7858_v11 = vpop.eup %7148  ;;  %v1908_v13 = vmul.f32 %v1227_v8, %v1044_v56  ;;  %v1307_v14 = vpop.permute.xlu0 %1306  ;;  %1606 = vperm.xlu1 %6465, %v7139_v41   ;;  %7174 = vpow2.f32 %v5779_v50  ;;  %v1904_v50 = vmul.f32 %v7723_v31, %v1040_v37  ;;  %v2046_v56 = vpack.c.bf16 %v1906_v39, %v1905_v40  ;;  %v1054_v31 = vld [vmem:[%s10607_s1 + $0x98] sm:$0xff]  ;;  %v1037_v8 = vld [vmem:[%s10607_s1 + $0x10] sm:$0xff] }
  0xcb   :  { %v7867_v18 = vpop.eup %7150  ;;  %v1924_v22 = vmul.f32 %v1307_v14, %v1060_v62  ;;  %1601 = vperm.xlu0 %6464, %v7141_v47   ;;  %6055 = vmatpush3.bf16.msra.mxu0 %v2048_v7  ;;  %7176 = vpow2.f32 %v5778_v57  ;;  %v5774_v47 = vmul.f32 -1.442695, %v131_v28  ;;  %v1036_v14 = vld [vmem:[%s10607_s1 + $0x8] sm:$0xff] }
  0xcc   :  { %v7878_v24 = vpop.eup %7152  ;;  %v2047_v25 = vpack.c.bf16 %v1908_v13, %v1907_v12  ;;  %7178 = vpow2.f32 %v5793_v2 }
  0xcd   :  { %v7886_v29 = vpop.eup %7154  ;;  %v2055_v30 = vpack.c.bf16 %v1924_v22, %v1923_v20  ;;  %v1297_v32 = vpop.permute.xlu1 %1296  ;;  %7180 = vpow2.f32 %v5792_v9  ;;  %v1902_v9 = vmul.f32 %v7707_v16, %v1038_v55  ;;  %v1052_v16 = vld [vmem:[%s10607_s1 + $0x88] sm:$0xff]  ;;  %v145_v55 = vld [vmem:[%s10605_s0 + $0x3b0] sm:$0xff] }
  0xce   :  { %v7888_v36 = vpop.eup %7156  ;;  %v1922_v41 = vmul.f32 %v1297_v32, %v1058_v23  ;;  %v1292_v42 = vpop.permute.xlu0 %1291  ;;  %1526 = vperm.xlu1 %6465, %v7143_v52   ;;  %7182 = vpow2.f32 %v5777_v3  ;;  %v2045_v3 = vpack.c.bf16 %v1904_v50, %v1903_v51  ;;  %v146_v50 = vld [vmem:[%s10605_s0 + $0x3b8] sm:$0xff] }
  0xcf   :  { %v7898_v43 = vpop.eup %7158  ;;  %v1921_v44 = vmul.f32 %v1292_v42, %v1057_v26  ;;  %1521 = vperm.xlu0 %6464, %v7145_v59   ;;  %6056 = vmatprep.subr.bf16.mxu0 %v2055_v30  ;;  %7184 = vpow2.f32 %v5776_v6  ;;  %v1901_v6 = vmul.f32 %v7688_v63, %v1037_v8 }
  0xd0   :  { %v7903_v48 = vpop.eup %7160  ;;  %6057 = vmatpush3.bf16.msra.mxu0 %v2047_v25  ;;  %7186 = vpow2.f32 %v5791_v27  ;;  %v1900_v27 = vmul.f32 %v7712_v21, %v1036_v14  ;;  %v1098_v21 = vld [vmem:[%s10607_s1 + $0x1f8] sm:$0xff] }
  0xd1   :  { %v7163_v49 = vpop.eup %7162  ;;  %v2054_v52 = vpack.c.bf16 %v1922_v41, %v1921_v44  ;;  %v1287_v53 = vpop.permute.xlu1 %1286  ;;  %7188 = vpow2.f32 %v5790_v33  ;;  %v2044_v63 = vpack.c.bf16 %v1902_v9, %v1901_v6  ;;  %v5788_v9 = vmul.f32 -1.442695, %v145_v55  ;;  %v139_v55 = vld [vmem:[%s10605_s0 + $0x380] sm:$0xff] }
  0xd2   :  { %v7165_v54 = vpop.eup %7164  ;;  %v1920_v57 = vmul.f32 %v1287_v53, %v1056_v46  ;;  %v1282_v58 = vpop.permute.xlu0 %1281  ;;  %1596 = vperm.xlu1 %6465, %v7853_v61   ;;  %v730_v59 = vadd.f32 1.0, %v7163_v49  ;;  %7190 = vpow2.f32 %v5775_v34 }
  0xd3   :  { %v7167_v60 = vpop.eup %7166  ;;  %v1919_v62 = vmul.f32 %v1282_v58, %v1055_v45  ;;  %1591 = vperm.xlu0 %6464, %v7858_v11   ;;  %6058 = vmatprep.subr.bf16.mxu0 %v2054_v52  ;;  %v729_v35 = vadd.f32 1.0, %v7165_v54  ;;  %7192 = vpow2.f32 %v5774_v47  ;;  %v1082_v58 = vld [vmem:[%s10607_s1 + $0x178] sm:$0xff] }
  0xd4   :  { %v7169_v2 = vpop.eup %7168  ;;  %6059 = vmatpush3.bf16.msra.mxu0 %v2046_v56  ;;  %7194 = vrcp.f32 %v730_v59  ;;  %v714_v61 = vadd.f32 1.0, %v7167_v60  ;;  %v1081_v59 = vld [vmem:[%s10607_s1 + $0x170] sm:$0xff]  ;;  %v130_v60 = vld [vmem:[%s10605_s0 + $0x338] sm:$0xff] }
  0xd5   :  { %v7171_v7 = vpop.eup %7170  ;;  %v2053_v10 = vpack.c.bf16 %v1920_v57, %v1919_v62  ;;  %v1277_v11 = vpop.permute.xlu1 %1276  ;;  %7196 = vrcp.f32 %v729_v35  ;;  %v713_v12 = vadd.f32 1.0, %v7169_v2  ;;  %v5789_v35 = vmul.f32 -1.442695, %v146_v50  ;;  %v129_v2 = vld [vmem:[%s10605_s0 + $0x330] sm:$0xff] }
  0xd6   :  { %v7173_v13 = vpop.eup %7172  ;;  %v1918_v15 = vmul.f32 %v1277_v11, %v1054_v31  ;;  %v1272_v17 = vpop.permute.xlu0 %1271  ;;  %1516 = vperm.xlu1 %6465, %v7867_v18   ;;  %7198 = vrcp.f32 %v714_v61  ;;  %v728_v19 = vadd.f32 1.0, %v7171_v7  ;;  %v1051_v18 = vld [vmem:[%s10607_s1 + $0x80] sm:$0xff]  ;;  %v144_v11 = vld [vmem:[%s10605_s0 + $0x3a8] sm:$0xff] }
  0xd7   :  { %v7175_v1 = vpop.eup %7174  ;;  %v1917_v20 = vmul.f32 %v1272_v17, %v1053_v5  ;;  %1511 = vperm.xlu0 %6464, %v7878_v24   ;;  %6060 = vmatprep.subr.bf16.mxu0 %v2053_v10  ;;  %7200 = vrcp.f32 %v713_v12  ;;  %v727_v22 = vadd.f32 1.0, %v7173_v13  ;;  %v1035_v24 = vld [vmem:[%s10607_s1] sm:$0xff]  ;;  %v6469_v10 = vld [vmem:[%s10606_s3 + $0x4c] ss:$36 sps:$4 sm:$0xff]   ;;  %v5787_v6 = vmul.f32 -1.442695, %v144_v11 }
  0xd8   :  { %v7177_v23 = vpop.eup %7176  ;;  %6061 = vmatpush3.bf16.msra.mxu0 %v2045_v3  ;;  %7202 = vrcp.f32 %v728_v19  ;;  %v712_v25 = vadd.f32 1.0, %v7175_v1  ;;  %v1899_v44 = vmul.f32 %v7693_v4, %v1035_v24  ;;  %v5773_v3 = vmul.f32 -1.442695, %v130_v60  ;;  %v1096_v1 = vld [vmem:[%s10607_s1 + $0x1e8] sm:$0xff]  ;;  %v1093_v60 = vld [vmem:[%s10607_s1 + $0x1d0] sm:$0xff] }
  0xd9   :  { %v7179_v26 = vpop.eup %7178  ;;  %v2052_v28 = vpack.c.bf16 %v1918_v15, %v1917_v20  ;;  %v1267_v30 = vpop.permute.xlu1 %1266  ;;  %7204 = vrcp.f32 %v727_v22  ;;  %v711_v32 = vadd.f32 1.0, %v7177_v23  ;;  %v143_v15 = vld [vmem:[%s10605_s0 + $0x3a0] sm:$0xff]  ;;  %v5772_v20 = vmul.f32 -1.442695, %v129_v2 }
  0xda   :  { %v7181_v33 = vpop.eup %7180  ;;  %v1916_v34 = vmul.f32 %v1267_v30, %v1052_v16  ;;  %v1262_v37 = vpop.permute.xlu0 %1261  ;;  %1586 = vperm.xlu1 %6465, %v7886_v29   ;;  %7206 = vrcp.f32 %v712_v25  ;;  %v726_v38 = vadd.f32 1.0, %v7179_v26  ;;  %v1097_v29 = vld [vmem:[%s10607_s1 + $0x1f0] sm:$0xff]  ;;  %v2043_v52 = vpack.c.bf16 %v1900_v27, %v1899_v44  ;;  %v128_v16 = vld [vmem:[%s10605_s0 + $0x328] sm:$0xff]  ;;  %v1095_v23 = vld [vmem:[%s10607_s1 + $0x1e0] sm:$0xff] }
  0xdb   :  { %v7183_v39 = vpop.eup %7182  ;;  %v1915_v40 = vmul.f32 %v1262_v37, %v1051_v18  ;;  %1581 = vperm.xlu0 %6464, %v7888_v36   ;;  %6062 = vmatprep.subr.bf16.mxu0 %v2052_v28  ;;  %7208 = vrcp.f32 %v711_v32  ;;  %v725_v41 = vadd.f32 1.0, %v7181_v33  ;;  %v127_v18 = vld [vmem:[%s10605_s0 + $0x320] sm:$0xff]  ;;  %v5786_v27 = vmul.f32 -1.442695, %v143_v15  ;;  %v142_v28 = vld [vmem:[%s10605_s0 + $0x398] sm:$0xff] }
  0xdc   :  { %v7185_v42 = vpop.eup %7184  ;;  %6063 = vmatpush3.bf16.msra.mxu0 %v2044_v63  ;;  %7210 = vrcp.f32 %v726_v38  ;;  %v710_v46 = vadd.f32 1.0, %v7183_v39  ;;  %v5771_v63 = vmul.f32 -1.442695, %v128_v16  ;;  %v1080_v39 = vld [vmem:[%s10607_s1 + $0x168] sm:$0xff]  ;;  %v5782_v2 = vmul.f32 -1.442695, %v139_v55 }
  0xdd   :  { %v7187_v47 = vpop.eup %7186  ;;  %v2051_v45 = vpack.c.bf16 %v1916_v34, %v1915_v40  ;;  %v1497_v36 = vpop.permute.xlu1 %1496  ;;  %7212 = vrcp.f32 %v725_v41  ;;  %v709_v49 = vadd.f32 1.0, %v7185_v42  ;;  %v141_v34 = vld [vmem:[%s10605_s0 + $0x390] sm:$0xff]  ;;  %v5770_v40 = vmul.f32 -1.442695, %v127_v18  ;;  %v1079_v42 = vld [vmem:[%s10607_s1 + $0x160] sm:$0xff] }
  0xde   :  { %v7189_v51 = vpop.eup %7188  ;;  %v1962_v53 = vmul.f32 %v1497_v36, %v1098_v21  ;;  %v1492_v4 = vpop.permute.xlu0 %1491  ;;  %1506 = vperm.xlu1 %6465, %v7898_v43   ;;  %7214 = vrcp.f32 %v710_v46  ;;  %v724_v54 = vadd.f32 1.0, %v7187_v47  ;;  %v126_v21 = vld [vmem:[%s10605_s0 + $0x318] sm:$0xff]  ;;  %v6471_v44 = vld [vmem:[%s10606_s3 + $0x48] ss:$36 sps:$4 sm:$0xff]   ;;  %v125_v46 = vld [vmem:[%s10605_s0 + $0x310] sm:$0xff] }
  0xdf   :  { %v7191_v56 = vpop.eup %7190  ;;  %v1961_v57 = vmul.f32 %v1492_v4, %v1097_v29  ;;  %1501 = vperm.xlu0 %6464, %v7903_v48   ;;  %6064 = vmatprep.subr.bf16.mxu0 %v2051_v45  ;;  %7216 = vrcp.f32 %v709_v49  ;;  %v723_v43 = vadd.f32 1.0, %v7189_v51  ;;  %v6466_v48 = vld [vmem:[%s10606_s3] ss:$36 sps:$4 sm:$0xff]   ;;  %v5785_v29 = vmul.f32 -1.442695, %v142_v28  ;;  %v140_v51 = vld [vmem:[%s10605_s0 + $0x388] sm:$0xff] }
  0xe0   :  { %v7193_v62 = vpop.eup %7192  ;;  %6065 = vmatpush3.bf16.msra.mxu0 %v2043_v52  ;;  %7218 = vrcp.f32 %v724_v54  ;;  %v708_v31 = vadd.f32 1.0, %v7191_v56  ;;  %v6472_v49 = vld [vmem:[%s10606_s3 + $0x94] ss:$36 sps:$4 sm:$0xff]   ;;  %v5784_v50 = vmul.f32 -1.442695, %v141_v34 }
  0xe1   :  { %v7195_v5 = vpop.eup %7194  ;;  %v1417_v61 = vpop.permute.xlu1 %1416  ;;  %v2074_v7 = vpack.c.bf16 %v1962_v53, %v1961_v57  ;;  %7220 = vrcp.f32 %v723_v43  ;;  %v707_v8 = vadd.f32 1.0, %v7193_v62  ;;  %v5769_v54 = vmul.f32 -1.442695, %v126_v21 }
  0xe2   :  { %v7197_v12 = vpop.eup %7196  ;;  %v1946_v13 = vmul.f32 %v1417_v61, %v1082_v58  ;;  %v1412_v14 = vpop.permute.xlu0 %1411  ;;  %1816 = vperm.xlu1 %6465, %v7195_v5   ;;  %7222 = vrcp.f32 %v708_v31  ;;  %v1094_v58 = vld [vmem:[%s10607_s1 + $0x1d8] sm:$0xff]  ;;  %v5783_v62 = vmul.f32 -1.442695, %v140_v51 }
  0xe3   :  { %v7199_v17 = vpop.eup %7198  ;;  %v1945_v19 = vmul.f32 %v1412_v14, %v1081_v59  ;;  %1811 = vperm.xlu0 %6464, %v7197_v12   ;;  %6138 = vmatprep.subr.bf16.mxu1 %v2074_v7  ;;  %7224 = vrcp.f32 %v707_v8  ;;  %v5768_v59 = vmul.f32 -1.442695, %v125_v46  ;;  %v1077_v12 = vld [vmem:[%s10607_s1 + $0x150] sm:$0xff] }
  0xe4   :  { %v7201_v22 = vpop.eup %7200  ;;  %2820 = vmatmul.mubr.bf16.vlgmr.msra.gmra.mxu0 %v6466_v48  ;;  %7226 = vpow2.f32 %v5789_v35 }
  0xe5   :  { %v7203_v25 = vpop.eup %7202  ;;  %v1487_v26 = vpop.permute.xlu1 %1486  ;;  %v2066_v24 = vpack.c.bf16 %v1946_v13, %v1945_v19  ;;  %7228 = vpow2.f32 %v5788_v9  ;;  %2827 = vmatprep.mubr.bf16.mxu0 %v6469_v10  ;;  %v1078_v10 = vld [vmem:[%s10607_s1 + $0x158] sm:$0xff]  ;;  %v6474_v13 = vld [vmem:[%s10606_s3 + $0x90] ss:$36 sps:$4 sm:$0xff]   ;;  %v124_v19 = vld [vmem:[%s10605_s0 + $0x308] sm:$0xff] }
  0xe6   :  { %v7205_v30 = vpop.eup %7204  ;;  %v1960_v32 = vmul.f32 %v1487_v26, %v1096_v1  ;;  %v1482_v33 = vpop.permute.xlu0 %1481  ;;  %1736 = vperm.xlu1 %6465, %v7199_v17   ;;  %7230 = vpow2.f32 %v5773_v3  ;;  %v6475_v17 = vld [vmem:[%s10606_s3 + $0xdc] ss:$36 sps:$4 sm:$0xff]  }
  0xe7   :  { %v7207_v37 = vpop.eup %7206  ;;  %v1959_v38 = vmul.f32 %v1482_v33, %v1095_v23  ;;  %1731 = vperm.xlu0 %6464, %v7201_v22   ;;  %6139 = vmatpush3.bf16.msra.mxu1 %v2066_v24  ;;  %7232 = vpow2.f32 %v5772_v20  ;;  %v123_v23 = vld [vmem:[%s10605_s0 + $0x300] sm:$0xff] }
  0xe8   :  { %v7209_v41 = vpop.eup %7208  ;;  %7234 = vpow2.f32 %v5787_v6 }
  0xe9   :  { %v7211_v47 = vpop.eup %7210  ;;  %v2073_v45 = vpack.c.bf16 %v1960_v32, %v1959_v38  ;;  %v1407_v36 = vpop.permute.xlu1 %1406  ;;  %7236 = vpow2.f32 %v5786_v27  ;;  %v1091_v27 = vld [vmem:[%s10607_s1 + $0x1c0] sm:$0xff] }
  0xea   :  { %v7213_v52 = vpop.eup %7212  ;;  %v1944_v53 = vmul.f32 %v1407_v36, %v1080_v39  ;;  %v1402_v4 = vpop.permute.xlu0 %1401  ;;  %1806 = vperm.xlu1 %6465, %v7203_v25   ;;  %7238 = vpow2.f32 %v5771_v63  ;;  %v1092_v25 = vld [vmem:[%s10607_s1 + $0x1c8] sm:$0xff]  ;;  %v6477_v36 = vld [vmem:[%s10606_s3 + $0xd8] ss:$36 sps:$4 sm:$0xff]  }
  0xeb   :  { %v8024_v56 = vpop.eup %7214  ;;  %v1943_v57 = vmul.f32 %v1402_v4, %v1079_v42  ;;  %1801 = vperm.xlu0 %6464, %v7205_v30   ;;  %6140 = vmatprep.subr.bf16.mxu1 %v2073_v45  ;;  %7240 = vpow2.f32 %v5770_v40  ;;  %v5767_v30 = vmul.f32 -1.442695, %v124_v19 }
  0xec   :  { %v8029_v43 = vpop.eup %7216  ;;  %2828 = vmatmul.mubr.bf16.gmra.mxu0 %v6471_v44  ;;  %7242 = vpow2.f32 %v5785_v29  ;;  %v1076_v44 = vld [vmem:[%s10607_s1 + $0x148] sm:$0xff] }
  0xed   :  { %v8034_v31 = vpop.eup %7218  ;;  %v2065_v48 = vpack.c.bf16 %v1944_v53, %v1943_v57  ;;  %v1477_v35 = vpop.permute.xlu1 %1476  ;;  %2835 = vmatprep.mubr.bf16.mxu0 %v6472_v49  ;;  %7244 = vpow2.f32 %v5784_v50  ;;  %v6478_v53 = vld [vmem:[%s10606_s3 + $0x124] ss:$36 sps:$4 sm:$0xff]  }
  0xee   :  { %v8036_v5 = vpop.eup %7220  ;;  %v1958_v61 = vmul.f32 %v1477_v35, %v1094_v58  ;;  %v1472_v7 = vpop.permute.xlu0 %1471  ;;  %1726 = vperm.xlu1 %6465, %v7207_v37   ;;  %7246 = vpow2.f32 %v5769_v54  ;;  %v5766_v37 = vmul.f32 -1.442695, %v123_v23 }
  0xef   :  { %v8038_v8 = vpop.eup %7222  ;;  %v1957_v9 = vmul.f32 %v1472_v7, %v1093_v60  ;;  %1721 = vperm.xlu0 %6464, %v7209_v41   ;;  %6141 = vmatpush3.bf16.msra.mxu1 %v2065_v48  ;;  %7248 = vpow2.f32 %v5768_v59  ;;  %v1090_v59 = vld [vmem:[%s10607_s1 + $0x1b8] sm:$0xff] }
  0xf0   :  { %v8043_v11 = vpop.eup %7224  ;;  %7250 = vpow2.f32 %v5783_v62  ;;  %v1089_v62 = vld [vmem:[%s10607_s1 + $0x1b0] sm:$0xff] }
  0xf1   :  { %v7227_v14 = vpop.eup %7226  ;;  %v2072_v3 = vpack.c.bf16 %v1958_v61, %v1957_v9  ;;  %v1397_v15 = vpop.permute.xlu1 %1396  ;;  %7252 = vpow2.f32 %v5782_v2  ;;  %v170_v61 = vld [vmem:[%s10605_s0 + $0x478] sm:$0xff] }
  0xf2   :  { %v7229_v1 = vpop.eup %7228  ;;  %v1942_v20 = vmul.f32 %v1397_v15, %v1078_v10  ;;  %v1392_v16 = vpop.permute.xlu0 %1391  ;;  %1796 = vperm.xlu1 %6465, %v7211_v47   ;;  %v722_v22 = vadd.f32 1.0, %v7227_v14  ;;  %v1075_v47 = vld [vmem:[%s10607_s1 + $0x140] sm:$0xff]  ;;  %v5813_v19 = vmul.f32 -1.442695, %v170_v61 }
  0xf3   :  { %v7231_v6 = vpop.eup %7230  ;;  %v1941_v18 = vmul.f32 %v1392_v16, %v1077_v12  ;;  %1791 = vperm.xlu0 %6464, %v7213_v52   ;;  %6142 = vmatprep.subr.bf16.mxu1 %v2072_v3  ;;  %v721_v26 = vadd.f32 1.0, %v7229_v1  ;;  %v1074_v3 = vld [vmem:[%s10607_s1 + $0x138] sm:$0xff]  ;;  %v167_v1 = vld [vmem:[%s10605_s0 + $0x460] sm:$0xff] }
  0xf4   :  { %v7233_v24 = vpop.eup %7232  ;;  %7254 = vrcp.f32 %v722_v22  ;;  %v706_v28 = vadd.f32 1.0, %v7231_v6  ;;  %2836 = vmatmul.mubr.bf16.gmra.mxu0 %v6474_v13  ;;  %v169_v13 = vld [vmem:[%s10605_s0 + $0x470] sm:$0xff] }
  0xf5   :  { %v7235_v32 = vpop.eup %7234  ;;  %v2064_v33 = vpack.c.bf16 %v1942_v20, %v1941_v18  ;;  %v1467_v63 = vpop.permute.xlu1 %1466  ;;  %7256 = vrcp.f32 %v721_v26  ;;  %v705_v34 = vadd.f32 1.0, %v7233_v24  ;;  %2843 = vmatprep.mubr.bf16.mxu0 %v6475_v17  ;;  %v1073_v17 = vld [vmem:[%s10607_s1 + $0x130] sm:$0xff]  ;;  %v5812_v23 = vmul.f32 -1.442695, %v169_v13  ;;  %v166_v18 = vld [vmem:[%s10605_s0 + $0x458] sm:$0xff] }
  0xf6   :  { %v7237_v38 = vpop.eup %7236  ;;  %v1956_v39 = vmul.f32 %v1467_v63, %v1092_v25  ;;  %v1462_v40 = vpop.permute.xlu0 %1461  ;;  %1716 = vperm.xlu1 %6465, %v8024_v56   ;;  %7258 = vrcp.f32 %v706_v28  ;;  %v720_v21 = vadd.f32 1.0, %v7235_v32  ;;  %v6481_v6 = vld [vmem:[%s10606_s3 + $0x16c] ss:$36 sps:$4 sm:$0xff]   ;;  %v5810_v63 = vmul.f32 -1.442695, %v167_v1 }
  0xf7   :  { %v7239_v41 = vpop.eup %7238  ;;  %v1955_v42 = vmul.f32 %v1462_v40, %v1091_v27  ;;  %1711 = vperm.xlu0 %6464, %v8029_v43   ;;  %6143 = vmatpush3.bf16.msra.mxu1 %v2064_v33  ;;  %7260 = vrcp.f32 %v705_v34  ;;  %v719_v29 = vadd.f32 1.0, %v7237_v38  ;;  %v165_v28 = vld [vmem:[%s10605_s0 + $0x450] sm:$0xff]  ;;  %v1088_v33 = vld [vmem:[%s10607_s1 + $0x1a8] sm:$0xff]  ;;  %v1087_v38 = vld [vmem:[%s10607_s1 + $0x1a0] sm:$0xff] }
  0xf8   :  { %v7241_v46 = vpop.eup %7240  ;;  %v704_v45 = vadd.f32 1.0, %v7239_v41  ;;  %7262 = vpow2.f32 %v5767_v30  ;;  %v164_v34 = vld [vmem:[%s10605_s0 + $0x448] sm:$0xff]  ;;  %v163_v40 = vld [vmem:[%s10605_s0 + $0x440] sm:$0xff] }
  0xf9   :  { %v7243_v49 = vpop.eup %7242  ;;  %v2071_v50 = vpack.c.bf16 %v1956_v39, %v1955_v42  ;;  %v1387_v51 = vpop.permute.xlu1 %1386  ;;  %v703_v52 = vadd.f32 1.0, %v7241_v46  ;;  %7264 = vpow2.f32 %v5766_v37  ;;  %v5809_v39 = vmul.f32 -1.442695, %v166_v18  ;;  %v1070_v18 = vld [vmem:[%s10607_s1 + $0x118] sm:$0xff] }
  0xfa   :  { %v7245_v4 = vpop.eup %7244  ;;  %v1940_v54 = vmul.f32 %v1387_v51, %v1076_v44  ;;  %v1382_v55 = vpop.permute.xlu0 %1381  ;;  %1786 = vperm.xlu1 %6465, %v8034_v31   ;;  %7266 = vrcp.f32 %v720_v21  ;;  %v718_v56 = vadd.f32 1.0, %v7243_v49  ;;  %v5808_v44 = vmul.f32 -1.442695, %v165_v28 }
  0xfb   :  { %v7247_v57 = vpop.eup %7246  ;;  %v1939_v58 = vmul.f32 %v1382_v55, %v1075_v47  ;;  %1781 = vperm.xlu0 %6464, %v8036_v5   ;;  %6144 = vmatprep.subr.bf16.mxu1 %v2071_v50  ;;  %7268 = vrcp.f32 %v719_v29  ;;  %v717_v43 = vadd.f32 1.0, %v7245_v4  ;;  %v1072_v50 = vld [vmem:[%s10607_s1 + $0x128] sm:$0xff]  ;;  %v5806_v51 = vmul.f32 -1.442695, %v163_v40  ;;  %v1071_v4 = vld [vmem:[%s10607_s1 + $0x120] sm:$0xff] }
  0xfc   :  { %v7249_v60 = vpop.eup %7248  ;;  %7270 = vrcp.f32 %v704_v45  ;;  %v702_v31 = vadd.f32 1.0, %v7247_v57  ;;  %2844 = vmatmul.mubr.bf16.gmra.mxu0 %v6477_v36  ;;  %v5807_v45 = vmul.f32 -1.442695, %v164_v34  ;;  %v6483_v55 = vld [vmem:[%s10606_s3 + $0x168] ss:$36 sps:$4 sm:$0xff]   ;;  %v155_v40 = vld [vmem:[%s10605_s0 + $0x400] sm:$0xff] }
  0xfd   :  { %v7251_v48 = vpop.eup %7250  ;;  %v2063_v35 = vpack.c.bf16 %v1940_v54, %v1939_v58  ;;  %v1457_v2 = vpop.permute.xlu1 %1456  ;;  %7272 = vrcp.f32 %v703_v52  ;;  %v701_v5 = vadd.f32 1.0, %v7249_v60  ;;  %2851 = vmatprep.mubr.bf16.mxu0 %v6478_v53  ;;  %v162_v52 = vld [vmem:[%s10605_s0 + $0x438] sm:$0xff] }
  0xfe   :  { %v7253_v7 = vpop.eup %7252  ;;  %v1954_v9 = vmul.f32 %v1457_v2, %v1090_v59  ;;  %v1452_v10 = vpop.permute.xlu0 %1451  ;;  %1706 = vperm.xlu1 %6465, %v8038_v8   ;;  %7274 = vrcp.f32 %v718_v56  ;;  %v716_v12 = vadd.f32 1.0, %v7251_v48  ;;  %v168_v8 = vld [vmem:[%s10605_s0 + $0x468] sm:$0xff]  ;;  %v161_v56 = vld [vmem:[%s10605_s0 + $0x430] sm:$0xff]  ;;  %v5805_v2 = vmul.f32 -1.442695, %v162_v52 }
  0xff   :  { %v1953_v14 = vmul.f32 %v1452_v10, %v1089_v62  ;;  %1701 = vperm.xlu0 %6464, %v8043_v11   ;;  %6145 = vmatpush3.bf16.msra.mxu1 %v2063_v35  ;;  %7276 = vrcp.f32 %v717_v43  ;;  %v715_v15 = vadd.f32 1.0, %v7253_v7  ;;  %v6480_v11 = vld [vmem:[%s10606_s3 + $0x120] ss:$36 sps:$4 sm:$0xff]   ;;  %v5811_v27 = vmul.f32 -1.442695, %v168_v8  ;;  %v160_v62 = vld [vmem:[%s10605_s0 + $0x428] sm:$0xff] }
 0x100   :  { %7278 = vrcp.f32 %v702_v31  ;;  %v6484_v60 = vld [vmem:[%s10606_s3 + $0x1b4] ss:$36 sps:$4 sm:$0xff]   ;;  %v5804_v10 = vmul.f32 -1.442695, %v161_v56  ;;  %v5798_v52 = vmul.f32 -1.442695, %v155_v40 }
 0x101   :  { %v7255_v20 = vpop.eup %7254  ;;  %v2070_v16 = vpack.c.bf16 %v1954_v9, %v1953_v14  ;;  %v1377_v22 = vpop.permute.xlu1 %1376  ;;  %7280 = vrcp.f32 %v701_v5  ;;  %v159_v5 = vld [vmem:[%s10605_s0 + $0x420] sm:$0xff]  ;;  %v1086_v9 = vld [vmem:[%s10607_s1 + $0x198] sm:$0xff]  ;;  %v1085_v14 = vld [vmem:[%s10607_s1 + $0x190] sm:$0xff] }
 0x102   :  { %v7257_v25 = vpop.eup %7256  ;;  %v1938_v26 = vmul.f32 %v1377_v22, %v1074_v3  ;;  %v1372_v24 = vpop.permute.xlu0 %1371  ;;  %1776 = vperm.xlu1 %6465, %v7255_v20   ;;  %7282 = vrcp.f32 %v716_v12  ;;  %v158_v12 = vld [vmem:[%s10605_s0 + $0x418] sm:$0xff]  ;;  %v5803_v3 = vmul.f32 -1.442695, %v160_v62 }
 0x103   :  { %v7259_v30 = vpop.eup %7258  ;;  %v1937_v32 = vmul.f32 %v1372_v24, %v1073_v17  ;;  %1771 = vperm.xlu0 %6464, %v7257_v25   ;;  %6146 = vmatprep.subr.bf16.mxu1 %v2070_v16  ;;  %7284 = vrcp.f32 %v715_v15  ;;  %v157_v15 = vld [vmem:[%s10605_s0 + $0x410] sm:$0xff]  ;;  %v5801_v22 = vmul.f32 -1.442695, %v158_v12  ;;  %v6489_v62 = vld [vmem:[%s10606_s3 + $0x1f8] ss:$36 sps:$4 sm:$0xff]  }
 0x104   :  { %v7261_v37 = vpop.eup %7260  ;;  %2852 = vmatmul.mubr.bf16.gmra.mxu0 %v6480_v11  ;;  %7286 = vpow2.f32 %v5813_v19  ;;  %v5802_v19 = vmul.f32 -1.442695, %v159_v5  ;;  %v5800_v25 = vmul.f32 -1.442695, %v157_v15  ;;  %v1069_v24 = vld [vmem:[%s10607_s1 + $0x110] sm:$0xff] }
 0x105   :  { %v7263_v21 = vpop.eup %7262  ;;  %v2062_v41 = vpack.c.bf16 %v1938_v26, %v1937_v32  ;;  %v1447_v42 = vpop.permute.xlu1 %1446  ;;  %7288 = vpow2.f32 %v5812_v23  ;;  %2859 = vmatprep.mubr.bf16.mxu0 %v6481_v6  ;;  %v1129_v15 = vld [vmem:[%s10607_s1 + $0x2f0] sm:$0xff] }
 0x106   :  { %v7265_v29 = vpop.eup %7264  ;;  %v1952_v46 = vmul.f32 %v1447_v42, %v1088_v33  ;;  %v1442_v47 = vpop.permute.xlu0 %1441  ;;  %1696 = vperm.xlu1 %6465, %v7259_v30   ;;  %7290 = vpow2.f32 %v5811_v27  ;;  %v700_v54 = vadd.f32 1.0, %v7263_v21  ;;  %v6486_v27 = vld [vmem:[%s10606_s3 + $0x1b0] ss:$36 sps:$4 sm:$0xff]   ;;  %v6487_v33 = vld [vmem:[%s10606_s3 + $0x1fc] ss:$36 sps:$4 sm:$0xff]   ;;  %v1084_v42 = vld [vmem:[%s10607_s1 + $0x188] sm:$0xff] }
 0x107   :  { %v7267_v36 = vpop.eup %7266  ;;  %v1951_v49 = vmul.f32 %v1442_v47, %v1087_v38  ;;  %1691 = vperm.xlu0 %6464, %v7261_v37   ;;  %6147 = vmatpush3.bf16.msra.mxu1 %v2062_v41  ;;  %7292 = vpow2.f32 %v5810_v63  ;;  %v699_v43 = vadd.f32 1.0, %v7265_v29  ;;  %v156_v63 = vld [vmem:[%s10605_s0 + $0x408] sm:$0xff] }
 0x108   :  { %v7269_v53 = vpop.eup %7268  ;;  %7294 = vpow2.f32 %v5809_v39 }
 0x109   :  { %v7271_v57 = vpop.eup %7270  ;;  %v2069_v58 = vpack.c.bf16 %v1952_v46, %v1951_v49  ;;  %v1367_v59 = vpop.permute.xlu1 %1366  ;;  %7296 = vpow2.f32 %v5808_v44  ;;  %v1083_v46 = vld [vmem:[%s10607_s1 + $0x180] sm:$0xff] }
 0x10a   :  { %v7273_v31 = vpop.eup %7272  ;;  %v1936_v48 = vmul.f32 %v1367_v59, %v1072_v50  ;;  %v1362_v35 = vpop.permute.xlu0 %1361  ;;  %1766 = vperm.xlu1 %6465, %v7267_v36   ;;  %7298 = vpow2.f32 %v5807_v45  ;;  %v5799_v45 = vmul.f32 -1.442695, %v156_v63  ;;  %v6499_v63 = vld [vmem:[%s10606_s3 + $0x28c] ss:$36 sps:$4 sm:$0xff]  }
 0x10b   :  { %v7275_v61 = vpop.eup %7274  ;;  %v1935_v7 = vmul.f32 %v1362_v35, %v1071_v4  ;;  %1761 = vperm.xlu0 %6464, %v7269_v53   ;;  %6148 = vmatprep.subr.bf16.mxu1 %v2069_v58  ;;  %7300 = vpow2.f32 %v5806_v51  ;;  %v1068_v58 = vld [vmem:[%s10607_s1 + $0x108] sm:$0xff] }
 0x10c   :  { %v7277_v13 = vpop.eup %7276  ;;  %7302 = vrcp.f32 %v700_v54  ;;  %2860 = vmatmul.mubr.bf16.gmra.mxu0 %v6483_v55 }
 0x10d   :  { %v7279_v8 = vpop.eup %7278  ;;  %v2061_v17 = vpack.c.bf16 %v1936_v48, %v1935_v7  ;;  %v1437_v11 = vpop.permute.xlu1 %1436  ;;  %7304 = vrcp.f32 %v699_v43  ;;  %2867 = vmatprep.mubr.bf16.mxu0 %v6484_v60  ;;  %v1067_v60 = vld [vmem:[%s10607_s1 + $0x100] sm:$0xff] }
 0x10e   :  { %v7281_v1 = vpop.eup %7280  ;;  %v1950_v20 = vmul.f32 %v1437_v11, %v1086_v9  ;;  %v1432_v16 = vpop.permute.xlu0 %1431  ;;  %1686 = vperm.xlu1 %6465, %v7271_v57   ;;  %7306 = vpow2.f32 %v5805_v2  ;;  %v6493_v2 = vld [vmem:[%s10606_s3 + $0x244] ss:$36 sps:$4 sm:$0xff]  }
 0x10f   :  { %v8168_v23 = vpop.eup %7282  ;;  %v1949_v6 = vmul.f32 %v1432_v16, %v1085_v14  ;;  %1681 = vperm.xlu0 %6464, %v7273_v31   ;;  %6149 = vmatpush3.bf16.msra.mxu1 %v2061_v17  ;;  %7308 = vpow2.f32 %v5804_v10 }
 0x110   :  { %v8173_v26 = vpop.eup %7284  ;;  %7310 = vpow2.f32 %v5803_v3 }
 0x111   :  { %v7287_v28 = vpop.eup %7286  ;;  %v2068_v30 = vpack.c.bf16 %v1950_v20, %v1949_v6  ;;  %v1357_v32 = vpop.permute.xlu1 %1356  ;;  %7312 = vpow2.f32 %v5802_v19 }
 0x112   :  { %v7289_v34 = vpop.eup %7288  ;;  %v1934_v37 = vmul.f32 %v1357_v32, %v1070_v18  ;;  %v1352_v38 = vpop.permute.xlu0 %1351  ;;  %1756 = vperm.xlu1 %6465, %v7275_v61   ;;  %v746_v39 = vadd.f32 1.0, %v7287_v28  ;;  %7314 = vpow2.f32 %v5801_v22  ;;  %v6490_v22 = vld [vmem:[%s10606_s3 + $0x8] ss:$36 sps:$4 sm:$0xff]   ;;  %v1114_v18 = vld [vmem:[%s10607_s1 + $0x278] sm:$0xff] }
 0x113   :  { %v7291_v21 = vpop.eup %7290  ;;  %v1933_v41 = vmul.f32 %v1352_v38, %v1069_v24  ;;  %1751 = vperm.xlu0 %6464, %v7277_v13   ;;  %6150 = vmatprep.subr.bf16.mxu1 %v2068_v30  ;;  %v745_v44 = vadd.f32 1.0, %v7289_v34  ;;  %7316 = vpow2.f32 %v5800_v25  ;;  %v1130_v13 = vld [vmem:[%s10607_s1 + $0x2f8] sm:$0xff]  ;;  %v1113_v24 = vld [vmem:[%s10607_s1 + $0x270] sm:$0xff] }
 0x114   :  { %v7293_v29 = vpop.eup %7292  ;;  %7318 = vrcp.f32 %v746_v39  ;;  %v744_v47 = vadd.f32 1.0, %v7291_v21  ;;  %2868 = vmatmul.mubr.bf16.gmra.mxu0 %v6486_v27  ;;  %v6495_v27 = vld [vmem:[%s10606_s3 + $0x240] ss:$36 sps:$4 sm:$0xff]   ;;  %v6496_v28 = vld [vmem:[%s10606_s3 + $0x54] ss:$36 sps:$4 sm:$0xff]  }
 0x115   :  { %v7295_v36 = vpop.eup %7294  ;;  %v2060_v49 = vpack.c.bf16 %v1934_v37, %v1933_v41  ;;  %v1427_v50 = vpop.permute.xlu1 %1426  ;;  %7320 = vrcp.f32 %v745_v44  ;;  %v743_v51 = vadd.f32 1.0, %v7293_v29  ;;  %2875 = vmatprep.mubr.bf16.mxu0 %v6487_v33  ;;  %v1128_v41 = vld [vmem:[%s10607_s1 + $0x2e8] sm:$0xff]  ;;  %v1127_v29 = vld [vmem:[%s10607_s1 + $0x2e0] sm:$0xff] }
 0x116   :  { %v7297_v53 = vpop.eup %7296  ;;  %v1948_v4 = vmul.f32 %v1427_v50, %v1084_v42  ;;  %v1422_v54 = vpop.permute.xlu0 %1421  ;;  %1676 = vperm.xlu1 %6465, %v7279_v8   ;;  %7322 = vrcp.f32 %v744_v47  ;;  %v742_v55 = vadd.f32 1.0, %v7295_v36 }
 0x117   :  { %v7299_v56 = vpop.eup %7298  ;;  %v1947_v57 = vmul.f32 %v1422_v54, %v1083_v46  ;;  %1671 = vperm.xlu0 %6464, %v7281_v1   ;;  %6151 = vmatpush3.bf16.msra.mxu1 %v2060_v49  ;;  %7324 = vrcp.f32 %v743_v51  ;;  %v741_v59 = vadd.f32 1.0, %v7297_v53  ;;  %v1112_v54 = vld [vmem:[%s10607_s1 + $0x268] sm:$0xff] }
 0x118   :  { %v7301_v43 = vpop.eup %7300  ;;  %7326 = vpow2.f32 %v5799_v45  ;;  %v740_v9 = vadd.f32 1.0, %v7299_v56 }
 0x119   :  { %v7303_v31 = vpop.eup %7302  ;;  %v2067_v48 = vpack.c.bf16 %v1948_v4, %v1947_v57  ;;  %v1347_v35 = vpop.permute.xlu1 %1346  ;;  %7328 = vpow2.f32 %v5798_v52  ;;  %v739_v14 = vadd.f32 1.0, %v7301_v43  ;;  %v6498_v52 = vld [vmem:[%s10606_s3 + $0x50] ss:$36 sps:$4 sm:$0xff]   ;;  %v1111_v57 = vld [vmem:[%s10607_s1 + $0x260] sm:$0xff] }
 0x11a   :  { %v7305_v5 = vpop.eup %7304  ;;  %v1932_v61 = vmul.f32 %v1347_v35, %v1068_v58  ;;  %v1342_v7 = vpop.permute.xlu0 %1341  ;;  %1746 = vperm.xlu1 %6465, %v8168_v23   ;;  %7330 = vrcp.f32 %v742_v55  ;;  %v6501_v58 = vld [vmem:[%s10606_s3 + $0x288] ss:$36 sps:$4 sm:$0xff]  }
 0x11b   :  { %v7307_v10 = vpop.eup %7306  ;;  %v1931_v12 = vmul.f32 %v1342_v7, %v1067_v60  ;;  %1741 = vperm.xlu0 %6464, %v8173_v26   ;;  %6152 = vmatprep.subr.bf16.mxu1 %v2067_v48  ;;  %7332 = vrcp.f32 %v741_v59  ;;  %v6502_v59 = vld [vmem:[%s10606_s3 + $0x9c] ss:$36 sps:$4 sm:$0xff]  }
 0x11c   :  { %v7309_v3 = vpop.eup %7308  ;;  %2876 = vmatmul.mubr.bf16.gmra.mxu0 %v6489_v62  ;;  %7334 = vrcp.f32 %v740_v9  ;;  %v738_v16 = vadd.f32 1.0, %v7307_v10  ;;  %v6505_v62 = vld [vmem:[%s10606_s3 + $0x2d4] ss:$36 sps:$4 sm:$0xff]  }
 0x11d   :  { %v7311_v8 = vpop.eup %7310  ;;  %v2059_v17 = vpack.c.bf16 %v1932_v61, %v1931_v12  ;;  %v1657_v11 = vpop.permute.xlu1 %1656  ;;  %2883 = vmatprep.mubr.bf16.mxu0 %v6493_v2  ;;  %7336 = vrcp.f32 %v739_v14  ;;  %v737_v25 = vadd.f32 1.0, %v7309_v3  ;;  %v1126_v61 = vld [vmem:[%s10607_s1 + $0x2d8] sm:$0xff]  ;;  %v1125_v10 = vld [vmem:[%s10607_s1 + $0x2d0] sm:$0xff] }
 0x11e   :  { %v7313_v19 = vpop.eup %7312  ;;  %v1994_v1 = vmul.f32 %v1657_v11, %v1130_v13  ;;  %v1652_v20 = vpop.permute.xlu0 %1651  ;;  %1666 = vperm.xlu1 %6465, %v7303_v31   ;;  %7338 = vrcp.f32 %v738_v16  ;;  %v736_v39 = vadd.f32 1.0, %v7311_v8  ;;  %v1110_v11 = vld [vmem:[%s10607_s1 + $0x258] sm:$0xff]  ;;  %v6508_v16 = vld [vmem:[%s10606_s3 + $0xe4] ss:$36 sps:$4 sm:$0xff]  }
 0x11f   :  { %v7315_v23 = vpop.eup %7314  ;;  %v1993_v6 = vmul.f32 %v1652_v20, %v1129_v15  ;;  %1661 = vperm.xlu0 %6464, %v7305_v5   ;;  %6153 = vmatpush3.bf16.msra.mxu1 %v2059_v17  ;;  %7340 = vrcp.f32 %v737_v25  ;;  %v735_v42 = vadd.f32 1.0, %v7313_v19  ;;  %v6504_v15 = vld [vmem:[%s10606_s3 + $0x98] ss:$36 sps:$4 sm:$0xff]   ;;  %v6507_v20 = vld [vmem:[%s10606_s3 + $0x2d0] ss:$36 sps:$4 sm:$0xff]  }
 0x120   :  { %v7317_v26 = vpop.eup %7316  ;;  %7342 = vrcp.f32 %v736_v39  ;;  %v734_v51 = vadd.f32 1.0, %v7315_v23 }
 0x121   :  { %v7319_v30 = vpop.eup %7318  ;;  %v2090_v32 = vpack.c.bf16 %v1994_v1, %v1993_v6  ;;  %v1577_v33 = vpop.permute.xlu1 %1576  ;;  %7344 = vrcp.f32 %v735_v42  ;;  %v733_v55 = vadd.f32 1.0, %v7317_v26  ;;  %v1109_v1 = vld [vmem:[%s10607_s1 + $0x250] sm:$0xff]  ;;  %v6511_v6 = vld [vmem:[%s10606_s3 + $0x31c] ss:$36 sps:$4 sm:$0xff]  }
 0x122   :  { %v7321_v34 = vpop.eup %7320  ;;  %v1978_v37 = vmul.f32 %v1577_v33, %v1114_v18  ;;  %v1572_v38 = vpop.permute.xlu0 %1571  ;;  %1896 = vperm.xlu1 %6465, %v7319_v30   ;;  %2949 = vmatmul.mubr.bf16.vlgmr.msra.gmra.mxu1 %v6490_v22  ;;  %7346 = vrcp.f32 %v734_v51  ;;  %v1123_v30 = vld [vmem:[%s10607_s1 + $0x2c0] sm:$0xff]  ;;  %v6513_v42 = vld [vmem:[%s10606_s3 + $0x318] ss:$36 sps:$4 sm:$0xff]  }
 0x123   :  { %v7323_v40 = vpop.eup %7322  ;;  %v1977_v21 = vmul.f32 %v1572_v38, %v1113_v24  ;;  %1891 = vperm.xlu0 %6464, %v7321_v34   ;;  %6226 = vmatprep.subr.bf16.mxu0 %v2090_v32  ;;  %7348 = vrcp.f32 %v733_v55  ;;  %v1122_v51 = vld [vmem:[%s10607_s1 + $0x2b8] sm:$0xff] }
 0x124   :  { %v7325_v44 = vpop.eup %7324  ;;  %2884 = vmatmul.mubr.bf16.gmra.mxu0 %v6495_v27  ;;  %2956 = vmatprep.mubr.bf16.mxu1 %v6496_v28  ;;  %v1124_v27 = vld [vmem:[%s10607_s1 + $0x2c8] sm:$0xff] }
 0x125   :  { %v7327_v46 = vpop.eup %7326  ;;  %v2082_v47 = vpack.c.bf16 %v1978_v37, %v1977_v21  ;;  %v1647_v45 = vpop.permute.xlu1 %1646  ;;  %2891 = vmatprep.mubr.bf16.mxu0 %v6499_v63  ;;  %v6510_v37 = vld [vmem:[%s10606_s3 + $0xe0] ss:$36 sps:$4 sm:$0xff]  }
 0x126   :  { %v7329_v36 = vpop.eup %7328  ;;  %v1992_v49 = vmul.f32 %v1647_v45, %v1128_v41  ;;  %v1642_v50 = vpop.permute.xlu0 %1641  ;;  %1886 = vperm.xlu1 %6465, %v7323_v40   ;;  %v732_v35 = vadd.f32 1.0, %v7327_v46  ;;  %v1108_v40 = vld [vmem:[%s10607_s1 + $0x248] sm:$0xff]  ;;  %v1107_v41 = vld [vmem:[%s10607_s1 + $0x240] sm:$0xff] }
 0x127   :  { %v7331_v53 = vpop.eup %7330  ;;  %v1991_v4 = vmul.f32 %v1642_v50, %v1127_v29  ;;  %1881 = vperm.xlu0 %6464, %v7325_v44   ;;  %6227 = vmatpush3.bf16.msra.mxu0 %v2082_v47  ;;  %v731_v7 = vadd.f32 1.0, %v7329_v36  ;;  %v6514_v44 = vld [vmem:[%s10606_s3 + $0x12c] ss:$36 sps:$4 sm:$0xff]   ;;  %v6519_v47 = vld [vmem:[%s10606_s3 + $0x14] ss:$36 sps:$4 sm:$0xff]  }
 0x128   :  { %v7333_v56 = vpop.eup %7332  ;;  %7350 = vrcp.f32 %v732_v35 }
 0x129   :  { %v2089_v43 = vpack.c.bf16 %v1992_v49, %v1991_v4  ;;  %v1567_v60 = vpop.permute.xlu1 %1566  ;;  %v7335_v2 = vpop.eup %7334  ;;  %7352 = vrcp.f32 %v731_v7  ;;  %v1120_v7 = vld [vmem:[%s10607_s1 + $0x2a8] sm:$0xff] }
 0x12a   :  { %v1976_v31 = vmul.f32 %v1567_v60, %v1112_v54  ;;  %v1562_v48 = vpop.permute.xlu0 %1561  ;;  %1876 = vperm.xlu1 %6465, %v7331_v53   ;;  %2957 = vmatmul.mubr.bf16.gmra.mxu1 %v6498_v52  ;;  %v7337_v9 = vpop.eup %7336  ;;  %v1121_v53 = vld [vmem:[%s10607_s1 + $0x2b0] sm:$0xff] }
 0x12b   :  { %v1975_v5 = vmul.f32 %v1562_v48, %v1111_v57  ;;  %1871 = vperm.xlu0 %6464, %v7333_v56   ;;  %6228 = vmatprep.subr.bf16.mxu0 %v2089_v43  ;;  %v7339_v8 = vpop.eup %7338  ;;  %v6516_v57 = vld [vmem:[%s10606_s3 + $0x128] ss:$36 sps:$4 sm:$0xff]   ;;  %v3913_v43 = vld [vmem:[%s10608_s5] sm:$0xff]  ;;  %v1105_v60 = vld [vmem:[%s10607_s1 + $0x230] sm:$0xff] }
 0x12c   :  { %2892 = vmatmul.mubr.bf16.gmra.mxu0 %v6501_v58  ;;  %2964 = vmatprep.mubr.bf16.mxu1 %v6502_v59  ;;  %v7341_v19 = vpop.eup %7340  ;;  %v1106_v59 = vld [vmem:[%s10607_s1 + $0x238] sm:$0xff] }
 0x12d   :  { %v2081_v12 = vpack.c.bf16 %v1976_v31, %v1975_v5  ;;  %v1637_v13 = vpop.permute.xlu1 %1636  ;;  %2899 = vmatprep.mubr.bf16.mxu0 %v6505_v62  ;;  %v7343_v26 = vpop.eup %7342  ;;  %v3914_v62 = vld [vmem:[%s10608_s5 + $0x8] sm:$0xff]  ;;  %v6520_v31 = vld [vmem:[%s10606_s3 + $0x174] ss:$36 sps:$4 sm:$0xff]  }
 0x12e   :  { %v1990_v14 = vmul.f32 %v1637_v13, %v1126_v61  ;;  %v1632_v3 = vpop.permute.xlu0 %1631  ;;  %1866 = vperm.xlu1 %6465, %v7335_v2   ;;  %v7345_v28 = vpop.eup %7344 }
 0x12f   :  { %v1989_v17 = vmul.f32 %v1632_v3, %v1125_v10  ;;  %1861 = vperm.xlu0 %6464, %v7337_v9   ;;  %6229 = vmatpush3.bf16.msra.mxu0 %v2081_v12  ;;  %v7347_v38 = vpop.eup %7346  ;;  %v1119_v9 = vld [vmem:[%s10607_s1 + $0x2a0] sm:$0xff]  ;;  %v3915_v10 = vld [vmem:[%s10608_s5 + $0x10] sm:$0xff] }
 0x130   :  { %v7349_v21 = vpop.eup %7348 }
 0x131   :  { %v2088_v22 = vpack.c.bf16 %v1990_v14, %v1989_v17  ;;  %v1557_v23 = vpop.permute.xlu1 %1556  ;;  %v1104_v17 = vld [vmem:[%s10607_s1 + $0x228] sm:$0xff] }
 0x132   :  { %v1974_v18 = vmul.f32 %v1557_v23, %v1110_v11  ;;  %v1552_v25 = vpop.permute.xlu0 %1551  ;;  %1856 = vperm.xlu1 %6465, %v7339_v8   ;;  %2965 = vmatmul.mubr.bf16.gmra.mxu1 %v6504_v15  ;;  %v6522_v15 = vld [vmem:[%s10606_s3 + $0x170] ss:$36 sps:$4 sm:$0xff]   ;;  %v1103_v11 = vld [vmem:[%s10607_s1 + $0x220] sm:$0xff] }
 0x133   :  { %v1973_v24 = vmul.f32 %v1552_v25, %v1109_v1  ;;  %1851 = vperm.xlu0 %6464, %v7341_v19   ;;  %6230 = vmatprep.subr.bf16.mxu0 %v2088_v22  ;;  %v3916_v19 = vld [vmem:[%s10608_s5 + $0x18] sm:$0xff]  ;;  %v1117_v25 = vld [vmem:[%s10607_s1 + $0x290] sm:$0xff] }
 0x134   :  { %2900 = vmatmul.mubr.bf16.gmra.mxu0 %v6507_v20  ;;  %2972 = vmatprep.mubr.bf16.mxu1 %v6508_v16  ;;  %v6526_v1 = vld [vmem:[%s10606_s3 + $0x1bc] ss:$36 sps:$4 sm:$0xff]  }
 0x135   :  { %v2080_v32 = vpack.c.bf16 %v1974_v18, %v1973_v24  ;;  %v1627_v33 = vpop.permute.xlu1 %1626  ;;  %2907 = vmatprep.mubr.bf16.mxu0 %v6511_v6  ;;  %v7351_v49 = vpop.eup %7350  ;;  %v1118_v18 = vld [vmem:[%s10607_s1 + $0x298] sm:$0xff] }
 0x136   :  { %v1988_v63 = vmul.f32 %v1627_v33, %v1124_v27  ;;  %v1622_v34 = vpop.permute.xlu0 %1621  ;;  %1846 = vperm.xlu1 %6465, %v7343_v26   ;;  %v7353_v52 = vpop.eup %7352  ;;  %v3917_v26 = vld [vmem:[%s10608_s5 + $0x20] sm:$0xff] }
 0x137   :  { %v1987_v39 = vmul.f32 %v1622_v34, %v1123_v30  ;;  %1841 = vperm.xlu0 %6464, %v7345_v28   ;;  %6231 = vmatpush3.bf16.msra.mxu0 %v2080_v32  ;;  %v6528_v32 = vld [vmem:[%s10606_s3 + $0x1b8] ss:$36 sps:$4 sm:$0xff]   ;;  %v1101_v34 = vld [vmem:[%s10607_s1 + $0x210] sm:$0xff] }
 0x139   :  { %v2087_v29 = vpack.c.bf16 %v1988_v63, %v1987_v39  ;;  %v1547_v46 = vpop.permute.xlu1 %1546  ;;  %v1102_v63 = vld [vmem:[%s10607_s1 + $0x218] sm:$0xff] }
 0x13a   :  { %v1972_v45 = vmul.f32 %v1547_v46, %v1108_v40  ;;  %v1542_v36 = vpop.permute.xlu0 %1541  ;;  %1836 = vperm.xlu1 %6465, %v7347_v38   ;;  %2973 = vmatmul.mubr.bf16.gmra.mxu1 %v6510_v37  ;;  %v3918_v37 = vld [vmem:[%s10608_s5 + $0x28] sm:$0xff] }
 0x13b   :  { %v1971_v50 = vmul.f32 %v1542_v36, %v1107_v41  ;;  %1831 = vperm.xlu0 %6464, %v7349_v21   ;;  %6232 = vmatprep.subr.bf16.mxu0 %v2087_v29  ;;  %v6532_v38 = vld [vmem:[%s10606_s3 + $0x204] ss:$36 sps:$4 sm:$0xff]  }
 0x13c   :  { %2908 = vmatmul.mubr.bf16.gmra.mxu0 %v6513_v42  ;;  %2980 = vmatprep.mubr.bf16.mxu1 %v6514_v44  ;;  %v1116_v44 = vld [vmem:[%s10607_s1 + $0x288] sm:$0xff]  ;;  %v1115_v29 = vld [vmem:[%s10607_s1 + $0x280] sm:$0xff] }
 0x13d   :  { %v2079_v4 = vpack.c.bf16 %v1972_v45, %v1971_v50  ;;  %v1617_v54 = vpop.permute.xlu1 %1616  ;;  %3077 = vmatprep.mubr.bf16.mxu0 %v6519_v47 }
 0x13e   :  { %v1986_v55 = vmul.f32 %v1617_v54, %v1122_v51  ;;  %v1612_v56 = vpop.permute.xlu0 %1611  ;;  %1826 = vperm.xlu1 %6465, %v7351_v49   ;;  %v6534_v49 = vld [vmem:[%s10606_s3 + $0x200] ss:$36 sps:$4 sm:$0xff]   ;;  %v1100_v51 = vld [vmem:[%s10607_s1 + $0x208] sm:$0xff] }
 0x13f   :  { %v1985_v58 = vmul.f32 %v1612_v56, %v1121_v53  ;;  %1821 = vperm.xlu0 %6464, %v7353_v52   ;;  %6233 = vmatpush3.bf16.msra.mxu0 %v2079_v4  ;;  %v6538_v52 = vld [vmem:[%s10606_s3 + $0x24c] ss:$36 sps:$4 sm:$0xff]   ;;  %v1099_v53 = vld [vmem:[%s10607_s1 + $0x200] sm:$0xff] }
 0x141   :  { %v2086_v48 = vpack.c.bf16 %v1986_v55, %v1985_v58  ;;  %v1537_v35 = vpop.permute.xlu1 %1536  ;;  %v1162_v58 = vld [vmem:[%s10607_s1 + $0x3f8] sm:$0xff] }
 0x142   :  { %v1970_v2 = vmul.f32 %v1537_v35, %v1106_v59  ;;  %v1532_v5 = vpop.permute.xlu0 %1531  ;;  %3939 = vperm.xlu1 %6465, %v3913_v43   ;;  %2981 = vmatmul.mubr.bf16.gmra.mxu1 %v6516_v57  ;;  %v1161_v59 = vld [vmem:[%s10607_s1 + $0x3f0] sm:$0xff]  ;;  %v6540_v35 = vld [vmem:[%s10606_s3 + $0x248] ss:$36 sps:$4 sm:$0xff]  }
 0x143   :  { %v1969_v61 = vmul.f32 %v1532_v5, %v1105_v60  ;;  %3944 = vperm.xlu0 %6464, %v3914_v62   ;;  %6234 = vmatprep.subr.bf16.mxu0 %v2086_v48  ;;  %v6517_v48 = vld [vmem:[%s10606_s3 + $0x10] ss:$36 sps:$4 sm:$0xff]   ;;  %v1146_v5 = vld [vmem:[%s10607_s1 + $0x378] sm:$0xff] }
 0x144   :  { %2988 = vmatprep.mubr.bf16.mxu1 %v6520_v31 }
 0x145   :  { %v2078_v12 = vpack.c.bf16 %v1970_v2, %v1969_v61  ;;  %v1607_v13 = vpop.permute.xlu1 %1606  ;;  %v6523_v61 = vld [vmem:[%s10606_s3 + $0x5c] ss:$36 sps:$4 sm:$0xff]  }
 0x146   :  { %v1984_v14 = vmul.f32 %v1607_v13, %v1120_v7  ;;  %v1602_v3 = vpop.permute.xlu0 %1601  ;;  %v1145_v7 = vld [vmem:[%s10607_s1 + $0x370] sm:$0xff] }
 0x147   :  { %v1983_v8 = vmul.f32 %v1602_v3, %v1119_v9  ;;  %3949 = vperm.xlu0 %6464, %v3915_v10   ;;  %6235 = vmatpush3.bf16.msra.mxu0 %v2078_v12  ;;  %v6544_v9 = vld [vmem:[%s10606_s3 + $0x294] ss:$36 sps:$4 sm:$0xff]  }
 0x149   :  { %v2085_v20 = vpack.c.bf16 %v1984_v14, %v1983_v8  ;;  %v1527_v16 = vpop.permute.xlu1 %1526  ;;  %v1159_v8 = vld [vmem:[%s10607_s1 + $0x3e0] sm:$0xff] }
 0x14a   :  { %v1968_v22 = vmul.f32 %v1527_v16, %v1104_v17  ;;  %v1522_v23 = vpop.permute.xlu0 %1521  ;;  %2989 = vmatmul.mubr.bf16.gmra.mxu1 %v6522_v15  ;;  %v1160_v15 = vld [vmem:[%s10607_s1 + $0x3e8] sm:$0xff]  ;;  %v6546_v16 = vld [vmem:[%s10606_s3 + $0x290] ss:$36 sps:$4 sm:$0xff]  }
 0x14b   :  { %v1967_v6 = vmul.f32 %v1522_v23, %v1103_v11  ;;  %3954 = vperm.xlu0 %6464, %v3916_v19   ;;  %6236 = vmatprep.subr.bf16.mxu0 %v2085_v20  ;;  %v6525_v20 = vld [vmem:[%s10606_s3 + $0x58] ss:$36 sps:$4 sm:$0xff]   ;;  %v1144_v23 = vld [vmem:[%s10607_s1 + $0x368] sm:$0xff] }
 0x14c   :  { %2996 = vmatprep.mubr.bf16.mxu1 %v6526_v1 }
 0x14d   :  { %v2077_v24 = vpack.c.bf16 %v1968_v22, %v1967_v6  ;;  %v1597_v27 = vpop.permute.xlu1 %1596  ;;  %v6529_v6 = vld [vmem:[%s10606_s3 + $0xa4] ss:$36 sps:$4 sm:$0xff]  }
 0x14e   :  { %v1982_v28 = vmul.f32 %v1597_v27, %v1118_v18  ;;  %v1592_v30 = vpop.permute.xlu0 %1591  ;;  %v1143_v18 = vld [vmem:[%s10607_s1 + $0x360] sm:$0xff] }
 0x14f   :  { %v1981_v33 = vmul.f32 %v1592_v30, %v1117_v25  ;;  %3959 = vperm.xlu0 %6464, %v3917_v26   ;;  %6237 = vmatpush3.bf16.msra.mxu0 %v2077_v24  ;;  %v6550_v25 = vld [vmem:[%s10606_s3 + $0x2dc] ss:$36 sps:$4 sm:$0xff]  }
 0x151   :  { %v2084_v39 = vpack.c.bf16 %v1982_v28, %v1981_v33  ;;  %v1517_v40 = vpop.permute.xlu1 %1516  ;;  %v1157_v33 = vld [vmem:[%s10607_s1 + $0x3d0] sm:$0xff] }
 0x152   :  { %v1966_v21 = vmul.f32 %v1517_v40, %v1102_v63  ;;  %v1512_v41 = vpop.permute.xlu0 %1511  ;;  %2997 = vmatmul.mubr.bf16.gmra.mxu1 %v6528_v32  ;;  %v1158_v32 = vld [vmem:[%s10607_s1 + $0x3d8] sm:$0xff] }
 0x153   :  { %v1965_v42 = vmul.f32 %v1512_v41, %v1101_v34  ;;  %3964 = vperm.xlu0 %6464, %v3918_v37   ;;  %6238 = vmatprep.subr.bf16.mxu0 %v2084_v39  ;;  %v6531_v39 = vld [vmem:[%s10606_s3 + $0xa0] ss:$36 sps:$4 sm:$0xff]   ;;  %v6552_v40 = vld [vmem:[%s10606_s3 + $0x2d8] ss:$36 sps:$4 sm:$0xff]  }
 0x154   :  { %3004 = vmatprep.mubr.bf16.mxu1 %v6532_v38  ;;  %v1142_v41 = vld [vmem:[%s10607_s1 + $0x358] sm:$0xff] }
 0x155   :  { %v2076_v46 = vpack.c.bf16 %v1966_v21, %v1965_v42  ;;  %v1587_v47 = vpop.permute.xlu1 %1586  ;;  %v6535_v42 = vld [vmem:[%s10606_s3 + $0xec] ss:$36 sps:$4 sm:$0xff]  }
 0x156   :  { %v1980_v45 = vmul.f32 %v1587_v47, %v1116_v44  ;;  %v1582_v36 = vpop.permute.xlu0 %1581  ;;  %v1141_v44 = vld [vmem:[%s10607_s1 + $0x350] sm:$0xff] }
 0x157   :  { %v1979_v50 = vmul.f32 %v1582_v36, %v1115_v29  ;;  %6239 = vmatpush3.bf16.msra.mxu0 %v2076_v46  ;;  %v6556_v29 = vld [vmem:[%s10606_s3 + $0x324] ss:$36 sps:$4 sm:$0xff]  }
 0x159   :  { %v2083_v4 = vpack.c.bf16 %v1980_v45, %v1979_v50  ;;  %v1507_v54 = vpop.permute.xlu1 %1506  ;;  %v1156_v50 = vld [vmem:[%s10607_s1 + $0x3c8] sm:$0xff] }
 0x15a   :  { %v1964_v55 = vmul.f32 %v1507_v54, %v1100_v51  ;;  %v1502_v56 = vpop.permute.xlu0 %1501  ;;  %3005 = vmatmul.mubr.bf16.gmra.mxu1 %v6534_v49  ;;  %v1155_v51 = vld [vmem:[%s10607_s1 + $0x3c0] sm:$0xff] }
 0x15b   :  { %v1963_v57 = vmul.f32 %v1502_v56, %v1099_v53  ;;  %6240 = vmatprep.subr.bf16.mxu0 %v2083_v4  ;;  %3012 = vmatprep.mubr.bf16.mxu1 %v6538_v52  ;;  %v6558_v56 = vld [vmem:[%s10606_s3 + $0x320] ss:$36 sps:$4 sm:$0xff]  }
 0x15d   :  { %v2075_v43 = vpack.c.bf16 %v1964_v55, %v1963_v57  ;;  %v1817_v60 = vpop.permute.xlu1 %1816  ;;  %v6537_v55 = vld [vmem:[%s10606_s3 + $0xe8] ss:$36 sps:$4 sm:$0xff]  }
 0x15e   :  { %v2026_v62 = vmul.f32 %v1817_v60, %v1162_v58  ;;  %v1812_v31 = vpop.permute.xlu0 %1811  ;;  %v1140_v58 = vld [vmem:[%s10607_s1 + $0x348] sm:$0xff]  ;;  %v6566_v60 = vld [vmem:[%s10606_s3 + $0x1c] ss:$36 sps:$4 sm:$0xff]  }
 0x15f   :  { %v2025_v2 = vmul.f32 %v1812_v31, %v1161_v59  ;;  %6241 = vmatpush3.bf16.msra.mxu0 %v2075_v43  ;;  %v6541_v59 = vld [vmem:[%s10606_s3 + $0x134] ss:$36 sps:$4 sm:$0xff]   ;;  %v1139_v43 = vld [vmem:[%s10607_s1 + $0x340] sm:$0xff] }
 0x161   :  { %v2106_v10 = vpack.c.bf16 %v2026_v62, %v2025_v2  ;;  %v1737_v12 = vpop.permute.xlu1 %1736 }
 0x162   :  { %v2010_v13 = vmul.f32 %v1737_v12, %v1146_v5  ;;  %3078 = vmatmul.mubr.bf16.vlgmr.msra.gmra.mxu0 %v6517_v48  ;;  %v1732_v14 = vpop.permute.xlu0 %1731  ;;  %3013 = vmatmul.mubr.bf16.gmra.mxu1 %v6540_v35  ;;  %v1154_v5 = vld [vmem:[%s10607_s1 + $0x3b8] sm:$0xff] }
 0x163   :  { %v2009_v3 = vmul.f32 %v1732_v14, %v1145_v7  ;;  %6314 = vmatprep.subr.bf16.mxu1 %v2106_v10  ;;  %3085 = vmatprep.mubr.bf16.mxu0 %v6523_v61  ;;  %v1153_v61 = vld [vmem:[%s10607_s1 + $0x3b0] sm:$0xff] }
 0x164   :  { %3020 = vmatprep.mubr.bf16.mxu1 %v6544_v9 }
 0x165   :  { %v2098_v17 = vpack.c.bf16 %v2010_v13, %v2009_v3  ;;  %v1807_v11 = vpop.permute.xlu1 %1806  ;;  %v6543_v13 = vld [vmem:[%s10606_s3 + $0x130] ss:$36 sps:$4 sm:$0xff]   ;;  %v1138_v3 = vld [vmem:[%s10607_s1 + $0x338] sm:$0xff] }
 0x166   :  { %v2024_v19 = vmul.f32 %v1807_v11, %v1160_v15  ;;  %v1802_v1 = vpop.permute.xlu0 %1801  ;;  %v6547_v15 = vld [vmem:[%s10606_s3 + $0x17c] ss:$36 sps:$4 sm:$0xff]  }
 0x167   :  { %v2023_v22 = vmul.f32 %v1802_v1, %v1159_v8  ;;  %6315 = vmatpush3.bf16.msra.mxu1 %v2098_v17  ;;  %v1137_v8 = vld [vmem:[%s10607_s1 + $0x330] sm:$0xff] }
 0x169   :  { %v2105_v26 = vpack.c.bf16 %v2024_v19, %v2023_v22  ;;  %v1727_v24 = vpop.permute.xlu1 %1726  ;;  %v1151_v22 = vld [vmem:[%s10607_s1 + $0x3a0] sm:$0xff] }
 0x16a   :  { %v2008_v27 = vmul.f32 %v1727_v24, %v1144_v23  ;;  %3086 = vmatmul.mubr.bf16.gmra.mxu0 %v6525_v20  ;;  %v1722_v28 = vpop.permute.xlu0 %1721  ;;  %3021 = vmatmul.mubr.bf16.gmra.mxu1 %v6546_v16  ;;  %v1152_v16 = vld [vmem:[%s10607_s1 + $0x3a8] sm:$0xff] }
 0x16b   :  { %v2007_v30 = vmul.f32 %v1722_v28, %v1143_v18  ;;  %6316 = vmatprep.subr.bf16.mxu1 %v2105_v26  ;;  %3093 = vmatprep.mubr.bf16.mxu0 %v6529_v6  ;;  %v6549_v26 = vld [vmem:[%s10606_s3 + $0x178] ss:$36 sps:$4 sm:$0xff]   ;;  %v6553_v28 = vld [vmem:[%s10606_s3 + $0x1c4] ss:$36 sps:$4 sm:$0xff]  }
 0x16c   :  { %3028 = vmatprep.mubr.bf16.mxu1 %v6550_v25 }
 0x16d   :  { %v2097_v63 = vpack.c.bf16 %v2008_v27, %v2007_v30  ;;  %v1797_v34 = vpop.permute.xlu1 %1796  ;;  %v1136_v27 = vld [vmem:[%s10607_s1 + $0x328] sm:$0xff]  ;;  %v1135_v30 = vld [vmem:[%s10607_s1 + $0x320] sm:$0xff] }
 0x16e   :  { %v2022_v37 = vmul.f32 %v1797_v34, %v1158_v32  ;;  %v1792_v38 = vpop.permute.xlu0 %1791 }
 0x16f   :  { %v2021_v21 = vmul.f32 %v1792_v38, %v1157_v33  ;;  %6317 = vmatpush3.bf16.msra.mxu1 %v2097_v63  ;;  %v1150_v38 = vld [vmem:[%s10607_s1 + $0x398] sm:$0xff] }
 0x171   :  { %v2104_v46 = vpack.c.bf16 %v2022_v37, %v2021_v21  ;;  %v1717_v47 = vpop.permute.xlu1 %1716 }
 0x172   :  { %v2006_v45 = vmul.f32 %v1717_v47, %v1142_v41  ;;  %3094 = vmatmul.mubr.bf16.gmra.mxu0 %v6531_v39  ;;  %v1712_v36 = vpop.permute.xlu0 %1711  ;;  %3029 = vmatmul.mubr.bf16.gmra.mxu1 %v6552_v40  ;;  %v1149_v39 = vld [vmem:[%s10607_s1 + $0x390] sm:$0xff] }
 0x173   :  { %v2005_v49 = vmul.f32 %v1712_v36, %v1141_v44  ;;  %6318 = vmatprep.subr.bf16.mxu1 %v2104_v46  ;;  %3101 = vmatprep.mubr.bf16.mxu0 %v6535_v42  ;;  %v6555_v44 = vld [vmem:[%s10606_s3 + $0x1c0] ss:$36 sps:$4 sm:$0xff]   ;;  %v1134_v46 = vld [vmem:[%s10607_s1 + $0x318] sm:$0xff]  ;;  %v6559_v47 = vld [vmem:[%s10606_s3 + $0x20c] ss:$36 sps:$4 sm:$0xff]  }
 0x174   :  { %3036 = vmatprep.mubr.bf16.mxu1 %v6556_v29 }
 0x175   :  { %v2096_v52 = vpack.c.bf16 %v2006_v45, %v2005_v49  ;;  %v1787_v53 = vpop.permute.xlu1 %1786  ;;  %v1133_v45 = vld [vmem:[%s10607_s1 + $0x310] sm:$0xff] }
 0x176   :  { %v2020_v4 = vmul.f32 %v1787_v53, %v1156_v50  ;;  %v1782_v54 = vpop.permute.xlu0 %1781  ;;  %v1148_v53 = vld [vmem:[%s10607_s1 + $0x388] sm:$0xff] }
 0x177   :  { %v2019_v57 = vmul.f32 %v1782_v54, %v1155_v51  ;;  %6319 = vmatpush3.bf16.msra.mxu1 %v2096_v52 }
 0x179   :  { %v2103_v62 = vpack.c.bf16 %v2020_v4, %v2019_v57  ;;  %v1707_v31 = vpop.permute.xlu1 %1706  ;;  %v1147_v4 = vld [vmem:[%s10607_s1 + $0x380] sm:$0xff] }
 0x17a   :  { %v2004_v48 = vmul.f32 %v1707_v31, %v1140_v58  ;;  %3102 = vmatmul.mubr.bf16.gmra.mxu0 %v6537_v55  ;;  %v1702_v35 = vpop.permute.xlu0 %1701  ;;  %3037 = vmatmul.mubr.bf16.gmra.mxu1 %v6558_v56  ;;  %v6561_v58 = vld [vmem:[%s10606_s3 + $0x208] ss:$36 sps:$4 sm:$0xff]  }
 0x17b   :  { %v2003_v2 = vmul.f32 %v1702_v35, %v1139_v43  ;;  %6320 = vmatprep.subr.bf16.mxu1 %v2103_v62  ;;  %3109 = vmatprep.mubr.bf16.mxu0 %v6541_v59  ;;  %v1132_v43 = vld [vmem:[%s10607_s1 + $0x308] sm:$0xff]  ;;  %v1131_v62 = vld [vmem:[%s10607_s1 + $0x300] sm:$0xff] }
 0x17c   :  { %3206 = vmatprep.mubr.bf16.mxu1 %v6566_v60  ;;  %v6562_v60 = vld [vmem:[%s10606_s3 + $0x254] ss:$36 sps:$4 sm:$0xff]  }
 0x17d   :  { %v2095_v7 = vpack.c.bf16 %v2004_v48, %v2003_v2  ;;  %v1777_v9 = vpop.permute.xlu1 %1776 }
 0x17e   :  { %v2018_v10 = vmul.f32 %v1777_v9, %v1154_v5  ;;  %v1772_v12 = vpop.permute.xlu0 %1771 }
 0x17f   :  { %v2017_v14 = vmul.f32 %v1772_v12, %v1153_v61  ;;  %6321 = vmatpush3.bf16.msra.mxu1 %v2095_v7  ;;  %v1178_v61 = vld [vmem:[%s10607_s1 + $0x478] sm:$0xff]  ;;  %v1177_v7 = vld [vmem:[%s10607_s1 + $0x470] sm:$0xff] }
 0x181   :  { %v2102_v17 = vpack.c.bf16 %v2018_v10, %v2017_v14  ;;  %v1697_v11 = vpop.permute.xlu1 %1696  ;;  %v6564_v14 = vld [vmem:[%s10606_s3 + $0x18] ss:$36 sps:$4 sm:$0xff]  }
 0x182   :  { %v2002_v19 = vmul.f32 %v1697_v11, %v1138_v3  ;;  %3110 = vmatmul.mubr.bf16.gmra.mxu0 %v6543_v13  ;;  %v1692_v1 = vpop.permute.xlu0 %1691  ;;  %v6567_v3 = vld [vmem:[%s10606_s3 + $0x250] ss:$36 sps:$4 sm:$0xff]   ;;  %v1175_v11 = vld [vmem:[%s10607_s1 + $0x460] sm:$0xff] }
 0x183   :  { %v2001_v20 = vmul.f32 %v1692_v1, %v1137_v8  ;;  %6322 = vmatprep.subr.bf16.mxu1 %v2102_v17  ;;  %3117 = vmatprep.mubr.bf16.mxu0 %v6547_v15  ;;  %v1176_v8 = vld [vmem:[%s10607_s1 + $0x468] sm:$0xff]  ;;  %v6568_v17 = vld [vmem:[%s10606_s3 + $0x29c] ss:$36 sps:$4 sm:$0xff]  }
 0x185   :  { %v2094_v23 = vpack.c.bf16 %v2002_v19, %v2001_v20  ;;  %v1767_v6 = vpop.permute.xlu1 %1766  ;;  %v6570_v19 = vld [vmem:[%s10606_s3 + $0x64] ss:$36 sps:$4 sm:$0xff]  }
 0x186   :  { %v2016_v18 = vmul.f32 %v1767_v6, %v1152_v16  ;;  %v1762_v25 = vpop.permute.xlu0 %1761  ;;  %v1174_v6 = vld [vmem:[%s10607_s1 + $0x458] sm:$0xff] }
 0x187   :  { %v2015_v24 = vmul.f32 %v1762_v25, %v1151_v22  ;;  %6323 = vmatpush3.bf16.msra.mxu1 %v2094_v23 }
 0x189   :  { %v2101_v32 = vpack.c.bf16 %v2016_v18, %v2015_v24  ;;  %v1687_v33 = vpop.permute.xlu1 %1686  ;;  %v1173_v18 = vld [vmem:[%s10607_s1 + $0x450] sm:$0xff] }
 0x18a   :  { %v2000_v63 = vmul.f32 %v1687_v33, %v1136_v27  ;;  %3118 = vmatmul.mubr.bf16.gmra.mxu0 %v6549_v26  ;;  %v1682_v34 = vpop.permute.xlu0 %1681 }
 0x18b   :  { %v1999_v37 = vmul.f32 %v1682_v34, %v1135_v30  ;;  %6324 = vmatprep.subr.bf16.mxu1 %v2101_v32  ;;  %3125 = vmatprep.mubr.bf16.mxu0 %v6553_v28  ;;  %v6572_v30 = vld [vmem:[%s10606_s3 + $0x298] ss:$36 sps:$4 sm:$0xff]   ;;  %v6573_v32 = vld [vmem:[%s10606_s3 + $0x60] ss:$36 sps:$4 sm:$0xff]   ;;  %v1172_v34 = vld [vmem:[%s10607_s1 + $0x448] sm:$0xff] }
 0x18d   :  { %v2093_v40 = vpack.c.bf16 %v2000_v63, %v1999_v37  ;;  %v1757_v21 = vpop.permute.xlu1 %1756  ;;  %v6574_v37 = vld [vmem:[%s10606_s3 + $0x2e4] ss:$36 sps:$4 sm:$0xff]  }
 0x18e   :  { %v2014_v41 = vmul.f32 %v1757_v21, %v1150_v38  ;;  %v1752_v42 = vpop.permute.xlu0 %1751 }
 0x18f   :  { %v2013_v29 = vmul.f32 %v1752_v42, %v1149_v39  ;;  %6325 = vmatpush3.bf16.msra.mxu1 %v2093_v40  ;;  %v1171_v39 = vld [vmem:[%s10607_s1 + $0x440] sm:$0xff]  ;;  %v6576_v40 = vld [vmem:[%s10606_s3 + $0xac] ss:$36 sps:$4 sm:$0xff]  }
 0x191   :  { %v2100_v36 = vpack.c.bf16 %v2014_v41, %v2013_v29  ;;  %v1677_v49 = vpop.permute.xlu1 %1676 }
 0x192   :  { %v1998_v50 = vmul.f32 %v1677_v49, %v1134_v46  ;;  %3126 = vmatmul.mubr.bf16.gmra.mxu0 %v6555_v44  ;;  %v1672_v51 = vpop.permute.xlu0 %1671  ;;  %v1169_v49 = vld [vmem:[%s10607_s1 + $0x430] sm:$0xff] }
 0x193   :  { %v1997_v52 = vmul.f32 %v1672_v51, %v1133_v45  ;;  %6326 = vmatprep.subr.bf16.mxu1 %v2100_v36  ;;  %3133 = vmatprep.mubr.bf16.mxu0 %v6559_v47  ;;  %v1170_v45 = vld [vmem:[%s10607_s1 + $0x438] sm:$0xff] }
 0x195   :  { %v2092_v54 = vpack.c.bf16 %v1998_v50, %v1997_v52  ;;  %v1747_v55 = vpop.permute.xlu1 %1746 }
 0x196   :  { %v2012_v56 = vmul.f32 %v1747_v55, %v1148_v53  ;;  %v1742_v57 = vpop.permute.xlu0 %1741  ;;  %v6579_v55 = vld [vmem:[%s10606_s3 + $0xa8] ss:$36 sps:$4 sm:$0xff]  }
 0x197   :  { %v2011_v59 = vmul.f32 %v1742_v57, %v1147_v4  ;;  %6327 = vmatpush3.bf16.msra.mxu1 %v2092_v54  ;;  %v6578_v54 = vld [vmem:[%s10606_s3 + $0x2e0] ss:$36 sps:$4 sm:$0xff]  }
 0x199   :  { %v2099_v31 = vpack.c.bf16 %v2012_v56, %v2011_v59  ;;  %v1667_v48 = vpop.permute.xlu1 %1666  ;;  %v6580_v59 = vld [vmem:[%s10606_s3 + $0x32c] ss:$36 sps:$4 sm:$0xff]  }
 0x19a   :  { %v1996_v35 = vmul.f32 %v1667_v48, %v1132_v43  ;;  %3134 = vmatmul.mubr.bf16.gmra.mxu0 %v6561_v58  ;;  %v1662_v2 = vpop.permute.xlu0 %1661  ;;  %v1168_v58 = vld [vmem:[%s10607_s1 + $0x428] sm:$0xff] }
 0x19b   :  { %v1995_v5 = vmul.f32 %v1662_v2, %v1131_v62  ;;  %6328 = vmatprep.subr.bf16.mxu1 %v2099_v31  ;;  %3141 = vmatprep.mubr.bf16.mxu0 %v6562_v60  ;;  %v1167_v60 = vld [vmem:[%s10607_s1 + $0x420] sm:$0xff]  ;;  %v6582_v62 = vld [vmem:[%s10606_s3 + $0xf4] ss:$36 sps:$4 sm:$0xff]  }
 0x19d   :  { %v2091_v9 = vpack.c.bf16 %v1996_v35, %v1995_v5  ;;  %v1897_v10 = vpop.permute.xlu1 %1896 }
 0x19e   :  { %v2042_v12 = vmul.f32 %v1897_v10, %v1178_v61  ;;  %v1892_v13 = vpop.permute.xlu0 %1891 }
 0x19f   :  { %v2041_v15 = vmul.f32 %v1892_v13, %v1177_v7  ;;  %6329 = vmatpush3.bf16.msra.mxu1 %v2091_v9  ;;  %v1166_v9 = vld [vmem:[%s10607_s1 + $0x418] sm:$0xff] }
 0x1a1   :  { %v2114_v1 = vpack.c.bf16 %v2042_v12, %v2041_v15  ;;  %v1887_v20 = vpop.permute.xlu1 %1886  ;;  %v1165_v12 = vld [vmem:[%s10607_s1 + $0x410] sm:$0xff] }
 0x1a2   :  { %v2040_v16 = vmul.f32 %v1887_v20, %v1176_v8  ;;  %3142 = vmatmul.mubr.bf16.gmra.mxu0 %v6567_v3  ;;  %3207 = vmatmul.mubr.bf16.vlgmr.msra.gmra.mxu1 %v6564_v14  ;;  %v1882_v22 = vpop.permute.xlu0 %1881  ;;  %v1164_v20 = vld [vmem:[%s10607_s1 + $0x408] sm:$0xff] }
 0x1a3   :  { %v2039_v23 = vmul.f32 %v1882_v22, %v1175_v11  ;;  %6422 = vmatprep.subr.bf16.mxu0 %v2114_v1  ;;  %3149 = vmatprep.mubr.bf16.mxu0 %v6568_v17  ;;  %v6584_v17 = vld [vmem:[%s10606_s3 + $0x328] ss:$36 sps:$4 sm:$0xff]   ;;  %v6585_v11 = vld [vmem:[%s10606_s3 + $0xf0] ss:$36 sps:$4 sm:$0xff]  }
 0x1a4   :  { %6423 = vmatpush3.bf16.msra.mxu0 %v2114_v1  ;;  %3214 = vmatprep.mubr.bf16.mxu1 %v6570_v19  ;;  %v6066_v25 = vpop.f32.mrf.mxu0 }
 0x1a5   :  { %v2113_v26 = vpack.c.bf16 %v2040_v16, %v2039_v23  ;;  %v1877_v24 = vpop.permute.xlu1 %1876  ;;  %v6586_v16 = vld [vmem:[%s10606_s3 + $0x13c] ss:$36 sps:$4 sm:$0xff]  }
 0x1a6   :  { %v2038_v27 = vmul.f32 %v1877_v24, %v1174_v6  ;;  %v1872_v28 = vpop.permute.xlu0 %1871  ;;  %v6067_v33 = vpop.f32.mrf.mxu0  ;;  %v1163_v23 = vld [vmem:[%s10607_s1 + $0x400] sm:$0xff] }
 0x1a7   :  { %v2037_v63 = vmul.f32 %v1872_v28, %v1173_v18  ;;  %6424 = vmatprep.subr.bf16.mxu0 %v2113_v26  ;;  %v8606_v38 = vadd.f32 %v6067_v33, %v6066_v25  ;;  %v6589_v6 = vld [vmem:[%s10606_s3 + $0x20] ss:$36 sps:$4 sm:$0xff]  }
 0x1a8   :  { %6425 = vmatpush3.bf16.msra.mxu0 %v2113_v26  ;;  %v6069_v21 = vpop.f32.mrf.mxu0 }
 0x1a9   :  { %v2112_v41 = vpack.c.bf16 %v2038_v27, %v2037_v63  ;;  %v1867_v42 = vpop.permute.xlu1 %1866  ;;  %v6588_v63 = vld [vmem:[%s10606_s3 + $0x138] ss:$36 sps:$4 sm:$0xff]  }
 0x1aa   :  { %v2036_v44 = vmul.f32 %v1867_v42, %v1172_v34  ;;  %3150 = vmatmul.mubr.bf16.gmra.mxu0 %v6572_v30  ;;  %3215 = vmatmul.mubr.bf16.gmra.mxu1 %v6573_v32  ;;  %v1862_v29 = vpop.permute.xlu0 %1861  ;;  %v6070_v46 = vpop.f32.mrf.mxu0 }
 0x1ab   :  { %v2035_v47 = vmul.f32 %v1862_v29, %v1171_v39  ;;  %6426 = vmatprep.subr.bf16.mxu0 %v2112_v41  ;;  %3157 = vmatprep.mubr.bf16.mxu0 %v6574_v37  ;;  %v8617_v36 = vadd.f32 %v6070_v46, %v6069_v21  ;;  %v6590_v37 = vld [vmem:[%s10606_s3 + $0x68] ss:$36 sps:$4 sm:$0xff]   ;;  %v6594_v21 = vld [vmem:[%s10606_s3 + $0xb0] ss:$36 sps:$4 sm:$0xff]   ;;  %v6593_v29 = vld [vmem:[%s10606_s3 + $0x180] ss:$36 sps:$4 sm:$0xff]  }
 0x1ac   :  { %6427 = vmatpush3.bf16.msra.mxu0 %v2112_v41  ;;  %3222 = vmatprep.mubr.bf16.mxu1 %v6576_v40  ;;  %v6072_v50 = vpop.f32.mrf.mxu0  ;;  %v6591_v39 = vld [vmem:[%s10606_s3 + $0x184] ss:$36 sps:$4 sm:$0xff]  }
 0x1ad   :  { %v2111_v51 = vpack.c.bf16 %v2036_v44, %v2035_v47  ;;  %v1857_v52 = vpop.permute.xlu1 %1856  ;;  %v6595_v47 = vld [vmem:[%s10606_s3 + $0xf8] ss:$36 sps:$4 sm:$0xff]  }
 0x1ae   :  { %v2034_v53 = vmul.f32 %v1857_v52, %v1170_v45  ;;  %v1852_v4 = vpop.permute.xlu0 %1851  ;;  %v6073_v56 = vpop.f32.mrf.mxu0  ;;  %v6596_v45 = vld [vmem:[%s10606_s3 + $0x1cc] ss:$36 sps:$4 sm:$0xff]  }
 0x1af   :  { %v2033_v57 = vmul.f32 %v1852_v4, %v1169_v49  ;;  %6428 = vmatprep.subr.bf16.mxu0 %v2111_v51  ;;  %v8634_v43 = vadd.f32 %v6073_v56, %v6072_v50  ;;  %v6599_v50 = vld [vmem:[%s10606_s3 + $0x140] ss:$36 sps:$4 sm:$0xff]   ;;  %v6598_v4 = vld [vmem:[%s10606_s3 + $0x1c8] ss:$36 sps:$4 sm:$0xff]   ;;  %v6601_v56 = vld [vmem:[%s10606_s3 + $0x214] ss:$36 sps:$4 sm:$0xff]  }
 0x1b0   :  { %6429 = vmatpush3.bf16.msra.mxu0 %v2111_v51  ;;  %v6075_v31 = vpop.f32.mrf.mxu0 }
 0x1b1   :  { %v2110_v48 = vpack.c.bf16 %v2034_v53, %v2033_v57  ;;  %v1847_v35 = vpop.permute.xlu1 %1846 }
 0x1b2   :  { %v2032_v2 = vmul.f32 %v1847_v35, %v1168_v58  ;;  %3158 = vmatmul.mubr.bf16.gmra.mxu0 %v6578_v54  ;;  %3223 = vmatmul.mubr.bf16.gmra.mxu1 %v6579_v55  ;;  %v1842_v5 = vpop.permute.xlu0 %1841  ;;  %v6076_v61 = vpop.f32.mrf.mxu0  ;;  %v6600_v55 = vld [vmem:[%s10606_s3 + $0x188] ss:$36 sps:$4 sm:$0xff]   ;;  %v6604_v58 = vld [vmem:[%s10606_s3 + $0x1d0] ss:$36 sps:$4 sm:$0xff]   ;;  %v6605_v35 = vld [vmem:[%s10606_s3 + $0x218] ss:$36 sps:$4 sm:$0xff]  }
 0x1b3   :  { %v2031_v7 = vmul.f32 %v1842_v5, %v1167_v60  ;;  %6430 = vmatprep.subr.bf16.mxu0 %v2110_v48  ;;  %3165 = vmatprep.mubr.bf16.mxu0 %v6580_v59  ;;  %v8645_v10 = vadd.f32 %v6076_v61, %v6075_v31  ;;  %v6603_v31 = vld [vmem:[%s10606_s3 + $0x210] ss:$36 sps:$4 sm:$0xff]   ;;  %v6609_v61 = vld [vmem:[%s10606_s3 + $0x260] ss:$36 sps:$4 sm:$0xff]  }
 0x1b4   :  { %6431 = vmatpush3.bf16.msra.mxu0 %v2110_v48  ;;  %3230 = vmatprep.mubr.bf16.mxu1 %v6582_v62  ;;  %v6078_v13 = vpop.f32.mrf.mxu0 }
 0x1b5   :  { %v2109_v14 = vpack.c.bf16 %v2032_v2, %v2031_v7  ;;  %v1837_v3 = vpop.permute.xlu1 %1836  ;;  %v6606_v2 = vld [vmem:[%s10606_s3 + $0x25c] ss:$36 sps:$4 sm:$0xff]  }
 0x1b6   :  { %v2030_v15 = vmul.f32 %v1837_v3, %v1166_v9  ;;  %v1832_v8 = vpop.permute.xlu0 %1831  ;;  %v6079_v19 = vpop.f32.mrf.mxu0  ;;  %v6610_v3 = vld [vmem:[%s10606_s3 + $0x2a8] ss:$36 sps:$4 sm:$0xff]  }
 0x1b7   :  { %v2029_v1 = vmul.f32 %v1832_v8, %v1165_v12  ;;  %6432 = vmatprep.subr.bf16.mxu0 %v2109_v14  ;;  %v8662_v22 = vadd.f32 %v6079_v19, %v6078_v13  ;;  %v6608_v13 = vld [vmem:[%s10606_s3 + $0x258] ss:$36 sps:$4 sm:$0xff]  }
 0x1b8   :  { %6433 = vmatpush3.bf16.msra.mxu0 %v2109_v14  ;;  %v8670_v18 = vpop.f32.mrf.mxu0 }
 0x1b9   :  { %v2108_v25 = vpack.c.bf16 %v2030_v15, %v2029_v1  ;;  %v1827_v26 = vpop.permute.xlu1 %1826  ;;  %v6611_v15 = vld [vmem:[%s10606_s3 + $0x2a4] ss:$36 sps:$4 sm:$0xff]  }
 0x1ba   :  { %v2028_v24 = vmul.f32 %v1827_v26, %v1164_v20  ;;  %3166 = vmatmul.mubr.bf16.gmra.mxu0 %v6584_v17  ;;  %3231 = vmatmul.mubr.bf16.gmra.mxu1 %v6585_v11  ;;  %v1822_v27 = vpop.permute.xlu0 %1821  ;;  %v8672_v28 = vpop.f32.mrf.mxu0  ;;  %v6617_v17 = vld [vmem:[%s10606_s3 + $0x2f0] ss:$36 sps:$4 sm:$0xff]  }
 0x1bb   :  { %v2027_v30 = vmul.f32 %v1822_v27, %v1163_v23  ;;  %6434 = vmatprep.subr.bf16.mxu0 %v2108_v25  ;;  %3238 = vmatprep.mubr.bf16.mxu1 %v6586_v16  ;;  %v6618_v27 = vld [vmem:[%s10606_s3 + $0x338] ss:$36 sps:$4 sm:$0xff]  }
 0x1bc   :  { %6435 = vmatpush3.bf16.msra.mxu0 %v2108_v25  ;;  %6438 = vmatprep.mubr.bf16.mxu0 %v6589_v6  ;;  %v6084_v32 = vpop.f32.mrf.mxu0  ;;  %v6613_v6 = vld [vmem:[%s10606_s3 + $0x2a0] ss:$36 sps:$4 sm:$0xff]  }
 0x1bd   :  { %v2107_v33 = vpack.c.bf16 %v2028_v24, %v2027_v30  ;;  %v6614_v24 = vld [vmem:[%s10606_s3 + $0x2ec] ss:$36 sps:$4 sm:$0xff]  }
 0x1be   :  { %v6085_v34 = vpop.f32.mrf.mxu0 }
 0x1bf   :  { %6436 = vmatprep.subr.bf16.mxu0 %v2107_v33  ;;  %v8683_v40 = vadd.f32 %v6085_v34, %v6084_v32 }
 0x1c0   :  { %6437 = vmatpush3.bf16.msra.mxu0 %v2107_v33  ;;  %v8688_v41 = vpop.f32.mrf.mxu0 }
 0x1c2   :  { %3239 = vmatmul.mubr.bf16.gmra.mxu1 %v6588_v63  ;;  %v8690_v42 = vpop.f32.mrf.mxu0 }
 0x1c3   :  { %6439 = vmatmul.mubr.bf16.vlgmr.msra.gmra.mxu0 %v6590_v37  ;;  %3246 = vmatprep.mubr.bf16.mxu1 %v6591_v39 }
 0x1c4   :  { %6442 = vmatprep.mubr.bf16.mxu0 %v6594_v21  ;;  %v6090_v44 = vpop.f32.mrf.mxu0 }
 0x1c6   :  { %v6091_v46 = vpop.f32.mrf.mxu0 }
 0x1c7   :  { %v8701_v49 = vadd.f32 %v6091_v46, %v6090_v44 }
 0x1c8   :  { %v8706_v51 = vpop.f32.mrf.mxu0 }
 0x1ca   :  { %3247 = vmatmul.mubr.bf16.gmra.mxu1 %v6593_v29  ;;  %v8708_v52 = vpop.f32.mrf.mxu0 }
 0x1cb   :  { %6443 = vmatmul.mubr.bf16.gmra.mxu0 %v6595_v47  ;;  %3254 = vmatprep.mubr.bf16.mxu1 %v6596_v45 }
 0x1cc   :  { %6446 = vmatprep.mubr.bf16.mxu0 %v6599_v50  ;;  %v6096_v53 = vpop.f32.mrf.mxu0  ;;  %v6619_v50 = vld [vmem:[%s10606_s3 + $0x334] ss:$36 sps:$4 sm:$0xff]  }
 0x1ce   :  { %v6097_v54 = vpop.f32.mrf.mxu0 }
 0x1cf   :  { %v8719_v57 = vadd.f32 %v6097_v54, %v6096_v53 }
 0x1d0   :  { %v8724_v59 = vpop.f32.mrf.mxu0 }
 0x1d2   :  { %3255 = vmatmul.mubr.bf16.gmra.mxu1 %v6598_v4  ;;  %v8726_v60 = vpop.f32.mrf.mxu0 }
 0x1d3   :  { %6447 = vmatmul.mubr.bf16.gmra.mxu0 %v6600_v55  ;;  %3262 = vmatprep.mubr.bf16.mxu1 %v6601_v56 }
 0x1d4   :  { %6450 = vmatprep.mubr.bf16.mxu0 %v6604_v58  ;;  %v6102_v62 = vpop.f32.mrf.mxu0 }
 0x1d6   :  { %v6103_v48 = vpop.f32.mrf.mxu0 }
 0x1d7   :  { %v8737_v5 = vadd.f32 %v6103_v48, %v6102_v62 }
 0x1d8   :  { %v8742_v7 = vpop.f32.mrf.mxu0 }
 0x1da   :  { %3263 = vmatmul.mubr.bf16.gmra.mxu1 %v6603_v31  ;;  %v8744_v9 = vpop.f32.mrf.mxu0 }
 0x1db   :  { %6451 = vmatmul.mubr.bf16.gmra.mxu0 %v6605_v35  ;;  %3270 = vmatprep.mubr.bf16.mxu1 %v6606_v2 }
 0x1dc   :  { %6454 = vmatprep.mubr.bf16.mxu0 %v6609_v61  ;;  %v6108_v12 = vpop.f32.mrf.mxu0 }
 0x1de   :  { %v6109_v14 = vpop.f32.mrf.mxu0 }
 0x1df   :  { %v8755_v8 = vadd.f32 %v6109_v14, %v6108_v12 }
 0x1e0   :  { %v8760_v11 = vpop.f32.mrf.mxu0 }
 0x1e2   :  { %3271 = vmatmul.mubr.bf16.gmra.mxu1 %v6608_v13  ;;  %v6154_v19 = vpop.f32.mrf.mxu1  ;;  %v8762_v1 = vpop.f32.mrf.mxu0 }
 0x1e3   :  { %6455 = vmatmul.mubr.bf16.gmra.mxu0 %v6610_v3  ;;  %3278 = vmatprep.mubr.bf16.mxu1 %v6611_v15 }
 0x1e4   :  { %6458 = vmatprep.mubr.bf16.mxu0 %v6617_v17  ;;  %v6155_v20 = vpop.f32.mrf.mxu1  ;;  %v6114_v16 = vpop.f32.mrf.mxu0 }
 0x1e5   :  { %v6156_v23 = vadd.f32 %v6155_v20, %v6154_v19 }
 0x1e6   :  { %v6157_v25 = vpop.f32.mrf.mxu1  ;;  %v6115_v26 = vpop.f32.mrf.mxu0 }
 0x1e7   :  { %v8774_v30 = vadd.f32 %v6156_v23, %v8606_v38  ;;  %v8776_v32 = vadd.f32 %v6115_v26, %v6114_v16  ;;  %v6616_v38 = vld [vmem:[%s10606_s3 + $0x2e8] ss:$36 sps:$4 sm:$0xff]  }
 0x1e8   :  { %v6158_v33 = vpop.f32.mrf.mxu1  ;;  %v8778_v63 = vpop.f32.mrf.mxu0 }
 0x1e9   :  { %v6159_v34 = vadd.f32 %v6158_v33, %v6157_v25 }
 0x1ea   :  { %3279 = vmatmul.mubr.bf16.gmra.mxu1 %v6613_v6  ;;  %v6160_v37 = vpop.f32.mrf.mxu1  ;;  %v8780_v39 = vpop.f32.mrf.mxu0 }
 0x1eb   :  { %3286 = vmatprep.mubr.bf16.mxu1 %v6614_v24  ;;  %6459 = vmatmul.mubr.bf16.gmra.mxu0 %v6618_v27  ;;  %v8783_v21 = vadd.f32 %v6159_v34, %v8617_v36 }
 0x1ec   :  { %v6161_v44 = vpop.f32.mrf.mxu1  ;;  %v6120_v29 = vpop.f32.mrf.mxu0 }
 0x1ed   :  { %v6162_v46 = vadd.f32 %v6161_v44, %v6160_v37 }
 0x1ee   :  { %v6163_v47 = vpop.f32.mrf.mxu1  ;;  %v6121_v45 = vpop.f32.mrf.mxu0 }
 0x1ef   :  { %v8792_v53 = vadd.f32 %v6162_v46, %v8634_v43  ;;  %v8794_v4 = vadd.f32 %v6121_v45, %v6120_v29  ;;  %v6621_v43 = vld [vmem:[%s10606_s3 + $0x330] ss:$36 sps:$4 sm:$0xff]  }
 0x1f0   :  { %v6164_v36 = vpop.f32.mrf.mxu1  ;;  %v8796_v54 = vpop.f32.mrf.mxu0 }
 0x1f1   :  { %v6165_v55 = vadd.f32 %v6164_v36, %v6163_v47  ;;  %v6095_v36 = vadd.f32 %v8708_v52, %v8706_v51 }
 0x1f2   :  { %3287 = vmatmul.mubr.bf16.gmra.mxu1 %v6616_v38  ;;  %v6166_v56 = vpop.f32.mrf.mxu1  ;;  %v8798_v58 = vpop.f32.mrf.mxu0 }
 0x1f3   :  { %3294 = vmatprep.mubr.bf16.mxu1 %v6619_v50  ;;  %v8801_v62 = vadd.f32 %v6165_v55, %v8645_v10  ;;  %v6083_v10 = vadd.f32 %v8672_v28, %v8670_v18  ;;  %v6089_v28 = vadd.f32 %v8690_v42, %v8688_v41 }
 0x1f4   :  { %v6167_v31 = vpop.f32.mrf.mxu1  ;;  %v6126_v48 = vpop.f32.mrf.mxu0 }
 0x1f5   :  { %v6168_v35 = vadd.f32 %v6167_v31, %v6166_v56 }
 0x1f6   :  { %v6169_v2 = vpop.f32.mrf.mxu1  ;;  %v6127_v61 = vpop.f32.mrf.mxu0 }
 0x1f7   :  { %v8807_v12 = vadd.f32 %v6168_v35, %v8662_v22  ;;  %v8809_v13 = vadd.f32 %v6127_v61, %v6126_v48 }
 0x1f8   :  { %v6170_v14 = vpop.f32.mrf.mxu1  ;;  %v6129_v3 = vpop.f32.mrf.mxu0 }
 0x1f9   :  { %v6171_v15 = vadd.f32 %v6170_v14, %v6169_v2  ;;  %v6101_v2 = vadd.f32 %v8726_v60, %v8724_v59 }
 0x1fa   :  { %3295 = vmatmul.mubr.bf16.gmra.mxu1 %v6621_v43  ;;  %v6172_v17 = vpop.f32.mrf.mxu1  ;;  %v6130_v19 = vpop.f32.mrf.mxu0 }
 0x1fb   :  { %v8813_v20 = vadd.f32 %v6171_v15, %v6083_v10  ;;  %v8815_v16 = vadd.f32 %v6130_v19, %v6129_v3 }
 0x1fc   :  { %v6173_v23 = vpop.f32.mrf.mxu1  ;;  %v6132_v6 = vpop.f32.mrf.mxu0 }
 0x1fd   :  { %v6174_v25 = vadd.f32 %v6173_v23, %v6172_v17  ;;  %v6107_v17 = vadd.f32 %v8744_v9, %v8742_v7 }
 0x1fe   :  { %v6175_v22 = vpop.f32.mrf.mxu1  ;;  %v6133_v26 = vpop.f32.mrf.mxu0 }
 0x1ff   :  { %v8818_v24 = vadd.f32 %v6174_v25, %v8683_v40  ;;  %v8820_v27 = vadd.f32 %v6133_v26, %v6132_v6  ;;  %v6113_v26 = vadd.f32 %v8762_v1, %v8760_v11  ;;  %v6119_v11 = vadd.f32 %v8780_v39, %v8778_v63 }
 0x200   :  { %v6176_v33 = vpop.f32.mrf.mxu1  ;;  %v6135_v18 = vpop.f32.mrf.mxu0 }
 0x201   :  { %v6177_v34 = vadd.f32 %v6176_v33, %v6175_v22 }
 0x202   :  { %v6178_v37 = vpop.f32.mrf.mxu1  ;;  %v6136_v44 = vpop.f32.mrf.mxu0 }
 0x203   :  { %v8824_v29 = vadd.f32 %v6177_v34, %v6089_v28  ;;  %v8826_v46 = vadd.f32 %v6136_v44, %v6135_v18 }
 0x204   :  { %v6179_v38 = vpop.f32.mrf.mxu1 }
 0x205   :  { %v6180_v47 = vadd.f32 %v6179_v38, %v6178_v37 }
 0x206   :  { %v6181_v45 = vpop.f32.mrf.mxu1 }
 0x207   :  { %v8829_v40 = vadd.f32 %v6180_v47, %v8701_v49 }
 0x208   :  { %v6182_v50 = vpop.f32.mrf.mxu1 }
 0x209   :  { %v6183_v55 = vadd.f32 %v6182_v50, %v6181_v45 }
 0x20a   :  { %v6184_v56 = vpop.f32.mrf.mxu1 }
 0x20b   :  { %v8833_v41 = vadd.f32 %v6183_v55, %v6095_v36 }
 0x20c   :  { %v6185_v42 = vpop.f32.mrf.mxu1 }
 0x20d   :  { %v6186_v31 = vadd.f32 %v6185_v42, %v6184_v56 }
 0x20e   :  { %v6187_v48 = vpop.f32.mrf.mxu1 }
 0x20f   :  { %v8836_v35 = vadd.f32 %v6186_v31, %v8719_v57 }
 0x210   :  { %v6188_v43 = vpop.f32.mrf.mxu1 }
 0x211   :  { %v6189_v49 = vadd.f32 %v6188_v43, %v6187_v48 }
 0x212   :  { %v6190_v61 = vpop.f32.mrf.mxu1 }
 0x213   :  { %v8840_v14 = vadd.f32 %v6189_v49, %v6101_v2 }
 0x214   :  { %v6191_v3 = vpop.f32.mrf.mxu1 }
 0x215   :  { %v6192_v51 = vadd.f32 %v6191_v3, %v6190_v61 }
 0x216   :  { %v6193_v52 = vpop.f32.mrf.mxu1 }
 0x217   :  { %v8843_v10 = vadd.f32 %v6192_v51, %v8737_v5 }
 0x218   :  { %v6194_v15 = vpop.f32.mrf.mxu1 }
 0x219   :  { %v6195_v57 = vadd.f32 %v6194_v15, %v6193_v52 }
 0x21a   :  { %v6196_v19 = vpop.f32.mrf.mxu1 }
 0x21b   :  { %v8847_v23 = vadd.f32 %v6195_v57, %v6107_v17 }
 0x21c   :  { %v6197_v6 = vpop.f32.mrf.mxu1 }
 0x21d   :  { %v6198_v59 = vadd.f32 %v6197_v6, %v6196_v19 }
 0x21e   :  { %v6199_v60 = vpop.f32.mrf.mxu1 }
 0x21f   :  { %v8850_v25 = vadd.f32 %v6198_v59, %v8755_v8 }
 0x220   :  { %v6200_v22 = vpop.f32.mrf.mxu1 }
 0x221   :  { %v6201_v5 = vadd.f32 %v6200_v22, %v6199_v60 }
 0x222   :  { %v6242_v33 = vpop.f32.mrf.mxu0  ;;  %v6202_v18 = vpop.f32.mrf.mxu1 }
 0x223   :  { %v8854_v28 = vadd.f32 %v6201_v5, %v6113_v26 }
 0x224   :  { %v6243_v7 = vpop.f32.mrf.mxu0  ;;  %v6203_v9 = vpop.f32.mrf.mxu1 }
 0x225   :  { %v6244_v34 = vadd.f32 %v6243_v7, %v6242_v33  ;;  %v6204_v37 = vadd.f32 %v6203_v9, %v6202_v18 }
 0x226   :  { %v6245_v44 = vpop.f32.mrf.mxu0  ;;  %v6205_v38 = vpop.f32.mrf.mxu1 }
 0x227   :  { %v8857_v47 = vadd.f32 %v6244_v34, %v8774_v30  ;;  %v8860_v8 = vadd.f32 %v6204_v37, %v8776_v32 }
 0x228   :  { %v6246_v45 = vpop.f32.mrf.mxu0  ;;  %v6206_v50 = vpop.f32.mrf.mxu1 }
 0x229   :  { %v6247_v1 = vadd.f32 %v6246_v45, %v6245_v44  ;;  %v6207_v36 = vadd.f32 %v6206_v50, %v6205_v38 }
 0x22a   :  { %v6248_v55 = vpop.f32.mrf.mxu0  ;;  %v6208_v56 = vpop.f32.mrf.mxu1 }
 0x22b   :  { %v8865_v42 = vadd.f32 %v6247_v1, %v8783_v21  ;;  %v8867_v31 = vadd.f32 %v6207_v36, %v6119_v11  ;;  %v6125_v21 = vadd.f32 %v8798_v58, %v8796_v54 }
 0x22c   :  { %v6249_v48 = vpop.f32.mrf.mxu0  ;;  %v6209_v30 = vpop.f32.mrf.mxu1 }
 0x22d   :  { %v6250_v43 = vadd.f32 %v6249_v48, %v6248_v55  ;;  %v6210_v2 = vadd.f32 %v6209_v30, %v6208_v56 }
 0x22e   :  { %v6251_v32 = vpop.f32.mrf.mxu0  ;;  %v6211_v49 = vpop.f32.mrf.mxu1 }
 0x22f   :  { %v8870_v61 = vadd.f32 %v6250_v43, %v8792_v53  ;;  %v8873_v63 = vadd.f32 %v6210_v2, %v8794_v4 }
 0x230   :  { %v6252_v39 = vpop.f32.mrf.mxu0  ;;  %v6212_v3 = vpop.f32.mrf.mxu1 }
 0x231   :  { %v6253_v51 = vadd.f32 %v6252_v39, %v6251_v32  ;;  %v6213_v52 = vadd.f32 %v6212_v3, %v6211_v49 }
 0x232   :  { %v6254_v15 = vpop.f32.mrf.mxu0  ;;  %v6214_v17 = vpop.f32.mrf.mxu1 }
 0x233   :  { %v8878_v57 = vadd.f32 %v6253_v51, %v8801_v62  ;;  %v8880_v19 = vadd.f32 %v6213_v52, %v6125_v21 }
 0x234   :  { %v6255_v6 = vpop.f32.mrf.mxu0  ;;  %v6215_v53 = vpop.f32.mrf.mxu1 }
 0x235   :  { %v6256_v59 = vadd.f32 %v6255_v6, %v6254_v15  ;;  %v6216_v60 = vadd.f32 %v6215_v53, %v6214_v17 }
 0x236   :  { %v6257_v4 = vpop.f32.mrf.mxu0  ;;  %v6217_v22 = vpop.f32.mrf.mxu1 }
 0x237   :  { %v8883_v26 = vadd.f32 %v6256_v59, %v8807_v12  ;;  %v8886_v54 = vadd.f32 %v6216_v60, %v8809_v13 }
 0x238   :  { %v6258_v58 = vpop.f32.mrf.mxu0  ;;  %v6218_v5 = vpop.f32.mrf.mxu1 }
 0x239   :  { %v6259_v33 = vadd.f32 %v6258_v58, %v6257_v4  ;;  %v6219_v18 = vadd.f32 %v6218_v5, %v6217_v22 }
 0x23a   :  { %v6260_v62 = vpop.f32.mrf.mxu0  ;;  %v6220_v7 = vpop.f32.mrf.mxu1 }
 0x23b   :  { %v8889_v9 = vadd.f32 %v6259_v33, %v8813_v20  ;;  %v8892_v34 = vadd.f32 %v6219_v18, %v8815_v16 }
 0x23c   :  { %v6261_v37 = vpop.f32.mrf.mxu0  ;;  %v6221_v44 = vpop.f32.mrf.mxu1 }
 0x23d   :  { %v6262_v38 = vadd.f32 %v6261_v37, %v6260_v62  ;;  %v6222_v12 = vadd.f32 %v6221_v44, %v6220_v7 }
 0x23e   :  { %v6263_v45 = vpop.f32.mrf.mxu0  ;;  %v6223_v50 = vpop.f32.mrf.mxu1 }
 0x23f   :  { %v8895_v13 = vadd.f32 %v6262_v38, %v8818_v24  ;;  %v8898_v11 = vadd.f32 %v6222_v12, %v8820_v27 }
 0x240   :  { %v6264_v1 = vpop.f32.mrf.mxu0  ;;  %v6224_v36 = vpop.f32.mrf.mxu1 }
 0x241   :  { %v6265_v55 = vadd.f32 %v6264_v1, %v6263_v45  ;;  %v6225_v20 = vadd.f32 %v6224_v36, %v6223_v50 }
 0x242   :  { %v6266_v56 = vpop.f32.mrf.mxu0 }
 0x243   :  { %v8901_v16 = vadd.f32 %v6265_v55, %v8824_v29  ;;  %v8904_v48 = vadd.f32 %v6225_v20, %v8826_v46 }
 0x244   :  { %v6267_v30 = vpop.f32.mrf.mxu0 }
 0x245   :  { %v6268_v43 = vadd.f32 %v6267_v30, %v6266_v56 }
 0x246   :  { %v6269_v2 = vpop.f32.mrf.mxu0 }
 0x247   :  { %v8907_v24 = vadd.f32 %v6268_v43, %v8829_v40 }
 0x248   :  { %v6270_v32 = vpop.f32.mrf.mxu0 }
 0x249   :  { %v6271_v27 = vadd.f32 %v6270_v32, %v6269_v2 }
 0x24a   :  { %v6272_v49 = vpop.f32.mrf.mxu0 }
 0x24b   :  { %v8910_v39 = vadd.f32 %v6271_v27, %v8833_v41 }
 0x24c   :  { %v6273_v3 = vpop.f32.mrf.mxu0 }
 0x24d   :  { %v6274_v21 = vadd.f32 %v6273_v3, %v6272_v49 }
 0x24e   :  { %v6275_v51 = vpop.f32.mrf.mxu0 }
 0x24f   :  { %v8913_v29 = vadd.f32 %v6274_v21, %v8836_v35 }
 0x250   :  { %v6276_v46 = vpop.f32.mrf.mxu0 }
 0x251   :  { %v6277_v52 = vadd.f32 %v6276_v46, %v6275_v51 }
 0x252   :  { %v6278_v15 = vpop.f32.mrf.mxu0 }
 0x253   :  { %v8916_v17 = vadd.f32 %v6277_v52, %v8840_v14 }
 0x254   :  { %v6279_v40 = vpop.f32.mrf.mxu0 }
 0x255   :  { %v6280_v6 = vadd.f32 %v6279_v40, %v6278_v15 }
 0x256   :  { %v6281_v53 = vpop.f32.mrf.mxu0 }
 0x257   :  { %v8919_v59 = vadd.f32 %v6280_v6, %v8843_v10 }
 0x258   :  { %v6282_v41 = vpop.f32.mrf.mxu0 }
 0x259   :  { %v6283_v60 = vadd.f32 %v6282_v41, %v6281_v53 }
 0x25a   :  { %v6284_v4 = vpop.f32.mrf.mxu0 }
 0x25b   :  { %v8922_v22 = vadd.f32 %v6283_v60, %v8847_v23 }
 0x25c   :  { %v6285_v35 = vpop.f32.mrf.mxu0 }
 0x25d   :  { %v6286_v58 = vadd.f32 %v6285_v35, %v6284_v4 }
 0x25e   :  { %v6287_v5 = vpop.f32.mrf.mxu0 }
 0x25f   :  { %v8925_v33 = vadd.f32 %v6286_v58, %v8850_v25 }
 0x260   :  { %v6288_v14 = vpop.f32.mrf.mxu0 }
 0x261   :  { %v6289_v18 = vadd.f32 %v6288_v14, %v6287_v5 }
 0x262   :  { %v6290_v62 = vpop.f32.mrf.mxu0  ;;  %v6330_v7 = vpop.f32.mrf.mxu1 }
 0x263   :  { %v8928_v37 = vadd.f32 %v6289_v18, %v8854_v28 }
 0x264   :  { %v6291_v10 = vpop.f32.mrf.mxu0  ;;  %v6331_v44 = vpop.f32.mrf.mxu1 }
 0x265   :  { %v6292_v38 = vadd.f32 %v6291_v10, %v6290_v62 }
 0x266   :  { %v6293_v12 = vpop.f32.mrf.mxu0  ;;  %v6333_v45 = vpop.f32.mrf.mxu1 }
 0x267   :  { %v8931_v23 = vadd.f32 %v6292_v38, %v8860_v8  ;;  %v6332_v38 = vadd.f32 %v6331_v44, %v6330_v7 }
 0x268   :  { %v6294_v50 = vpop.f32.mrf.mxu0  ;;  %v6334_v1 = vpop.f32.mrf.mxu1 }
 0x269   :  { %v6295_v36 = vadd.f32 %v6294_v50, %v6293_v12 }
 0x26a   :  { %v6296_v25 = vpop.f32.mrf.mxu0  ;;  %v6336_v55 = vpop.f32.mrf.mxu1 }
 0x26b   :  { %v8934_v20 = vadd.f32 %v6295_v36, %v8867_v31 }
 0x26c   :  { %v6297_v56 = vpop.f32.mrf.mxu0  ;;  %v6337_v30 = vpop.f32.mrf.mxu1 }
 0x26d   :  { %v6298_v28 = vadd.f32 %v6297_v56, %v6296_v25  ;;  %v6338_v14 = vadd.f32 %v6337_v30, %v6336_v55 }
 0x26e   :  { %v6299_v43 = vpop.f32.mrf.mxu0  ;;  %v6339_v2 = vpop.f32.mrf.mxu1 }
 0x26f   :  { %v8937_v32 = vadd.f32 %v6298_v28, %v8873_v63  ;;  %v3217_v25 = vadd.f32 %v6338_v14, %v8870_v61  ;;  %v6335_v28 = vadd.f32 %v6334_v1, %v6333_v45 }
 0x270   :  { %v6300_v27 = vpop.f32.mrf.mxu0  ;;  %v6340_v49 = vpop.f32.mrf.mxu1 }
 0x271   :  { %v6301_v8 = vadd.f32 %v6300_v27, %v6299_v43  ;;  %v6341_v43 = vadd.f32 %v6340_v49, %v6339_v2  ;;  %v3212_v45 = vadd.f32 %v6335_v28, %v8865_v42 }
 0x272   :  { %v6302_v3 = vpop.f32.mrf.mxu0  ;;  %v6342_v21 = vpop.f32.mrf.mxu1 }
 0x273   :  { %v8940_v51 = vadd.f32 %v6301_v8, %v8880_v19 }
 0x274   :  { %v6303_v46 = vpop.f32.mrf.mxu0  ;;  %v6343_v52 = vpop.f32.mrf.mxu1 }
 0x275   :  { %v6304_v31 = vadd.f32 %v6303_v46, %v6302_v3  ;;  %v3220_v3 = vadd.f32 %v6341_v43, %v8878_v57  ;;  %v6344_v1 = vadd.f32 %v6343_v52, %v6342_v21 }
 0x276   :  { %v6305_v15 = vpop.f32.mrf.mxu0  ;;  %v6345_v40 = vpop.f32.mrf.mxu1 }
 0x277   :  { %v8943_v6 = vadd.f32 %v6304_v31, %v8886_v54 }
 0x278   :  { %v6306_v53 = vpop.f32.mrf.mxu0  ;;  %v6346_v41 = vpop.f32.mrf.mxu1 }
 0x279   :  { %v6307_v63 = vadd.f32 %v6306_v53, %v6305_v15 }
 0x27a   :  { %v6308_v60 = vpop.f32.mrf.mxu0  ;;  %v6348_v4 = vpop.f32.mrf.mxu1 }
 0x27b   :  { %v8946_v35 = vadd.f32 %v6307_v63, %v8892_v34 }
 0x27c   :  { %v6309_v58 = vpop.f32.mrf.mxu0  ;;  %v6349_v5 = vpop.f32.mrf.mxu1 }
 0x27d   :  { %v6310_v19 = vadd.f32 %v6309_v58, %v6308_v60  ;;  %v6350_v27 = vadd.f32 %v6349_v5, %v6348_v4  ;;  %v6347_v60 = vadd.f32 %v6346_v41, %v6345_v40 }
 0x27e   :  { %v6311_v18 = vpop.f32.mrf.mxu0  ;;  %v6351_v62 = vpop.f32.mrf.mxu1 }
 0x27f   :  { %v8949_v10 = vadd.f32 %v6310_v19, %v8898_v11  ;;  %v3209_v11 = vadd.f32 %v6332_v38, %v8857_v47  ;;  %v3233_v49 = vadd.f32 %v6350_v27, %v8895_v13  ;;  %v3225_v13 = vadd.f32 %v6344_v1, %v8883_v26 }
 0x280   :  { %v6312_v54 = vpop.f32.mrf.mxu0  ;;  %v6352_v12 = vpop.f32.mrf.mxu1  ;;  %v3228_v40 = vadd.f32 %v6347_v60, %v8889_v9 }
 0x281   :  { %v6313_v50 = vadd.f32 %v6312_v54, %v6311_v18  ;;  %v6353_v47 = vadd.f32 %v6352_v12, %v6351_v62 }
 0x282   :  { %v6354_v36 = vpop.f32.mrf.mxu1 }
 0x283   :  { %v8953_v56 = vadd.f32 %v6313_v50, %v8904_v48  ;;  %v6440_v34 = vpop.f32.mrf.mxu0  ;;  %v3236_v5 = vadd.f32 %v6353_v47, %v8901_v16 }
 0x284   :  { %v8955_v55 = vadd.f32 %v6440_v34, %v3217_v25  ;;  %v6355_v30 = vpop.f32.mrf.mxu1 }
 0x285   :  { %v3337_v7 = vpop.f32.mrf.mxu0  ;;  %v6356_v9 = vadd.f32 %v6355_v30, %v6354_v36 }
 0x286   :  { %v8958_v44 = vadd.f32 %v3337_v7, %v3209_v11  ;;  %v6357_v8 = vpop.f32.mrf.mxu1  ;;  %v3439_v61 = vsel %vm3432_vm0, %v8955_v55, 0.0 }
 0x287   :  { %3440 = vadd.xlane.f32.xlu0 %v3439_v61  ;;  %v6441_v48 = vpop.f32.mrf.mxu0 }
 0x288   :  { %v6358_v46 = vpop.f32.mrf.mxu1  ;;  %v8965_v31 = vadd.f32 %v6441_v48, %v3220_v3  ;;  %v3433_v63 = vsel %vm3432_vm0, %v8958_v44, 0.0  ;;  %v3241_v3 = vadd.f32 %v6356_v9, %v8907_v24 }
 0x289   :  { %v3340_v2 = vpop.f32.mrf.mxu0 }
 0x28a   :  { %v8967_v15 = vadd.f32 %v3340_v2, %v3212_v45  ;;  %v6360_v53 = vpop.f32.mrf.mxu1  ;;  %v3442_v19 = vsel %vm3432_vm0, %v8965_v31, 0.0  ;;  %v6359_v2 = vadd.f32 %v6358_v46, %v6357_v8 }
 0x28b   :  { %v6444_v4 = vpop.f32.mrf.mxu0  ;;  %3434 = vadd.xlane.f32.xlu0 %v3433_v63 }
 0x28c   :  { %v8971_v57 = vadd.f32 %v6444_v4, %v3233_v49  ;;  %v6361_v58 = vpop.f32.mrf.mxu1  ;;  %v3436_v42 = vsel %vm3432_vm0, %v8967_v15, 0.0 }
 0x28d   :  { %v3353_v21 = vpop.f32.mrf.mxu0  ;;  %3437 = vadd.xlane.f32.xlu1 %v3436_v42  ;;  %v6362_v41 = vadd.f32 %v6361_v58, %v6360_v53  ;;  %v3244_v58 = vadd.f32 %v6359_v2, %v8910_v39  ;;  %v3925_v2 = vld [vmem:[%s10608_s5 + $0x60] sm:$0xff] }
 0x28e   :  { %v6363_v52 = vpop.f32.mrf.mxu1  ;;  %v8980_v18 = vadd.f32 %v3353_v21, %v3225_v13  ;;  %v3451_v54 = vsel %vm3432_vm0, %v8971_v57, 0.0  ;;  %v3920_v13 = vld [vmem:[%s10608_s5 + $0x38] sm:$0xff] }
 0x28f   :  { %v6445_v14 = vpop.f32.mrf.mxu0  ;;  %3443 = vadd.xlane.f32.xlu0 %v3442_v19  ;;  %v3249_v34 = vadd.f32 %v6362_v41, %v8913_v29 }
 0x290   :  { %v8982_v62 = vadd.f32 %v6445_v14, %v3236_v5  ;;  %v6364_v38 = vpop.f32.mrf.mxu1  ;;  %v3445_v43 = vsel %vm3432_vm0, %v8980_v18, 0.0 }
 0x291   :  { %v3356_v26 = vpop.f32.mrf.mxu0  ;;  %3452 = vadd.xlane.f32.xlu1 %v3451_v54  ;;  %v6365_v48 = vadd.f32 %v6364_v38, %v6363_v52 }
 0x292   :  { %v8986_v12 = vadd.f32 %v3356_v26, %v3228_v40  ;;  %v6366_v16 = vpop.f32.mrf.mxu1  ;;  %v3454_v50 = vsel %vm3432_vm0, %v8982_v62, 0.0 }
 0x293   :  { %v6448_v25 = vpop.f32.mrf.mxu0  ;;  %3455 = vadd.xlane.f32.xlu0 %v3454_v50  ;;  %v3252_v49 = vadd.f32 %v6365_v48, %v8916_v17  ;;  %v3932_v48 = vld [vmem:[%s10608_s5 + $0x98] sm:$0xff] }
 0x294   :  { %v6367_v28 = vpop.f32.mrf.mxu1  ;;  %v8993_v11 = vadd.f32 %v6448_v25, %v3249_v34  ;;  %v3448_v7 = vsel %vm3432_vm0, %v8986_v12, 0.0 }
 0x295   :  { %3446 = vadd.xlane.f32.xlu1 %v3445_v43  ;;  %v3369_v61 = vpop.f32.mrf.mxu0  ;;  %v6368_v52 = vadd.f32 %v6367_v28, %v6366_v16  ;;  %v3921_v16 = vld [vmem:[%s10608_s5 + $0x40] sm:$0xff] }
 0x296   :  { %v6369_v27 = vpop.f32.mrf.mxu1  ;;  %v8998_v36 = vadd.f32 %v3369_v61, %v3241_v3  ;;  %v3463_v30 = vsel %vm3432_vm0, %v8993_v11, 0.0  ;;  %v3923_v61 = vld [vmem:[%s10608_s5 + $0x50] sm:$0xff]  ;;  %v3924_v3 = vld [vmem:[%s10608_s5 + $0x58] sm:$0xff] }
 0x297   :  { %3449 = vadd.xlane.f32.xlu0 %v3448_v7  ;;  %v6449_v1 = vpop.f32.mrf.mxu0  ;;  %v3257_v40 = vadd.f32 %v6368_v52, %v8919_v59 }
 0x298   :  { %v6370_v45 = vpop.f32.mrf.mxu1  ;;  %v9003_v53 = vadd.f32 %v6449_v1, %v3252_v49  ;;  %v3457_v60 = vsel %vm3432_vm0, %v8998_v36, 0.0  ;;  %v3919_v1 = vld [vmem:[%s10608_s5 + $0x30] sm:$0xff] }
 0x299   :  { %v3372_v24 = vpop.f32.mrf.mxu0  ;;  %v6371_v50 = vadd.f32 %v6370_v45, %v6369_v27  ;;  %v3922_v27 = vld [vmem:[%s10608_s5 + $0x48] sm:$0xff] }
 0x29a   :  { %v6372_v29 = vpop.f32.mrf.mxu1  ;;  %v9008_v42 = vadd.f32 %v3372_v24, %v3244_v58  ;;  %v3466_v8 = vsel %vm3432_vm0, %v9003_v53, 0.0 }
 0x29b   :  { %3464 = vadd.xlane.f32.xlu0 %v3463_v30  ;;  %v6452_v17 = vpop.f32.mrf.mxu0  ;;  %v3260_v34 = vadd.f32 %v6371_v50, %v8922_v22  ;;  %v3931_v22 = vld [vmem:[%s10608_s5 + $0x90] sm:$0xff] }
 0x29c   :  { %v6373_v47 = vpop.f32.mrf.mxu1  ;;  %v3460_v39 = vsel %vm3432_vm0, %v9008_v42, 0.0 }
 0x29d   :  { %v6374_v63 = vadd.f32 %v6373_v47, %v6372_v29  ;;  %v3385_v14 = vpop.f32.mrf.mxu0  ;;  %v3933_v29 = vld [vmem:[%s10608_s5 + $0xa0] sm:$0xff]  ;;  %v3934_v47 = vld [vmem:[%s10608_s5 + $0xa8] sm:$0xff] }
 0x29e   :  { %v6375_v4 = vpop.f32.mrf.mxu1  ;;  %v9024_v41 = vadd.f32 %v3385_v14, %v3257_v40 }
 0x29f   :  { %3458 = vadd.xlane.f32.xlu0 %v3457_v60  ;;  %v3265_v21 = vadd.f32 %v6374_v63, %v8925_v33  ;;  %v3929_v33 = vld [vmem:[%s10608_s5 + $0x80] sm:$0xff]  ;;  %v6453_v26 = vpop.f32.mrf.mxu0  ;;  %v3926_v60 = vld [vmem:[%s10608_s5 + $0x68] sm:$0xff] }
 0x2a0   :  { %v6376_v46 = vpop.f32.mrf.mxu1  ;;  %v3469_v25 = vsel %vm3432_vm0, %v9024_v41, 0.0 }
 0x2a1   :  { %v6377_v5 = vadd.f32 %v6376_v46, %v6375_v4  ;;  %v9018_v19 = vadd.f32 %v6452_v17, %v3265_v21  ;;  %v3388_v9 = vpop.f32.mrf.mxu0 }
 0x2a2   :  { %v9040_v28 = vadd.f32 %v3388_v9, %v3260_v34  ;;  %v6378_v45 = vpop.f32.mrf.mxu1 }
 0x2a3   :  { %3467 = vadd.xlane.f32.xlu0 %v3466_v8  ;;  %v3268_v38 = vadd.f32 %v6377_v5, %v8928_v37  ;;  %v3475_v54 = vsel %vm3432_vm0, %v9018_v19, 0.0  ;;  %v3930_v37 = vld [vmem:[%s10608_s5 + $0x88] sm:$0xff] }
 0x2a4   :  { %v3472_v7 = vsel %vm3432_vm0, %v9040_v28, 0.0  ;;  %v6379_v30 = vpop.f32.mrf.mxu1 }
 0x2a5   :  { %v9034_v59 = vadd.f32 %v6453_v26, %v3268_v38  ;;  %v6380_v52 = vadd.f32 %v6379_v30, %v6378_v45 }
 0x2a6   :  { %3974 = vperm.xlu1 %6465, %v3920_v13   ;;  %v6381_v49 = vpop.f32.mrf.mxu1 }
 0x2a7   :  { %3461 = vadd.xlane.f32.xlu0 %v3460_v39  ;;  %v3478_v43 = vsel %vm3432_vm0, %v9034_v59, 0.0  ;;  %v6456_v39 = vpop.f32.mrf.mxu0  ;;  %v3273_v40 = vadd.f32 %v6380_v52, %v8931_v23 }
 0x2a8   :  { %v6382_v63 = vpop.f32.mrf.mxu1 }
 0x2a9   :  { %v3401_v26 = vpop.f32.mrf.mxu0 }
 0x2aa   :  { %4019 = vperm.xlu1 %6465, %v3929_v33   ;;  %v6384_v24 = vpop.f32.mrf.mxu1  ;;  %v9077_v33 = vpop.permute.xlu0 %3944  ;;  %v9084_v9 = vadd.f32 %v3401_v26, %v3273_v40 }
 0x2ab   :  { %3476 = vadd.xlane.f32.xlu0 %v3475_v54  ;;  %v6457_v34 = vpop.f32.mrf.mxu0 }
 0x2ac   :  { %v6385_v4 = vpop.f32.mrf.mxu1 }
 0x2ad   :  { %v6386_v46 = vadd.f32 %v6385_v4, %v6384_v24 }
 0x2ae   :  { %3979 = vperm.xlu1 %6465, %v3921_v16   ;;  %v6387_v58 = vpop.f32.mrf.mxu1  ;;  %v9082_v50 = vpop.permute.xlu0 %3949 }
 0x2af   :  { %3470 = vadd.xlane.f32.xlu0 %v3469_v25  ;;  %v3281_v5 = vadd.f32 %v6386_v46, %v8937_v32  ;;  %v6383_v25 = vadd.f32 %v6382_v63, %v6381_v49 }
 0x2b0   :  { %v6388_v21 = vpop.f32.mrf.mxu1 }
 0x2b1   :  { %v6389_v38 = vadd.f32 %v6388_v21, %v6387_v58  ;;  %v9080_v54 = vadd.f32 %v6456_v39, %v3281_v5  ;;  %v3276_v23 = vadd.f32 %v6383_v25, %v8934_v20 }
 0x2b2   :  { %4024 = vperm.xlu1 %6465, %v3930_v37   ;;  %v6390_v8 = vpop.f32.mrf.mxu1 }
 0x2b3   :  { %3479 = vadd.xlane.f32.xlu0 %v3478_v43  ;;  %v3284_v37 = vadd.f32 %v6389_v38, %v8940_v51  ;;  %v3487_v32 = vsel %vm3432_vm0, %v9080_v54, 0.0 }
 0x2b4   :  { %v6391_v17 = vpop.f32.mrf.mxu1 }
 0x2b5   :  { %v6392_v45 = vadd.f32 %v6391_v17, %v6390_v8 }
 0x2b6   :  { %3984 = vperm.xlu1 %6465, %v3922_v27   ;;  %v6393_v13 = vpop.f32.mrf.mxu1 }
 0x2b7   :  { %3473 = vadd.xlane.f32.xlu0 %v3472_v7  ;;  %v3481_v7 = vsel %vm3432_vm0, %v9084_v9, 0.0 }
 0x2b8   :  { %v6394_v14 = vpop.f32.mrf.mxu1 }
 0x2b9   :  { %v6395_v4 = vadd.f32 %v6394_v14, %v6393_v13  ;;  %v9126_v14 = vpop.permute.xlu1 %3939 }
 0x2ba   :  { %4029 = vperm.xlu1 %6465, %v3931_v22   ;;  %v6396_v16 = vpop.f32.mrf.mxu1  ;;  %v9092_v22 = vadd.f32 %v6457_v34, %v3284_v37 }
 0x2bb   :  { %v3292_v17 = vadd.f32 %v6395_v4, %v8946_v35 }
 0x2bc   :  { %v6397_v43 = vpop.f32.mrf.mxu1  ;;  %v3490_v30 = vsel %vm3432_vm0, %v9092_v22, 0.0 }
 0x2bd   :  { %v6398_v27 = vadd.f32 %v6397_v43, %v6396_v16 }
 0x2be   :  { %3989 = vperm.xlu1 %6465, %v3923_v61   ;;  %v3404_v61 = vpop.f32.mrf.mxu0 }
 0x2bf   :  { %v9096_v51 = vadd.f32 %v3404_v61, %v3276_v23 }
 0x2c0   :  { %v6460_v20 = vpop.f32.mrf.mxu0 }
 0x2c2   :  { %4034 = vperm.xlu1 %6465, %v3932_v48   ;;  %v6399_v48 = vpop.f32.mrf.mxu1  ;;  %v3417_v24 = vpop.f32.mrf.mxu0 }
 0x2c4   :  { %v6461_v8 = vpop.f32.mrf.mxu0 }
 0x2c6   :  { %3994 = vperm.xlu1 %6465, %v3924_v3   ;;  %v9094_v3 = vpop.permute.xlu0 %3954  ;;  %v3420_v5 = vpop.f32.mrf.mxu0 }
 0x2c7   :  { %v9122_v39 = vadd.f32 %v3420_v5, %v3292_v17 }
 0x2c9   :  { %v3496_v35 = vsel %vm3432_vm0, %v9122_v39, 0.0 }
 0x2ca   :  { %4039 = vperm.xlu1 %6465, %v3933_v29   ;;  %v3297_v29 = vadd.f32 %v6398_v27, %v8949_v10 }
 0x2cc   :  { %v9104_v63 = vadd.f32 %v6460_v20, %v3297_v29 }
 0x2cd   :  { %3969 = vperm.xlu0 %6464, %v3919_v1   ;;  %v6400_v1 = vpop.f32.mrf.mxu1 }
 0x2ce   :  { %3999 = vperm.xlu1 %6465, %v3925_v2   ;;  %v3289_v2 = vadd.f32 %v6392_v45, %v8943_v6  ;;  %v6401_v49 = vadd.f32 %v6400_v1, %v6399_v48  ;;  %v3499_v21 = vsel %vm3432_vm0, %v9104_v63, 0.0 }
 0x2d0   :  { %v9108_v10 = vadd.f32 %v3417_v24, %v3289_v2  ;;  %v3300_v58 = vadd.f32 %v6401_v49, %v8953_v56 }
 0x2d2   :  { %4044 = vperm.xlu1 %6465, %v3934_v47   ;;  %v3484_v47 = vsel %vm3432_vm0, %v9096_v51, 0.0  ;;  %v3493_v46 = vsel %vm3432_vm0, %v9108_v10, 0.0  ;;  %v9118_v52 = vadd.f32 %v6461_v8, %v3300_v58 }
 0x2d4   :  { %v3502_v56 = vsel %vm3432_vm0, %v9118_v52, 0.0 }
 0x2d6   :  { %4004 = vperm.xlu1 %6465, %v3926_v60   ;;  %v9106_v60 = vpop.permute.xlu0 %3959 }
 0x2da   :  { %v9113_v6 = vpop.permute.xlu0 %3964 }
 0x2fa   :  { %3488 = vadd.xlane.f32.xlu1 %v3487_v32 }
 0x2fe   :  { %3482 = vadd.xlane.f32.xlu1 %v3481_v7 }
 0x302   :  { %3491 = vadd.xlane.f32.xlu1 %v3490_v30 }
 0x306   :  { %3485 = vadd.xlane.f32.xlu1 %v3484_v47 }
 0x30a   :  { %3500 = vadd.xlane.f32.xlu1 %v3499_v21 }
 0x30e   :  { %3494 = vadd.xlane.f32.xlu1 %v3493_v46 }
 0x310   :  { %v9120_v13 = vpop.xlane.xlu0 %3440 }
 0x312   :  { %3503 = vadd.xlane.f32.xlu1 %v3502_v56 }
 0x314   :  { %v9128_v40 = vpop.xlane.xlu0 %3434 }
 0x316   :  { %3497 = vadd.xlane.f32.xlu1 %v3496_v35  ;;  %v3438_v38 = vpop.xlane.xlu1 %3437 }
 0x317   :  { %v3506_v26 = vmul.f32 0.020408163, %v3438_v38 }
 0x318   :  { %v3444_v16 = vpop.xlane.xlu0 %3443 }
 0x319   :  { %v3508_v25 = vmul.f32 0.020408163, %v3444_v16  ;;  %v9133_v37 = vsub.f32 %v8967_v15, %v3506_v26 }
 0x31a   :  { %v3453_v24 = vpop.xlane.xlu1 %3452 }
 0x31b   :  { %v9136_v32 = vsub.f32 %v8965_v31, %v3508_v25  ;;  %v3554_v61 = vmul.f32 %v9133_v37, %v9133_v37 }
 0x31c   :  { %v3456_v34 = vpop.xlane.xlu0 %3455 }
 0x31d   :  { %v3512_v43 = vmul.f32 0.020408163, %v3456_v34  ;;  %v3556_v23 = vmul.f32 %v9136_v32, %v9136_v32  ;;  %v3580_v31 = vsel %vm3432_vm0, %v3554_v61, 0.0 }
 0x31f   :  { %v9141_v27 = vsub.f32 %v8982_v62, %v3512_v43  ;;  %v3586_v7 = vsel %vm3432_vm0, %v3556_v23, 0.0  ;;  %v3935_v62 = vld [vmem:[%s10608_s5 + $0xb0] sm:$0xff] }
 0x320   :  { %3587 = vadd.xlane.f32.xlu0 %v3586_v7  ;;  %v3450_v48 = vpop.xlane.xlu0 %3449 }
 0x321   :  { %v3510_v15 = vmul.f32 0.020408163, %v3450_v48  ;;  %v3560_v29 = vmul.f32 %v9141_v27, %v9141_v27 }
 0x323   :  { %v9147_v45 = vsub.f32 %v8986_v12, %v3510_v15  ;;  %v3598_v2 = vsel %vm3432_vm0, %v3560_v29, 0.0 }
 0x324   :  { %3581 = vadd.xlane.f32.xlu0 %v3580_v31  ;;  %v3465_v30 = vpop.xlane.xlu0 %3464 }
 0x325   :  { %v3515_v20 = vmul.f32 0.020408163, %v3465_v30  ;;  %v3558_v12 = vmul.f32 %v9147_v45, %v9147_v45 }
 0x327   :  { %v9156_v1 = vsub.f32 %v8993_v11, %v3515_v20  ;;  %4049 = vperm.xlu1 %6465, %v3935_v62   ;;  %v3592_v58 = vsel %vm3432_vm0, %v3558_v12, 0.0  ;;  %v3507_v62 = vmul.f32 0.020408163, %v9120_v13 }
 0x328   :  { %3599 = vadd.xlane.f32.xlu0 %v3598_v2  ;;  %v3459_v49 = vpop.xlane.xlu0 %3458 }
 0x329   :  { %v3513_v47 = vmul.f32 0.020408163, %v3459_v49  ;;  %v3563_v21 = vmul.f32 %v9156_v1, %v9156_v1 }
 0x32b   :  { %v9162_v4 = vsub.f32 %v8998_v36, %v3513_v47  ;;  %v3607_v46 = vsel %vm3432_vm0, %v3563_v21, 0.0  ;;  %v3447_v36 = vpop.xlane.xlu1 %3446  ;;  %v9203_v47 = vsub.f32 %v8955_v55, %v3507_v62 }
 0x32c   :  { %3593 = vadd.xlane.f32.xlu0 %v3592_v58  ;;  %v3468_v11 = vpop.xlane.xlu0 %3467  ;;  %v3505_v58 = vmul.f32 0.020408163, %v9128_v40 }
 0x32d   :  { %v3516_v8 = vmul.f32 0.020408163, %v3468_v11  ;;  %v3561_v5 = vmul.f32 %v9162_v4, %v9162_v4  ;;  %v3555_v55 = vmul.f32 %v9203_v47, %v9203_v47 }
 0x32f   :  { %v9168_v17 = vsub.f32 %v9003_v53, %v3516_v8  ;;  %v3601_v26 = vsel %vm3432_vm0, %v3561_v5, 0.0  ;;  %v9179_v34 = vpop.permute.xlu1 %3974  ;;  %v9215_v8 = vsub.f32 %v8958_v44, %v3505_v58 }
 0x330   :  { %3608 = vadd.xlane.f32.xlu0 %v3607_v46  ;;  %v3462_v56 = vpop.xlane.xlu0 %3461  ;;  %v3511_v46 = vmul.f32 0.020408163, %v3453_v24 }
 0x331   :  { %v3514_v35 = vmul.f32 0.020408163, %v3462_v56  ;;  %v3564_v16 = vmul.f32 %v9168_v17, %v9168_v17  ;;  %v3553_v44 = vmul.f32 %v9215_v8, %v9215_v8 }
 0x332   :  { %v9225_v56 = vsub.f32 %v8971_v57, %v3511_v46 }
 0x333   :  { %v9174_v38 = vsub.f32 %v9008_v42, %v3514_v35  ;;  %v3610_v23 = vsel %vm3432_vm0, %v3564_v16, 0.0  ;;  %v3509_v35 = vmul.f32 0.020408163, %v3447_v36 }
 0x334   :  { %3602 = vadd.xlane.f32.xlu0 %v3601_v26  ;;  %v3477_v53 = vpop.xlane.xlu0 %3476  ;;  %v3583_v26 = vsel %vm3432_vm0, %v3555_v55, 0.0 }
 0x335   :  { %v3519_v25 = vmul.f32 0.020408163, %v3477_v53  ;;  %v3562_v7 = vmul.f32 %v9174_v38, %v9174_v38  ;;  %v9232_v16 = vsub.f32 %v8980_v18, %v3509_v35  ;;  %v3577_v53 = vsel %vm3432_vm0, %v3553_v44, 0.0 }
 0x337   :  { %v9182_v43 = vsub.f32 %v9018_v19, %v3519_v25  ;;  %v3604_v15 = vsel %vm3432_vm0, %v3562_v7, 0.0  ;;  %v9193_v19 = vpop.permute.xlu1 %4019  ;;  %v3559_v25 = vmul.f32 %v9225_v56, %v9225_v56 }
 0x338   :  { %3611 = vadd.xlane.f32.xlu0 %v3610_v23  ;;  %v3471_v42 = vpop.xlane.xlu0 %3470  ;;  %v3557_v23 = vmul.f32 %v9232_v16, %v9232_v16 }
 0x339   :  { %v3517_v61 = vmul.f32 0.020408163, %v3471_v42  ;;  %v3567_v31 = vmul.f32 %v9182_v43, %v9182_v43  ;;  %v3595_v36 = vsel %vm3432_vm0, %v3559_v25, 0.0 }
 0x33a   :  { %v3589_v42 = vsel %vm3432_vm0, %v3557_v23, 0.0 }
 0x33b   :  { %v9188_v48 = vsub.f32 %v9024_v41, %v3517_v61  ;;  %v3619_v2 = vsel %vm3432_vm0, %v3567_v31, 0.0  ;;  %v9206_v21 = vpop.permute.xlu1 %3979 }
 0x33c   :  { %3605 = vadd.xlane.f32.xlu0 %v3604_v15  ;;  %v3480_v29 = vpop.xlane.xlu0 %3479 }
 0x33d   :  { %v3520_v30 = vmul.f32 0.020408163, %v3480_v29  ;;  %v3565_v41 = vmul.f32 %v9188_v48, %v9188_v48 }
 0x33f   :  { %v9197_v20 = vsub.f32 %v9034_v59, %v3520_v30  ;;  %v3613_v59 = vsel %vm3432_vm0, %v3565_v41, 0.0 }
 0x340   :  { %3620 = vadd.xlane.f32.xlu0 %v3619_v2  ;;  %v3474_v12 = vpop.xlane.xlu0 %3473 }
 0x341   :  { %10617 = vst [vmem:[#allocation2_spill] sm:$0xff] %v9197_v20  ;;  %v3518_v49 = vmul.f32 0.020408163, %v3474_v12  ;;  %v3568_v11 = vmul.f32 %v9197_v20, %v9197_v20 }
 0x343   :  { %v9209_v13 = vsub.f32 %v9040_v28, %v3518_v49  ;;  %v3622_v40 = vsel %vm3432_vm0, %v3568_v11, 0.0  ;;  %v9222_v28 = vpop.permute.xlu1 %4024 }
 0x344   :  { %3614 = vadd.xlane.f32.xlu0 %v3613_v59 }
 0x345   :  { %v3566_v5 = vmul.f32 %v9209_v13, %v9209_v13 }
 0x347   :  { %v3616_v24 = vsel %vm3432_vm0, %v3566_v5, 0.0  ;;  %v9237_v57 = vpop.permute.xlu1 %3984 }
 0x348   :  { %3623 = vadd.xlane.f32.xlu0 %v3622_v40 }
 0x34b   :  { %3584 = vadd.xlane.f32.xlu1 %v3583_v26  ;;  %v9242_v7 = vpop.permute.xlu1 %4029 }
 0x34c   :  { %3617 = vadd.xlane.f32.xlu0 %v3616_v24 }
 0x34f   :  { %3578 = vadd.xlane.f32.xlu1 %v3577_v53  ;;  %v9245_v18 = vpop.permute.xlu1 %3989 }
 0x353   :  { %3596 = vadd.xlane.f32.xlu1 %v3595_v36  ;;  %v9247_v61 = vpop.permute.xlu1 %4034 }
 0x357   :  { %3590 = vadd.xlane.f32.xlu1 %v3589_v42  ;;  %v9249_v15 = vpop.permute.xlu1 %3994 }
 0x35b   :  { %v9251_v31 = vpop.permute.xlu1 %4039 }
 0x35f   :  { %v9253_v29 = vpop.permute.xlu1 %3999 }
 0x363   :  { %v9255_v30 = vpop.permute.xlu1 %4044 }
 0x367   :  { %v9257_v62 = vpop.permute.xlu1 %4004 }
 0x383   :  { %v3489_v2 = vpop.xlane.xlu1 %3488 }
 0x384   :  { %v3523_v41 = vmul.f32 0.020408163, %v3489_v2 }
 0x386   :  { %v9260_v12 = vsub.f32 %v9080_v54, %v3523_v41 }
 0x387   :  { %v3483_v49 = vpop.xlane.xlu1 %3482 }
 0x388   :  { %v3521_v58 = vmul.f32 0.020408163, %v3483_v49  ;;  %v3571_v59 = vmul.f32 %v9260_v12, %v9260_v12 }
 0x38a   :  { %v9265_v11 = vsub.f32 %v9084_v9, %v3521_v58  ;;  %v3631_v46 = vsel %vm3432_vm0, %v3571_v59, 0.0 }
 0x38b   :  { %v3492_v55 = vpop.xlane.xlu1 %3491  ;;  %3632 = vadd.xlane.f32.xlu1 %v3631_v46 }
 0x38c   :  { %v3524_v40 = vmul.f32 0.020408163, %v3492_v55  ;;  %v3569_v5 = vmul.f32 %v9265_v11, %v9265_v11 }
 0x38e   :  { %v9271_v35 = vsub.f32 %v9092_v22, %v3524_v40  ;;  %v3625_v54 = vsel %vm3432_vm0, %v3569_v5, 0.0 }
 0x38f   :  { %v3486_v26 = vpop.xlane.xlu1 %3485  ;;  %3626 = vadd.xlane.f32.xlu1 %v3625_v54 }
 0x390   :  { %v3522_v44 = vmul.f32 0.020408163, %v3486_v26  ;;  %v3572_v9 = vmul.f32 %v9271_v35, %v9271_v35 }
 0x392   :  { %v9277_v24 = vsub.f32 %v9096_v51, %v3522_v44  ;;  %v3634_v53 = vsel %vm3432_vm0, %v3572_v9, 0.0 }
 0x393   :  { %v3501_v25 = vpop.xlane.xlu1 %3500  ;;  %3635 = vadd.xlane.f32.xlu1 %v3634_v53  ;;  %v9306_v53 = vpop.permute.xlu0 %3969 }
 0x394   :  { %v3527_v36 = vmul.f32 0.020408163, %v3501_v25  ;;  %v3570_v22 = vmul.f32 %v9277_v24, %v9277_v24 }
 0x396   :  { %v9283_v23 = vsub.f32 %v9104_v63, %v3527_v36  ;;  %v3628_v42 = vsel %vm3432_vm0, %v3570_v22, 0.0 }
 0x397   :  { %v3495_v2 = vpop.xlane.xlu1 %3494  ;;  %3629 = vadd.xlane.f32.xlu1 %v3628_v42 }
 0x398   :  { %v3525_v41 = vmul.f32 0.020408163, %v3495_v2  ;;  %v3575_v51 = vmul.f32 %v9283_v23, %v9283_v23 }
 0x39a   :  { %v9289_v49 = vsub.f32 %v9108_v10, %v3525_v41  ;;  %v3643_v58 = vsel %vm3432_vm0, %v3575_v51, 0.0 }
 0x39b   :  { %v3504_v59 = vpop.xlane.xlu1 %3503  ;;  %3644 = vadd.xlane.f32.xlu1 %v3643_v58 }
 0x39c   :  { %v3528_v46 = vmul.f32 0.020408163, %v3504_v59  ;;  %v3573_v63 = vmul.f32 %v9289_v49, %v9289_v49 }
 0x39e   :  { %v9295_v55 = vsub.f32 %v9118_v52, %v3528_v46  ;;  %v3637_v40 = vsel %vm3432_vm0, %v3573_v63, 0.0  ;;  %v3674_v46 = vld [vmem:[%s10609_s4 + $0x8] sm:$0xff] }
 0x39f   :  { %v3498_v5 = vpop.xlane.xlu1 %3497  ;;  %3638 = vadd.xlane.f32.xlu1 %v3637_v40 }
 0x3a0   :  { %10618 = vst [vmem:[#allocation3_spill] sm:$0xff] %v9295_v55  ;;  %v3526_v54 = vmul.f32 0.020408163, %v3498_v5  ;;  %v3576_v10 = vmul.f32 %v9295_v55, %v9295_v55 }
 0x3a2   :  { %v9301_v26 = vsub.f32 %v9122_v39, %v3526_v54  ;;  %v3646_v44 = vsel %vm3432_vm0, %v3576_v10, 0.0 }
 0x3a3   :  { %3647 = vadd.xlane.f32.xlu1 %v3646_v44 }
 0x3a4   :  { %v3574_v9 = vmul.f32 %v9301_v26, %v9301_v26 }
 0x3a6   :  { %v3640_v52 = vsel %vm3432_vm0, %v3574_v9, 0.0 }
 0x3a7   :  { %3641 = vadd.xlane.f32.xlu1 %v3640_v52 }
 0x3a9   :  { %v3588_v25 = vpop.xlane.xlu0 %3587 }
 0x3ad   :  { %v3582_v36 = vpop.xlane.xlu0 %3581 }
 0x3ae   :  { %v3650_v22 = vmul.f32 0.020408163, %v3582_v36 }
 0x3b0   :  { %v3698_v42 = vadd.f32 1e-05, %v3650_v22 }
 0x3b1   :  { %v9309_v2 = vpop.xlane.xlu0 %3599 }
 0x3b2   :  { %7354 = vrsqrt.f32 %v3698_v42 }
 0x3b5   :  { %v9311_v39 = vpop.xlane.xlu0 %3593 }
 0x3b9   :  { %v3609_v41 = vpop.xlane.xlu0 %3608 }
 0x3ba   :  { %v3659_v51 = vmul.f32 0.020408163, %v3609_v41  ;;  %v3683_v41 = vld [vmem:[%s10609_s4 + $0x50] sm:$0xff] }
 0x3bc   :  { %v3707_v58 = vadd.f32 1e-05, %v3659_v51 }
 0x3bd   :  { %v3603_v59 = vpop.xlane.xlu0 %3602 }
 0x3be   :  { %7356 = vrsqrt.f32 %v3707_v58  ;;  %v3657_v63 = vmul.f32 0.020408163, %v3603_v59 }
 0x3bf   :  { %v7355_v40 = vpop.eup %7354 }
 0x3c0   :  { %v3705_v5 = vadd.f32 1e-05, %v3657_v63  ;;  %v3746_v54 = vmul.f32 %v7355_v40, %v3674_v46  ;;  %v3681_v40 = vld [vmem:[%s10609_s4 + $0x40] sm:$0xff] }
 0x3c1   :  { %v3612_v10 = vpop.xlane.xlu0 %3611 }
 0x3c2   :  { %7358 = vrsqrt.f32 %v3705_v5  ;;  %v3660_v44 = vmul.f32 0.020408163, %v3612_v10  ;;  %3776 = vperm.xlu0 %6464, %v3746_v54   ;;  %v9322_v10 = vpop.permute.xlu1 %4049 }
 0x3c4   :  { %v3708_v9 = vadd.f32 1e-05, %v3660_v44 }
 0x3c5   :  { %v3606_v52 = vpop.xlane.xlu0 %3605 }
 0x3c6   :  { %7360 = vrsqrt.f32 %v3708_v9  ;;  %v3658_v36 = vmul.f32 0.020408163, %v3606_v52 }
 0x3c8   :  { %v3706_v22 = vadd.f32 1e-05, %v3658_v36  ;;  %v3684_v36 = vld [vmem:[%s10609_s4 + $0x58] sm:$0xff] }
 0x3c9   :  { %v3621_v42 = vpop.xlane.xlu0 %3620 }
 0x3ca   :  { %7362 = vrsqrt.f32 %v3706_v22  ;;  %v3663_v51 = vmul.f32 0.020408163, %v3621_v42 }
 0x3cb   :  { %v7357_v58 = vpop.eup %7356 }
 0x3cc   :  { %v3711_v59 = vadd.f32 1e-05, %v3663_v51  ;;  %v3755_v63 = vmul.f32 %v7357_v58, %v3683_v41 }
 0x3cd   :  { %v3615_v46 = vpop.xlane.xlu0 %3614 }
 0x3ce   :  { %7364 = vrsqrt.f32 %v3711_v59  ;;  %v3661_v5 = vmul.f32 0.020408163, %v3615_v46  ;;  %3821 = vperm.xlu0 %6464, %v3755_v63   ;;  %v3682_v59 = vld [vmem:[%s10609_s4 + $0x48] sm:$0xff] }
 0x3cf   :  { %v7359_v54 = vpop.eup %7358 }
 0x3d0   :  { %v3709_v44 = vadd.f32 1e-05, %v3661_v5  ;;  %v3753_v9 = vmul.f32 %v7359_v54, %v3681_v40  ;;  %v3652_v40 = vmul.f32 0.020408163, %v3588_v25  ;;  %v3685_v25 = vld [vmem:[%s10609_s4 + $0x60] sm:$0xff] }
 0x3d1   :  { %v9324_v52 = vpop.xlane.xlu0 %3623 }
 0x3d2   :  { %7366 = vrsqrt.f32 %v3709_v44  ;;  %3811 = vperm.xlu0 %6464, %v3753_v9   ;;  %v3687_v9 = vld [vmem:[%s10609_s4 + $0x70] sm:$0xff] }
 0x3d3   :  { %v7361_v22 = vpop.eup %7360 }
 0x3d4   :  { %v3585_v42 = vpop.xlane.xlu1 %3584  ;;  %v3756_v41 = vmul.f32 %v7361_v22, %v3684_v36  ;;  %v3700_v22 = vadd.f32 1e-05, %v3652_v40 }
 0x3d5   :  { %v3651_v51 = vmul.f32 0.020408163, %v3585_v42  ;;  %v3618_v58 = vpop.xlane.xlu0 %3617 }
 0x3d6   :  { %v3662_v63 = vmul.f32 0.020408163, %v3618_v58  ;;  %3826 = vperm.xlu0 %6464, %v3756_v41  }
 0x3d7   :  { %v7363_v46 = vpop.eup %7362  ;;  %v3699_v5 = vadd.f32 1e-05, %v3651_v51 }
 0x3d8   :  { %v3710_v54 = vadd.f32 1e-05, %v3662_v63  ;;  %v3579_v0 = vpop.xlane.xlu1 %3578  ;;  %v3754_v55 = vmul.f32 %v7363_v46, %v3682_v59 }
 0x3d9   :  { %7368 = vrsqrt.f32 %v3699_v5  ;;  %v3649_v44 = vmul.f32 0.020408163, %v3579_v0  ;;  %v3686_v5 = vld [vmem:[%s10609_s4 + $0x68] sm:$0xff] }
 0x3da   :  { %7370 = vrsqrt.f32 %v3710_v54  ;;  %3816 = vperm.xlu0 %6464, %v3754_v55   ;;  %v3656_v55 = vmul.f32 0.020408163, %v9309_v2  ;;  %v3673_v2 = vld [vmem:[%s10609_s4] sm:$0xff] }
 0x3db   :  { %v7365_v36 = vpop.eup %7364  ;;  %v3697_v42 = vadd.f32 1e-05, %v3649_v44 }
 0x3dc   :  { %v3597_v20 = vpop.xlane.xlu1 %3596  ;;  %v3759_v58 = vmul.f32 %v7365_v36, %v3687_v9  ;;  %v3704_v9 = vadd.f32 1e-05, %v3656_v55  ;;  %v3654_v36 = vmul.f32 0.020408163, %v9311_v39 }
 0x3dd   :  { %7372 = vrsqrt.f32 %v3697_v42  ;;  %v3655_v41 = vmul.f32 0.020408163, %v3597_v20  ;;  %v3675_v20 = vld [vmem:[%s10609_s4 + $0x10] sm:$0xff] }
 0x3de   :  { %3841 = vperm.xlu0 %6464, %v3759_v58   ;;  %7374 = vrsqrt.f32 %v3700_v22 }
 0x3df   :  { %v7367_v51 = vpop.eup %7366  ;;  %v3703_v0 = vadd.f32 1e-05, %v3655_v41  ;;  %v3702_v41 = vadd.f32 1e-05, %v3654_v36  ;;  %v3678_v36 = vld [vmem:[%s10609_s4 + $0x28] sm:$0xff] }
 0x3e0   :  { %v3591_v59 = vpop.xlane.xlu1 %3590  ;;  %v3757_v63 = vmul.f32 %v7367_v51, %v3685_v25 }
 0x3e1   :  { %v3653_v46 = vmul.f32 0.020408163, %v3591_v59  ;;  %7376 = vrsqrt.f32 %v3703_v0  ;;  %v3676_v0 = vld [vmem:[%s10609_s4 + $0x18] sm:$0xff] }
 0x3e2   :  { %3831 = vperm.xlu0 %6464, %v3757_v63   ;;  %v3679_v63 = vld [vmem:[%s10609_s4 + $0x30] sm:$0xff] }
 0x3e3   :  { %v3701_v40 = vadd.f32 1e-05, %v3653_v46 }
 0x3e5   :  { %7378 = vrsqrt.f32 %v3701_v40  ;;  %v3677_v40 = vld [vmem:[%s10609_s4 + $0x20] sm:$0xff] }
 0x3e6   :  { %v7369_v54 = vpop.eup %7368  ;;  %7380 = vrsqrt.f32 %v3704_v9 }
 0x3e7   :  { %v7371_v44 = vpop.eup %7370  ;;  %v3747_v22 = vmul.f32 %v7369_v54, %v3675_v20  ;;  %7382 = vrsqrt.f32 %v3702_v41  ;;  %v3680_v54 = vld [vmem:[%s10609_s4 + $0x38] sm:$0xff] }
 0x3e8   :  { %v3758_v42 = vmul.f32 %v7371_v44, %v3686_v5 }
 0x3e9   :  { %3781 = vperm.xlu1 %6465, %v3747_v22  }
 0x3ea   :  { %v7373_v58 = vpop.eup %7372  ;;  %3836 = vperm.xlu0 %6464, %v3758_v42  }
 0x3eb   :  { %v3745_v25 = vmul.f32 %v7373_v58, %v3673_v2  ;;  %v7375_v51 = vpop.eup %7374 }
 0x3ec   :  { %v3748_v39 = vmul.f32 %v7375_v51, %v3676_v0 }
 0x3ed   :  { %3771 = vperm.xlu1 %6465, %v3745_v25  }
 0x3ee   :  { %v7377_v59 = vpop.eup %7376 }
 0x3ef   :  { %v3751_v46 = vmul.f32 %v7377_v59, %v3679_v63 }
 0x3f1   :  { %3786 = vperm.xlu1 %6465, %v3748_v39  }
 0x3f2   :  { %v7379_v55 = vpop.eup %7378 }
 0x3f3   :  { %v3749_v20 = vmul.f32 %v7379_v55, %v3677_v40  ;;  %v7381_v5 = vpop.eup %7380 }
 0x3f4   :  { %v3752_v44 = vmul.f32 %v7381_v5, %v3680_v54  ;;  %v7383_v9 = vpop.eup %7382 }
 0x3f5   :  { %3801 = vperm.xlu1 %6465, %v3751_v46   ;;  %v3750_v22 = vmul.f32 %v7383_v9, %v3678_v36 }
 0x3f9   :  { %3791 = vperm.xlu1 %6465, %v3749_v20   ;;  %v3691_v20 = vld [vmem:[%s10609_s4 + $0x90] sm:$0xff] }
 0x3fd   :  { %3806 = vperm.xlu1 %6465, %v3752_v44  }
 0x401   :  { %3796 = vperm.xlu1 %6465, %v3750_v22   ;;  %v3689_v22 = vld [vmem:[%s10609_s4 + $0x80] sm:$0xff] }
 0x414   :  { %v3633_v42 = vpop.xlane.xlu1 %3632 }
 0x415   :  { %v3667_v2 = vmul.f32 0.020408163, %v3633_v42 }
 0x417   :  { %v3715_v58 = vadd.f32 1e-05, %v3667_v2 }
 0x418   :  { %v3627_v41 = vpop.xlane.xlu1 %3626 }
 0x419   :  { %7384 = vrsqrt.f32 %v3715_v58  ;;  %v3665_v25 = vmul.f32 0.020408163, %v3627_v41 }
 0x41b   :  { %v3713_v51 = vadd.f32 1e-05, %v3665_v25 }
 0x41c   :  { %v3636_v0 = vpop.xlane.xlu1 %3635 }
 0x41d   :  { %7386 = vrsqrt.f32 %v3713_v51  ;;  %v3668_v39 = vmul.f32 0.020408163, %v3636_v0  ;;  %v3692_v51 = vld [vmem:[%s10609_s4 + $0x98] sm:$0xff] }
 0x41f   :  { %v3716_v59 = vadd.f32 1e-05, %v3668_v39 }
 0x420   :  { %v3630_v63 = vpop.xlane.xlu1 %3629 }
 0x421   :  { %7388 = vrsqrt.f32 %v3716_v59  ;;  %v3666_v46 = vmul.f32 0.020408163, %v3630_v63  ;;  %v3927_v59 = vld [vmem:[%s10608_s5 + $0x70] sm:$0xff]  ;;  %v3664_v63 = vmul.f32 0.020408163, %v9324_v52 }
 0x422   :  { %v3695_v52 = vld [vmem:[%s10609_s4 + $0xb0] sm:$0xff] }
 0x423   :  { %v3714_v55 = vadd.f32 1e-05, %v3666_v46 }
 0x424   :  { %v3645_v40 = vpop.xlane.xlu1 %3644 }
 0x425   :  { %7390 = vrsqrt.f32 %v3714_v55  ;;  %v3671_v5 = vmul.f32 0.020408163, %v3645_v40 }
 0x426   :  { %v7385_v54 = vpop.eup %7384 }
 0x427   :  { %v3719_v44 = vadd.f32 1e-05, %v3671_v5  ;;  %v3763_v9 = vmul.f32 %v7385_v54, %v3691_v20  ;;  %v3690_v20 = vld [vmem:[%s10609_s4 + $0x88] sm:$0xff] }
 0x428   :  { %v3639_v36 = vpop.xlane.xlu1 %3638 }
 0x429   :  { %7392 = vrsqrt.f32 %v3719_v44  ;;  %v3669_v42 = vmul.f32 0.020408163, %v3639_v36  ;;  %3861 = vperm.xlu0 %6464, %v3763_v9   ;;  %v3928_v44 = vld [vmem:[%s10608_s5 + $0x78] sm:$0xff]  ;;  %v3712_v9 = vadd.f32 1e-05, %v3664_v63 }
 0x42a   :  { %v7387_v2 = vpop.eup %7386 }
 0x42b   :  { %v3717_v58 = vadd.f32 1e-05, %v3669_v42  ;;  %v3761_v41 = vmul.f32 %v7387_v2, %v3689_v22 }
 0x42c   :  { %v3648_v25 = vpop.xlane.xlu1 %3647 }
 0x42d   :  { %7394 = vrsqrt.f32 %v3717_v58  ;;  %v3672_v0 = vmul.f32 0.020408163, %v3648_v25  ;;  %3851 = vperm.xlu1 %6465, %v3761_v41   ;;  %v3693_v58 = vld [vmem:[%s10609_s4 + $0xa0] sm:$0xff] }
 0x42e   :  { %v7389_v39 = vpop.eup %7388 }
 0x42f   :  { %v3720_v46 = vadd.f32 1e-05, %v3672_v0  ;;  %v3764_v55 = vmul.f32 %v7389_v39, %v3692_v51  ;;  %v3696_v51 = vld [vmem:[%s10609_s4 + $0xb8] sm:$0xff] }
 0x430   :  { %v3642_v40 = vpop.xlane.xlu1 %3641 }
 0x431   :  { %7396 = vrsqrt.f32 %v3720_v46  ;;  %v3670_v5 = vmul.f32 0.020408163, %v3642_v40  ;;  %4009 = vperm.xlu1 %6465, %v3927_v59   ;;  %3866 = vperm.xlu0 %6464, %v3764_v55   ;;  %v3694_v59 = vld [vmem:[%s10609_s4 + $0xa8] sm:$0xff]  ;;  %v3688_v40 = vld [vmem:[%s10609_s4 + $0x78] sm:$0xff] }
 0x432   :  { %v7391_v54 = vpop.eup %7390 }
 0x433   :  { %v3718_v36 = vadd.f32 1e-05, %v3670_v5  ;;  %v3762_v22 = vmul.f32 %v7391_v54, %v3690_v20  ;;  %v3936_v5 = vld [vmem:[%s10608_s5 + $0xb8] sm:$0xff] }
 0x434   :  { %v6622_v54 = vld [vmem:[%s10610_s6 + $0x1f8] ss:$36 sps:$4 sm:$0xff]  }
 0x435   :  { %7398 = vrsqrt.f32 %v3718_v36  ;;  %4014 = vperm.xlu1 %6465, %v3928_v44   ;;  %3856 = vperm.xlu0 %6464, %v3762_v22   ;;  %v6624_v44 = vld [vmem:[%s10610_s6 + $0x1fc] ss:$36 sps:$4 sm:$0xff]   ;;  %v6627_v36 = vld [vmem:[%s10610_s6 + $0x204] ss:$36 sps:$4 sm:$0xff]   ;;  %v6628_v22 = vld [vmem:[%s10610_s6 + $0x1b0] ss:$36 sps:$4 sm:$0xff]  }
 0x436   :  { %v7393_v42 = vpop.eup %7392  ;;  %7400 = vrsqrt.f32 %v3712_v9  ;;  %v6625_v9 = vld [vmem:[%s10610_s6 + $0x200] ss:$36 sps:$4 sm:$0xff]   ;;  %4886 = vmatprep.subr.bf16.mxu1 %v6624_v44  ;;  %4957 = vmatprep.subr.bf16.mxu0 %v6627_v36  ;;  %v6652_v44 = vld [vmem:[%s10610_s6 + $0x90] ss:$36 sps:$4 sm:$0xff]   ;;  %v6655_v36 = vld [vmem:[%s10610_s6 + $0x98] ss:$36 sps:$4 sm:$0xff]  }
 0x437   :  { %v3767_v2 = vmul.f32 %v7393_v42, %v3695_v52  ;;  %v6630_v52 = vld [vmem:[%s10610_s6 + $0x1b4] ss:$36 sps:$4 sm:$0xff]   ;;  %4887 = vmatpush1.bf16.msra.mxu1 %v6622_v54  ;;  %4958 = vmatpush1.bf16.msra.mxu0 %v6625_v9  ;;  %v6657_v54 = vld [vmem:[%s10610_s6 + $0x9c] ss:$36 sps:$4 sm:$0xff]  }
 0x438   :  { %v6631_v42 = vld [vmem:[%s10610_s6 + $0x1b8] ss:$36 sps:$4 sm:$0xff]   ;;  %4888 = vmatprep.subr.bf16.mxu1 %v6630_v52 }
 0x439   :  { %3881 = vperm.xlu0 %6464, %v3767_v2   ;;  %v6633_v2 = vld [vmem:[%s10610_s6 + $0x1bc] ss:$36 sps:$4 sm:$0xff]  }
 0x43a   :  { %v7395_v41 = vpop.eup %7394  ;;  %4959 = vmatprep.subr.bf16.mxu0 %v6633_v2  ;;  %v6658_v2 = vld [vmem:[%s10610_s6 + $0x48] ss:$36 sps:$4 sm:$0xff]  }
 0x43b   :  { %v3765_v25 = vmul.f32 %v7395_v41, %v3693_v58  ;;  %v6636_v58 = vld [vmem:[%s10610_s6 + $0x16c] ss:$36 sps:$4 sm:$0xff]   ;;  %4889 = vmatpush1.bf16.msra.mxu1 %v6628_v22  ;;  %4960 = vmatpush1.bf16.msra.mxu0 %v6631_v42  ;;  %v6663_v42 = vld [vmem:[%s10610_s6 + $0x54] ss:$36 sps:$4 sm:$0xff]  }
 0x43c   :  { %v6634_v41 = vld [vmem:[%s10610_s6 + $0x168] ss:$36 sps:$4 sm:$0xff]   ;;  %4890 = vmatprep.subr.bf16.mxu1 %v6636_v58 }
 0x43d   :  { %3871 = vperm.xlu0 %6464, %v3765_v25   ;;  %v6639_v25 = vld [vmem:[%s10610_s6 + $0x174] ss:$36 sps:$4 sm:$0xff]   ;;  %v6660_v22 = vld [vmem:[%s10610_s6 + $0x4c] ss:$36 sps:$4 sm:$0xff]   ;;  %v3777_v52 = vpop.permute.xlu0 %3776 }
 0x43e   :  { %v7397_v0 = vpop.eup %7396  ;;  %4961 = vmatprep.subr.bf16.mxu0 %v6639_v25  ;;  %v3890_v25 = vmul.f32 %v3777_v52, %v9133_v37  ;;  %v6664_v37 = vld [vmem:[%s10610_s6] ss:$36 sps:$4 sm:$0xff]  }
 0x43f   :  { %v3768_v39 = vmul.f32 %v7397_v0, %v3696_v51  ;;  %v6637_v51 = vld [vmem:[%s10610_s6 + $0x170] ss:$36 sps:$4 sm:$0xff]   ;;  %v6642_v0 = vld [vmem:[%s10610_s6 + $0x124] ss:$36 sps:$4 sm:$0xff]   ;;  %4891 = vmatpush1.bf16.msra.mxu1 %v6634_v41 }
 0x440   :  { %4962 = vmatpush1.bf16.msra.mxu0 %v6637_v51  ;;  %4892 = vmatprep.subr.bf16.mxu1 %v6642_v0  ;;  %v6661_v41 = vld [vmem:[%s10610_s6 + $0x50] ss:$36 sps:$4 sm:$0xff]   ;;  %v6666_v0 = vld [vmem:[%s10610_s6 + $0x4] ss:$36 sps:$4 sm:$0xff]  }
 0x441   :  { %3886 = vperm.xlu0 %6464, %v3768_v39   ;;  %v6645_v39 = vld [vmem:[%s10610_s6 + $0x12c] ss:$36 sps:$4 sm:$0xff]  }
 0x442   :  { %v7399_v63 = vpop.eup %7398  ;;  %4963 = vmatprep.subr.bf16.mxu0 %v6645_v39  ;;  %v4081_v39 = vld [vmem:[%s10611_s2] sm:$0xff] }
 0x443   :  { %v3766_v46 = vmul.f32 %v7399_v63, %v3694_v59  ;;  %v7401_v55 = vpop.eup %7400  ;;  %v6640_v59 = vld [vmem:[%s10610_s6 + $0x120] ss:$36 sps:$4 sm:$0xff]   ;;  %v6643_v63 = vld [vmem:[%s10610_s6 + $0x128] ss:$36 sps:$4 sm:$0xff]  }
 0x444   :  { %v3760_v20 = vmul.f32 %v7401_v55, %v3688_v40  ;;  %v6651_v55 = vld [vmem:[%s10610_s6 + $0xe4] ss:$36 sps:$4 sm:$0xff]   ;;  %v6646_v40 = vld [vmem:[%s10610_s6 + $0xd8] ss:$36 sps:$4 sm:$0xff]   ;;  %4893 = vmatpush1.bf16.msra.mxu1 %v6640_v59  ;;  %4964 = vmatpush1.bf16.msra.mxu0 %v6643_v63  ;;  %v6669_v59 = vld [vmem:[%s10610_s6 + $0xc] ss:$36 sps:$4 sm:$0xff]  }
 0x445   :  { %3876 = vperm.xlu0 %6464, %v3766_v46   ;;  %v6648_v46 = vld [vmem:[%s10610_s6 + $0xdc] ss:$36 sps:$4 sm:$0xff]   ;;  %4965 = vmatprep.subr.bf16.mxu0 %v6651_v55 }
 0x446   :  { %4894 = vmatprep.subr.bf16.mxu1 %v6648_v46  ;;  %v4082_v46 = vld [vmem:[%s10611_s2 + $0x8] sm:$0xff] }
 0x448   :  { %4895 = vmatpush1.bf16.msra.mxu1 %v6646_v40  ;;  %v6672_v40 = vld [vmem:[%s10610_s6 + $0x31c] ss:$36 sps:$4 sm:$0xff]  }
 0x449   :  { %3846 = vperm.xlu0 %6464, %v3760_v20   ;;  %v6649_v20 = vld [vmem:[%s10610_s6 + $0xe0] ss:$36 sps:$4 sm:$0xff]  }
 0x44a   :  { %4966 = vmatpush1.bf16.msra.mxu0 %v6649_v20 }
 0x44b   :  { %4967 = vmatprep.subr.bf16.mxu0 %v6657_v54  ;;  %v6675_v54 = vld [vmem:[%s10610_s6 + $0x324] ss:$36 sps:$4 sm:$0xff]  }
 0x44d   :  { %4054 = vperm.xlu0 %6464, %v3936_v5   ;;  %v6654_v5 = vld [vmem:[%s10610_s6 + $0x94] ss:$36 sps:$4 sm:$0xff]  }
 0x44e   :  { %4896 = vmatprep.subr.bf16.mxu1 %v6654_v5  ;;  %4968 = vmatpush1.bf16.msra.mxu0 %v6655_v36  ;;  %v6673_v36 = vld [vmem:[%s10610_s6 + $0x320] ss:$36 sps:$4 sm:$0xff]  }
 0x44f   :  { %4897 = vmatpush1.bf16.msra.mxu1 %v6652_v44  ;;  %4969 = vmatprep.subr.bf16.mxu0 %v6663_v42  ;;  %v6670_v44 = vld [vmem:[%s10610_s6 + $0x318] ss:$36 sps:$4 sm:$0xff]  }
 0x450   :  { %4898 = vmatprep.subr.bf16.mxu1 %v6660_v22  ;;  %v6681_v22 = vld [vmem:[%s10610_s6 + $0x2dc] ss:$36 sps:$4 sm:$0xff]  }
 0x452   :  { %4970 = vmatpush1.bf16.msra.mxu0 %v6661_v41  ;;  %v6679_v41 = vld [vmem:[%s10610_s6 + $0x2d8] ss:$36 sps:$4 sm:$0xff]  }
 0x453   :  { %4899 = vmatpush1.bf16.msra.mxu1 %v6658_v2  ;;  %4971 = vmatprep.subr.bf16.mxu0 %v6669_v59 }
 0x454   :  { %4900 = vmatprep.subr.bf16.mxu1 %v6666_v0  ;;  %v6687_v0 = vld [vmem:[%s10610_s6 + $0x294] ss:$36 sps:$4 sm:$0xff]  }
 0x457   :  { %4901 = vmatpush1.bf16.msra.mxu1 %v6664_v37  ;;  %v6682_v37 = vld [vmem:[%s10610_s6 + $0x288] ss:$36 sps:$4 sm:$0xff]  }
 0x458   :  { %4910 = vmatprep.subr.bf16.mxu1 %v6672_v40 }
 0x45b   :  { %4911 = vmatpush2.bf16.msra.mxu1 %v6670_v44 }
 0x464   :  { %v3782_v9 = vpop.permute.xlu1 %3781 }
 0x465   :  { %v3891_v20 = vmul.f32 %v3782_v9, %v9203_v47  ;;  %v4083_v47 = vld [vmem:[%s10611_s2 + $0x10] sm:$0xff] }
 0x467   :  { %v4059_v42 = vadd.f32 %v9082_v50, %v3891_v20  ;;  %v4084_v50 = vld [vmem:[%s10611_s2 + $0x18] sm:$0xff] }
 0x468   :  { %v3772_v58 = vpop.permute.xlu1 %3771 }
 0x469   :  { %v3889_v51 = vmul.f32 %v3772_v58, %v9215_v8  ;;  %v6667_v8 = vld [vmem:[%s10610_s6 + $0x8] ss:$36 sps:$4 sm:$0xff]   ;;  %v6676_v58 = vld [vmem:[%s10610_s6 + $0x2d0] ss:$36 sps:$4 sm:$0xff]  }
 0x46a   :  { %4972 = vmatpush1.bf16.msra.mxu0 %v6667_v8  ;;  %v6685_v8 = vld [vmem:[%s10610_s6 + $0x290] ss:$36 sps:$4 sm:$0xff]  }
 0x46b   :  { %v4057_v63 = vadd.f32 %v9126_v14, %v3889_v51  ;;  %v4058_v14 = vadd.f32 %v9077_v33, %v3890_v25  ;;  %v6678_v33 = vld [vmem:[%s10610_s6 + $0x2d4] ss:$36 sps:$4 sm:$0xff]   ;;  %4981 = vmatprep.subr.bf16.mxu0 %v6675_v54  ;;  %v6684_v25 = vld [vmem:[%s10610_s6 + $0x28c] ss:$36 sps:$4 sm:$0xff]   ;;  %v3822_v51 = vpop.permute.xlu0 %3821 }
 0x46c   :  { %v3787_v55 = vpop.permute.xlu1 %3786  ;;  %4912 = vmatprep.subr.bf16.mxu1 %v6678_v33  ;;  %v4087_v33 = vld [vmem:[%s10611_s2 + $0x30] sm:$0xff] }
 0x46d   :  { %v4105_v5 = vadd.f32 %v4081_v39, %v4057_v63  ;;  %v4106_v52 = vadd.f32 %v4082_v46, %v4058_v14  ;;  %v3892_v2 = vmul.f32 %v3787_v55, %v9136_v32  ;;  %v4107_v39 = vadd.f32 %v4083_v47, %v4059_v42  ;;  %v4085_v46 = vld [vmem:[%s10611_s2 + $0x20] sm:$0xff]  ;;  %4913 = vmatpush2.bf16.msra.mxu1 %v6676_v58  ;;  %v4086_v14 = vld [vmem:[%s10611_s2 + $0x28] sm:$0xff] }
 0x46e   :  { %4982 = vmatpush2.bf16.msra.mxu0 %v6673_v36  ;;  %4914 = vmatprep.subr.bf16.mxu1 %v6684_v25  ;;  %v3899_v25 = vmul.f32 %v3822_v51, %v9156_v1 }
 0x46f   :  { %4129 = vxpose.xlu1.b32.start [1/16] (narrow) %v4105_v5, 56  ;;  %v4060_v59 = vadd.f32 %v9094_v3, %v3892_v2  ;;  %4983 = vmatprep.subr.bf16.mxu0 %v6681_v22  ;;  %v3812_v40 = vpop.permute.xlu0 %3811 }
 0x470   :  { %v3802_v9 = vpop.permute.xlu1 %3801 }
 0x471   :  { %v4108_v3 = vadd.f32 %v4084_v50, %v4060_v59  ;;  %4915 = vmatpush2.bf16.msra.mxu1 %v6682_v37  ;;  %v3895_v5 = vmul.f32 %v3802_v9, %v9225_v56  ;;  %v4088_v56 = vld [vmem:[%s10611_s2 + $0x38] sm:$0xff] }
 0x472   :  { %4984 = vmatpush2.bf16.msra.mxu0 %v6679_v41  ;;  %v4092_v59 = vld [vmem:[%s10611_s2 + $0x58] sm:$0xff] }
 0x473   :  { %4130 = vxpose.xlu1.b32.cont [2/16] (narrow) %v4106_v52, 56  ;;  %4985 = vmatprep.subr.bf16.mxu0 %v6687_v0  ;;  %v4063_v47 = vadd.f32 %v9306_v53, %v3895_v5  ;;  %v4091_v0 = vld [vmem:[%s10611_s2 + $0x50] sm:$0xff] }
 0x474   :  { %v3792_v32 = vpop.permute.xlu1 %3791 }
 0x475   :  { %v3893_v63 = vmul.f32 %v3792_v32, %v9232_v16  ;;  %v4111_v9 = vadd.f32 %v4087_v33, %v4063_v47  ;;  %v6693_v33 = vld [vmem:[%s10610_s6 + $0x24c] ss:$36 sps:$4 sm:$0xff]  }
 0x476   :  { %4986 = vmatpush2.bf16.msra.mxu0 %v6685_v8  ;;  %v4093_v8 = vld [vmem:[%s10611_s2 + $0x60] sm:$0xff] }
 0x477   :  { %4131 = vxpose.xlu1.b32.cont [3/16] (narrow) %v4107_v39, 56  ;;  %v4061_v16 = vadd.f32 %v9106_v60, %v3893_v63  ;;  %v3827_v60 = vpop.permute.xlu0 %3826  ;;  %4987 = vmatprep.subr.bf16.mxu0 %v6693_v33 }
 0x478   :  { %v3807_v55 = vpop.permute.xlu1 %3806 }
 0x479   :  { %v4109_v54 = vadd.f32 %v4085_v46, %v4061_v16  ;;  %v3896_v22 = vmul.f32 %v3807_v55, %v9141_v27  ;;  %v4089_v27 = vld [vmem:[%s10611_s2 + $0x40] sm:$0xff] }
 0x47b   :  { %4132 = vxpose.xlu1.b32.cont [4/16] (narrow) %v4108_v3, 56  ;;  %v3817_v42 = vpop.permute.xlu0 %3816 }
 0x47c   :  { %v3797_v20 = vpop.permute.xlu1 %3796  ;;  %v3898_v58 = vmul.f32 %v3817_v42, %v9174_v38  ;;  %v3900_v38 = vmul.f32 %v3827_v60, %v9168_v17  ;;  %v6705_v42 = vld [vmem:[%s10610_s6 + $0x214] ss:$36 sps:$4 sm:$0xff]  }
 0x47d   :  { %v3894_v44 = vmul.f32 %v3797_v20, %v9147_v45  ;;  %v3897_v45 = vmul.f32 %v3812_v40, %v9162_v4 }
 0x47e   :  { %v4066_v4 = vadd.f32 %v9237_v57, %v3898_v58  ;;  %v4068_v51 = vadd.f32 %v9249_v15, %v3900_v38 }
 0x47f   :  { %v4062_v36 = vadd.f32 %v9113_v6, %v3894_v44  ;;  %4133 = vxpose.xlu1.b32.cont [5/16] (narrow) %v4109_v54, 56  ;;  %v4064_v6 = vadd.f32 %v9179_v34, %v3896_v22  ;;  %v4065_v2 = vadd.f32 %v9206_v21, %v3897_v45  ;;  %v3842_v41 = vpop.permute.xlu0 %3841  ;;  %v4090_v34 = vld [vmem:[%s10611_s2 + $0x48] sm:$0xff]  ;;  %v4067_v21 = vadd.f32 %v9245_v18, %v3899_v25 }
 0x480   :  { %v4114_v32 = vadd.f32 %v4090_v34, %v4066_v4  ;;  %v4116_v18 = vadd.f32 %v4092_v59, %v4068_v51  ;;  %v3903_v40 = vmul.f32 %v3842_v41, %v9182_v43  ;;  %v6690_v43 = vld [vmem:[%s10610_s6 + $0x244] ss:$36 sps:$4 sm:$0xff]  }
 0x481   :  { %v4110_v52 = vadd.f32 %v4086_v14, %v4062_v36  ;;  %v4112_v53 = vadd.f32 %v4088_v56, %v4064_v6  ;;  %v4113_v50 = vadd.f32 %v4089_v27, %v4065_v2  ;;  %v4115_v1 = vadd.f32 %v4091_v0, %v4067_v21  ;;  %4916 = vmatprep.subr.bf16.mxu1 %v6690_v43  ;;  %v4099_v2 = vld [vmem:[%s10611_s2 + $0x90] sm:$0xff]  ;;  %v4102_v21 = vld [vmem:[%s10611_s2 + $0xa8] sm:$0xff] }
 0x483   :  { %4134 = vxpose.xlu1.b32.cont [6/16] (narrow) %v4110_v52, 56  ;;  %v3832_v39 = vpop.permute.xlu0 %3831  ;;  %v4098_v52 = vld [vmem:[%s10611_s2 + $0x88] sm:$0xff] }
 0x484   :  { %v3901_v57 = vmul.f32 %v3832_v39, %v9188_v48  ;;  %v4094_v48 = vld [vmem:[%s10611_s2 + $0x68] sm:$0xff]  ;;  %v10619_v39 = vld [vmem:[#allocation2_spill] sm:$0xff] }
 0x486   :  { %v4069_v17 = vadd.f32 %v9253_v29, %v3901_v57  ;;  %v10620_v57 = vld [vmem:[#allocation3_spill] sm:$0xff] }
 0x487   :  { %4135 = vxpose.xlu1.b32.cont [7/16] (narrow) %v4111_v9, 56  ;;  %v3837_v63 = vpop.permute.xlu0 %3836  ;;  %v6696_v9 = vld [vmem:[%s10610_s6 + $0x20c] ss:$36 sps:$4 sm:$0xff]  }
 0x488   :  { %v3902_v37 = vmul.f32 %v3837_v63, %v9209_v13  ;;  %v4117_v46 = vadd.f32 %v4093_v8, %v4069_v17  ;;  %v4097_v13 = vld [vmem:[%s10611_s2 + $0x80] sm:$0xff] }
 0x48a   :  { %v4070_v15 = vadd.f32 %v9257_v62, %v3902_v37  ;;  %v4095_v62 = vld [vmem:[%s10611_s2 + $0x70] sm:$0xff]  ;;  %v4104_v37 = vld [vmem:[%s10611_s2 + $0xb8] sm:$0xff] }
 0x48b   :  { %4136 = vxpose.xlu1.b32.cont [8/16] (narrow) %v4112_v53, 56 }
 0x48c   :  { %v4118_v55 = vadd.f32 %v4094_v48, %v4070_v15 }
 0x48f   :  { %4137 = vxpose.xlu1.b32.cont [9/16] (narrow) %v4113_v50, 56  ;;  %v4101_v50 = vld [vmem:[%s10611_s2 + $0xa0] sm:$0xff] }
 0x493   :  { %4138 = vxpose.xlu1.b32.cont [10/16] (narrow) %v4114_v32, 56 }
 0x497   :  { %4139 = vxpose.xlu1.b32.cont [11/16] (narrow) %v4115_v1, 56 }
 0x49b   :  { %4140 = vxpose.xlu1.b32.cont [12/16] (narrow) %v4116_v18, 56 }
 0x49f   :  { %4141 = vxpose.xlu1.b32.cont [13/16] (narrow) %v4117_v46, 56 }
 0x4a3   :  { %4142 = vxpose.xlu1.b32.cont [14/16] (narrow) %v4118_v55, 56 }
 0x4a4   :  { %v3862_v3 = vpop.permute.xlu0 %3861 }
 0x4a5   :  { %v3907_v47 = vmul.f32 %v3862_v3, %v9260_v12 }
 0x4a7   :  { %v4075_v12 = vadd.f32 %v9242_v7, %v3907_v47  ;;  %v6715_v47 = vld [vmem:[%s10610_s6 + $0x180] ss:$36 sps:$4 sm:$0xff]  }
 0x4a8   :  { %v3852_v16 = vpop.permute.xlu1 %3851 }
 0x4a9   :  { %v3905_v29 = vmul.f32 %v3852_v16, %v9265_v11  ;;  %v6688_v11 = vld [vmem:[%s10610_s6 + $0x240] ss:$36 sps:$4 sm:$0xff]   ;;  %v4123_v58 = vadd.f32 %v4099_v2, %v4075_v12  ;;  %v6721_v12 = vld [vmem:[%s10610_s6 + $0x138] ss:$36 sps:$4 sm:$0xff]  }
 0x4aa   :  { %4917 = vmatpush2.bf16.msra.mxu1 %v6688_v11  ;;  %v6717_v11 = vld [vmem:[%s10610_s6 + $0x184] ss:$36 sps:$4 sm:$0xff]  }
 0x4ab   :  { %v4073_v14 = vadd.f32 %v9193_v19, %v3905_v29  ;;  %v6691_v19 = vld [vmem:[%s10610_s6 + $0x248] ss:$36 sps:$4 sm:$0xff]   ;;  %5028 = vmatprep.subr.bf16.mxu1 %v6696_v9  ;;  %v6706_v9 = vld [vmem:[%s10610_s6 + $0x130] ss:$36 sps:$4 sm:$0xff]  }
 0x4ac   :  { %v4010_v20 = vpop.permute.xlu1 %4009  ;;  %v3867_v5 = vpop.permute.xlu0 %3866  ;;  %4988 = vmatpush2.bf16.msra.mxu0 %v6691_v19  ;;  %v6694_v29 = vld [vmem:[%s10610_s6 + $0x208] ss:$36 sps:$4 sm:$0xff]   ;;  %v6700_v19 = vld [vmem:[%s10610_s6 + $0x178] ss:$36 sps:$4 sm:$0xff]  }
 0x4ad   :  { %v4121_v54 = vadd.f32 %v4097_v13, %v4073_v14  ;;  %v4071_v44 = vadd.f32 %v4010_v20, %v3903_v40  ;;  %5099 = vmatprep.subr.bf16.mxu0 %v6705_v42  ;;  %v6703_v13 = vld [vmem:[%s10610_s6 + $0x210] ss:$36 sps:$4 sm:$0xff]   ;;  %v6699_v14 = vld [vmem:[%s10610_s6 + $0x1c4] ss:$36 sps:$4 sm:$0xff]  }
 0x4af   :  { %v4119_v36 = vadd.f32 %v4095_v62, %v4071_v44  ;;  %4161 = vxpose.xlu0.b32.start [1/8] (short) (narrow) %v4121_v54, 56  ;;  %v6711_v62 = vld [vmem:[%s10610_s6 + $0x1cc] ss:$36 sps:$4 sm:$0xff]   ;;  %v6697_v54 = vld [vmem:[%s10610_s6 + $0x1c0] ss:$36 sps:$4 sm:$0xff]  }
 0x4b0   :  { %v3857_v60 = vpop.permute.xlu0 %3856  ;;  %v4015_v51 = vpop.permute.xlu1 %4014  ;;  %v6709_v44 = vld [vmem:[%s10610_s6 + $0x1c8] ss:$36 sps:$4 sm:$0xff]  }
 0x4b1   :  { %v3906_v22 = vmul.f32 %v3857_v60, %v9277_v24  ;;  %4143 = vxpose.xlu1.b32.cont [15/16] (narrow) %v4119_v36, 56  ;;  %v3908_v24 = vmul.f32 %v3867_v5, %v9271_v35  ;;  %v4100_v35 = vld [vmem:[%s10611_s2 + $0x98] sm:$0xff] }
 0x4b2   :  { %v6702_v36 = vld [vmem:[%s10610_s6 + $0x17c] ss:$36 sps:$4 sm:$0xff]  }
 0x4b3   :  { %v4074_v56 = vadd.f32 %v9222_v28, %v3906_v22  ;;  %v4076_v53 = vadd.f32 %v9247_v61, %v3908_v24  ;;  %v6714_v24 = vld [vmem:[%s10610_s6 + $0xec] ss:$36 sps:$4 sm:$0xff]  }
 0x4b4   :  { %v3882_v45 = vpop.permute.xlu0 %3881 }
 0x4b5   :  { %v4122_v6 = vadd.f32 %v4098_v52, %v4074_v56  ;;  %v4124_v41 = vadd.f32 %v4100_v35, %v4076_v53  ;;  %v3911_v34 = vmul.f32 %v3882_v45, %v9283_v23  ;;  %v4103_v23 = vld [vmem:[%s10611_s2 + $0xb0] sm:$0xff]  ;;  %v6723_v56 = vld [vmem:[%s10610_s6 + $0x13c] ss:$36 sps:$4 sm:$0xff]   ;;  %v6720_v35 = vld [vmem:[%s10610_s6 + $0xa4] ss:$36 sps:$4 sm:$0xff]  }
 0x4b6   :  { %v6708_v52 = vld [vmem:[%s10610_s6 + $0x134] ss:$36 sps:$4 sm:$0xff]  }
 0x4b7   :  { %4162 = vxpose.xlu0.b32.cont [2/8] (short) (narrow) %v4122_v6, 56  ;;  %v6729_v6 = vld [vmem:[%s10610_s6 + $0xf4] ss:$36 sps:$4 sm:$0xff]  }
 0x4b8   :  { %v3872_v28 = vpop.permute.xlu0 %3871  ;;  %v6727_v53 = vld [vmem:[%s10610_s6 + $0xf0] ss:$36 sps:$4 sm:$0xff]  }
 0x4b9   :  { %v3909_v7 = vmul.f32 %v3872_v28, %v9289_v49 }
 0x4bb   :  { %4163 = vxpose.xlu0.b32.cont [3/8] (short) (narrow) %v4123_v58, 56  ;;  %v4077_v25 = vadd.f32 %v9251_v31, %v3909_v7  ;;  %v4079_v31 = vadd.f32 %v9322_v10, %v3911_v34  ;;  %v6712_v58 = vld [vmem:[%s10610_s6 + $0xe8] ss:$36 sps:$4 sm:$0xff]  }
 0x4bc   :  { %v3887_v27 = vpop.permute.xlu0 %3886  ;;  %v6733_v34 = vld [vmem:[%s10610_s6 + $0xa8] ss:$36 sps:$4 sm:$0xff]  }
 0x4bd   :  { %v4125_v61 = vadd.f32 %v4101_v50, %v4077_v25  ;;  %v3912_v59 = vmul.f32 %v3887_v27, %v10620_v57  ;;  %v4127_v18 = vadd.f32 %v4103_v23, %v4079_v31  ;;  %v6735_v27 = vld [vmem:[%s10610_s6 + $0xac] ss:$36 sps:$4 sm:$0xff]   ;;  %v6718_v25 = vld [vmem:[%s10610_s6 + $0xa0] ss:$36 sps:$4 sm:$0xff]   ;;  %v6732_v31 = vld [vmem:[%s10610_s6 + $0x14] ss:$36 sps:$4 sm:$0xff]  }
 0x4be   :  { %v6753_v23 = vld [vmem:[%s10610_s6 + $0x334] ss:$36 sps:$4 sm:$0xff]  }
 0x4bf   :  { %4164 = vxpose.xlu0.b32.cont [4/8] (short) (narrow) %v4124_v41, 56  ;;  %v6751_v57 = vld [vmem:[%s10610_s6 + $0x330] ss:$36 sps:$4 sm:$0xff]  }
 0x4c0   :  { %v3877_v4 = vpop.permute.xlu0 %3876 }
 0x4c1   :  { %v3910_v49 = vmul.f32 %v3877_v4, %v9301_v26  ;;  %v4096_v26 = vld [vmem:[%s10611_s2 + $0x78] sm:$0xff] }
 0x4c3   :  { %v4078_v38 = vadd.f32 %v9255_v30, %v3910_v49  ;;  %4165 = vxpose.xlu0.b32.cont [5/8] (short) (narrow) %v4125_v61, 56  ;;  %v6726_v61 = vld [vmem:[%s10610_s6 + $0x5c] ss:$36 sps:$4 sm:$0xff]   ;;  %v6741_v49 = vld [vmem:[%s10610_s6 + $0x64] ss:$36 sps:$4 sm:$0xff]  }
 0x4c4   :  { %v3847_v32 = vpop.permute.xlu0 %3846 }
 0x4c5   :  { %v4126_v0 = vadd.f32 %v4102_v21, %v4078_v38  ;;  %v3904_v1 = vmul.f32 %v3847_v32, %v10619_v39  ;;  %v6724_v38 = vld [vmem:[%s10610_s6 + $0x58] ss:$36 sps:$4 sm:$0xff]   ;;  %v6739_v32 = vld [vmem:[%s10610_s6 + $0x60] ss:$36 sps:$4 sm:$0xff]   ;;  %v6730_v39 = vld [vmem:[%s10610_s6 + $0x10] ss:$36 sps:$4 sm:$0xff]  }
 0x4c7   :  { %v4072_v63 = vadd.f32 %v4015_v51, %v3904_v1  ;;  %4166 = vxpose.xlu0.b32.cont [6/8] (short) (narrow) %v4126_v0, 56  ;;  %v6747_v0 = vld [vmem:[%s10610_s6 + $0x1c] ss:$36 sps:$4 sm:$0xff]   ;;  %v6738_v51 = vld [vmem:[%s10610_s6 + $0x32c] ss:$36 sps:$4 sm:$0xff]  }
 0x4c8   :  { %v4055_v30 = vpop.permute.xlu0 %4054  ;;  %v6745_v1 = vld [vmem:[%s10610_s6 + $0x18] ss:$36 sps:$4 sm:$0xff]  }
 0x4c9   :  { %v4120_v17 = vadd.f32 %v4096_v26, %v4072_v63  ;;  %v4080_v10 = vadd.f32 %v4055_v30, %v3912_v59  ;;  %v6736_v26 = vld [vmem:[%s10610_s6 + $0x328] ss:$36 sps:$4 sm:$0xff]   ;;  %v6742_v30 = vld [vmem:[%s10610_s6 + $0x2e0] ss:$36 sps:$4 sm:$0xff]  }
 0x4ca   :  { %v6744_v59 = vld [vmem:[%s10610_s6 + $0x2e4] ss:$36 sps:$4 sm:$0xff]   ;;  %v6759_v63 = vld [vmem:[%s10610_s6 + $0x2ec] ss:$36 sps:$4 sm:$0xff]  }
 0x4cb   :  { %4167 = vxpose.xlu0.b32.cont [7/8] (short) (narrow) %v4127_v18, 56  ;;  %4144 = vxpose.xlu1.b32.end [16/16] (narrow) %v4120_v17, 56  ;;  %v4128_v8 = vadd.f32 %v4104_v37, %v4080_v10  ;;  %v6757_v18 = vld [vmem:[%s10610_s6 + $0x2e8] ss:$36 sps:$4 sm:$0xff]   ;;  %v6750_v17 = vld [vmem:[%s10610_s6 + $0x29c] ss:$36 sps:$4 sm:$0xff]  }
 0x4cc   :  { %v6762_v10 = vld [vmem:[%s10610_s6 + $0x2a4] ss:$36 sps:$4 sm:$0xff]   ;;  %v6748_v37 = vld [vmem:[%s10610_s6 + $0x298] ss:$36 sps:$4 sm:$0xff]  }
 0x4cf   :  { %4168 = vxpose.xlu0.b32.end [8/8] (short) (narrow) %v4128_v8, 56  ;;  %v6760_v8 = vld [vmem:[%s10610_s6 + $0x2a0] ss:$36 sps:$4 sm:$0xff]  }
 0x50b   :  { %v4145_v46 = vpop.trf.xlu1 }
 0x50f   :  { %v4146_v15 = vpop.trf.xlu1 }
 0x510   :  { %v9676_v40 = vpack.c.bf16 %v4146_v15, %v4145_v46  ;;  %v6756_v46 = vld [vmem:[%s10610_s6 + $0x254] ss:$36 sps:$4 sm:$0xff]   ;;  %v6766_v15 = vld [vmem:[%s10610_s6 + $0x25c] ss:$36 sps:$4 sm:$0xff]  }
 0x513   :  { %v4147_v55 = vpop.trf.xlu1 }
 0x517   :  { %v4148_v20 = vpop.trf.xlu1 }
 0x518   :  { %v9710_v22 = vpack.c.bf16 %v4148_v20, %v4147_v55  ;;  %v6764_v55 = vld [vmem:[%s10610_s6 + $0x258] ss:$36 sps:$4 sm:$0xff]  }
 0x519   :  { %v6770_v20 = vld [vmem:[%s10610_s6 + $0xf8] ss:$36 sps:$4 sm:$0xff]  }
 0x51b   :  { %v4149_v33 = vpop.trf.xlu1 }
 0x51f   :  { %v4150_v42 = vpop.trf.xlu1 }
 0x520   :  { %v9744_v7 = vpack.c.bf16 %v4150_v42, %v4149_v33 }
 0x523   :  { %v4151_v4 = vpop.trf.xlu1 }
 0x524   :  { %v9776_v21 = vpack.c.bf16 %v4151_v4, %v4151_v4 }
 0x52f   :  { %v4177_v48 = vpop.trf.xlu0 }
 0x533   :  { %v4178_v3 = vpop.trf.xlu0 }
 0x534   :  { %v9668_v16 = vpack.c.bf16 %v4178_v3, %v4177_v48  ;;  %v6754_v48 = vld [vmem:[%s10610_s6 + $0x250] ss:$36 sps:$4 sm:$0xff]   ;;  %v6763_v3 = vld [vmem:[%s10610_s6 + $0x218] ss:$36 sps:$4 sm:$0xff]  }
 0x536   :  { %6030 = vmatprep.mubr.msk.bf16.mxu1 %vm4873_vm1, %v9668_v16  ;;  %6034 = vmatprep.mubr.msk.bf16.mxu0 %vm4873_vm1, %v9668_v16 }
 0x537   :  { %4919 = vmatmul.mubr.bf16.vlgmr.msra.gmra.mxu1 %v9676_v40  ;;  %4990 = vmatmul.mubr.bf16.vlgmr.msra.gmra.mxu0 %v9676_v40  ;;  %v4179_v5 = vpop.trf.xlu0 }
 0x538   :  { %5029 = vmatpush1.bf16.msra.mxu1 %v6694_v29  ;;  %5100 = vmatpush1.bf16.msra.mxu0 %v6703_v13  ;;  %v10621_v29 = vmov 0   ;;  %v6767_v13 = vld [vmem:[%s10610_s6 + $0x1d0] ss:$36 sps:$4 sm:$0xff]  }
 0x539   :  { %5030 = vmatprep.subr.bf16.mxu1 %v6699_v14  ;;  %5101 = vmatprep.subr.bf16.mxu0 %v6711_v62  ;;  %v6768_v14 = vld [vmem:[%s10610_s6 + $0x188] ss:$36 sps:$4 sm:$0xff]   ;;  %v6769_v62 = vld [vmem:[%s10610_s6 + $0x140] ss:$36 sps:$4 sm:$0xff]  }
 0x53b   :  { %v4180_v43 = vpop.trf.xlu0 }
 0x53c   :  { %5031 = vmatpush1.bf16.msra.mxu1 %v6697_v54  ;;  %v9702_v60 = vpack.c.bf16 %v4180_v43, %v4179_v5  ;;  %5102 = vmatpush1.bf16.msra.mxu0 %v6709_v44  ;;  %v6771_v5 = vld [vmem:[%s10610_s6 + $0xb0] ss:$36 sps:$4 sm:$0xff]   ;;  %v6772_v54 = vld [vmem:[%s10610_s6 + $0x68] ss:$36 sps:$4 sm:$0xff]   ;;  %v6773_v44 = vld [vmem:[%s10610_s6 + $0x20] ss:$36 sps:$4 sm:$0xff]  }
 0x53d   :  { %5032 = vmatprep.subr.bf16.mxu1 %v6702_v36  ;;  %5103 = vmatprep.subr.bf16.mxu0 %v6717_v11  ;;  %v6774_v36 = vld [vmem:[%s10610_s6 + $0x338] ss:$36 sps:$4 sm:$0xff]   ;;  %v6775_v11 = vld [vmem:[%s10610_s6 + $0x2f0] ss:$36 sps:$4 sm:$0xff]   ;;  %v6777_v43 = vld [vmem:[%s10610_s6 + $0x260] ss:$36 sps:$4 sm:$0xff]  }
 0x53e   :  { %6031 = vmatprep.mubr.msk.bf16.mxu1 %vm4873_vm1, %v9702_v60  ;;  %6035 = vmatprep.mubr.msk.bf16.mxu0 %vm4873_vm1, %v9702_v60 }
 0x53f   :  { %4929 = vmatmul.mubr.bf16.gmra.mxu1 %v9710_v22  ;;  %5000 = vmatmul.mubr.bf16.gmra.mxu0 %v9710_v22  ;;  %v4181_v45 = vpop.trf.xlu0 }
 0x540   :  { %5033 = vmatpush1.bf16.msra.mxu1 %v6700_v19  ;;  %5104 = vmatpush1.bf16.msra.mxu0 %v6715_v47 }
 0x541   :  { %5034 = vmatprep.subr.bf16.mxu1 %v6708_v52  ;;  %5105 = vmatprep.subr.bf16.mxu0 %v6723_v56 }
 0x543   :  { %v4182_v2 = vpop.trf.xlu0 }
 0x544   :  { %5035 = vmatpush1.bf16.msra.mxu1 %v6706_v9  ;;  %v9736_v28 = vpack.c.bf16 %v4182_v2, %v4181_v45  ;;  %5106 = vmatpush1.bf16.msra.mxu0 %v6721_v12 }
 0x545   :  { %5036 = vmatprep.subr.bf16.mxu1 %v6714_v24  ;;  %5107 = vmatprep.subr.bf16.mxu0 %v6729_v6 }
 0x546   :  { %6032 = vmatprep.mubr.msk.bf16.mxu1 %vm4873_vm1, %v9736_v28  ;;  %6036 = vmatprep.mubr.msk.bf16.mxu0 %vm4873_vm1, %v9736_v28 }
 0x547   :  { %4939 = vmatmul.mubr.bf16.gmra.mxu1 %v9744_v7  ;;  %5010 = vmatmul.mubr.bf16.gmra.mxu0 %v9744_v7  ;;  %v4183_v41 = vpop.trf.xlu0 }
 0x548   :  { %5037 = vmatpush1.bf16.msra.mxu1 %v6712_v58  ;;  %v9761_v50 = vpack.c.bf16 %v4183_v41, %v4183_v41  ;;  %5108 = vmatpush1.bf16.msra.mxu0 %v6727_v53 }
 0x549   :  { %5038 = vmatprep.subr.bf16.mxu1 %v6720_v35  ;;  %5109 = vmatprep.subr.bf16.mxu0 %v6735_v27 }
 0x54a   :  { %6033 = vmatprep.mubr.msk.bf16.mxu1 %vm4873_vm1, %v9761_v50  ;;  %6037 = vmatprep.mubr.msk.bf16.mxu0 %vm4873_vm1, %v9761_v50 }
 0x54c   :  { %5039 = vmatpush1.bf16.msra.mxu1 %v6718_v25  ;;  %5110 = vmatpush1.bf16.msra.mxu0 %v6733_v34 }
 0x54d   :  { %5040 = vmatprep.subr.bf16.mxu1 %v6726_v61  ;;  %5111 = vmatprep.subr.bf16.mxu0 %v6741_v49 }
 0x54f   :  { %4949 = vmatmul.mubr.bf16.gmra.mxu1 %v9776_v21  ;;  %5020 = vmatmul.mubr.bf16.gmra.mxu0 %v9776_v21 }
 0x550   :  { %5041 = vmatpush1.bf16.msra.mxu1 %v6724_v38  ;;  %5112 = vmatpush1.bf16.msra.mxu0 %v6739_v32 }
 0x551   :  { %5042 = vmatprep.subr.bf16.mxu1 %v6732_v31  ;;  %5113 = vmatprep.subr.bf16.mxu0 %v6747_v0 }
 0x552   :  { %6038 = vmatprep.mubr.msk.bf16.mxu1 %vm4873_vm1, %v9668_v16  ;;  %6042 = vmatprep.mubr.msk.bf16.mxu0 %vm4873_vm1, %v9668_v16 }
 0x554   :  { %5043 = vmatpush1.bf16.msra.mxu1 %v6730_v39  ;;  %5114 = vmatpush1.bf16.msra.mxu0 %v6745_v1 }
 0x555   :  { %5052 = vmatprep.subr.bf16.mxu1 %v6738_v51  ;;  %5123 = vmatprep.subr.bf16.mxu0 %v6753_v23 }
 0x558   :  { %5053 = vmatpush2.bf16.msra.mxu1 %v6736_v26  ;;  %5124 = vmatpush2.bf16.msra.mxu0 %v6751_v57 }
 0x559   :  { %5054 = vmatprep.subr.bf16.mxu1 %v6744_v59  ;;  %5125 = vmatprep.subr.bf16.mxu0 %v6759_v63 }
 0x55c   :  { %5055 = vmatpush2.bf16.msra.mxu1 %v6742_v30  ;;  %5126 = vmatpush2.bf16.msra.mxu0 %v6757_v18 }
 0x55d   :  { %5056 = vmatprep.subr.bf16.mxu1 %v6750_v17  ;;  %5127 = vmatprep.subr.bf16.mxu0 %v6762_v10 }
 0x560   :  { %5057 = vmatpush2.bf16.msra.mxu1 %v6748_v37  ;;  %5128 = vmatpush2.bf16.msra.mxu0 %v6760_v8 }
 0x561   :  { %5058 = vmatprep.subr.bf16.mxu1 %v6756_v46  ;;  %5129 = vmatprep.subr.bf16.mxu0 %v6766_v15 }
 0x564   :  { %5059 = vmatpush2.bf16.msra.mxu1 %v6754_v48  ;;  %5130 = vmatpush2.bf16.msra.mxu0 %v6764_v55 }
 0x565   :  { %5170 = vmatprep.subr.bf16.mxu1 %v10621_v29 }
 0x567   :  { %5061 = vmatmul.mubr.bf16.vlgmr.msra.gmra.mxu1 %v9676_v40  ;;  %5132 = vmatmul.mubr.bf16.vlgmr.msra.gmra.mxu0 %v9676_v40 }
 0x568   :  { %5171 = vmatpush1.bf16.msra.mxu1 %v6763_v3  ;;  %6039 = vmatprep.mubr.msk.bf16.mxu1 %vm4873_vm1, %v9702_v60 }
 0x569   :  { %5172 = vmatprep.subr.bf16.mxu1 %v10621_v29  ;;  %6043 = vmatprep.mubr.msk.bf16.mxu0 %vm4873_vm1, %v9702_v60 }
 0x56c   :  { %5173 = vmatpush1.bf16.msra.mxu1 %v6767_v13 }
 0x56d   :  { %5174 = vmatprep.subr.bf16.mxu1 %v10621_v29 }
 0x56f   :  { %5071 = vmatmul.mubr.bf16.gmra.mxu1 %v9710_v22  ;;  %5142 = vmatmul.mubr.bf16.gmra.mxu0 %v9710_v22 }
 0x570   :  { %5175 = vmatpush1.bf16.msra.mxu1 %v6768_v14  ;;  %6040 = vmatprep.mubr.msk.bf16.mxu1 %vm4873_vm1, %v9736_v28 }
 0x571   :  { %5176 = vmatprep.subr.bf16.mxu1 %v10621_v29  ;;  %6044 = vmatprep.mubr.msk.bf16.mxu0 %vm4873_vm1, %v9736_v28 }
 0x574   :  { %5177 = vmatpush1.bf16.msra.mxu1 %v6769_v62 }
 0x575   :  { %5178 = vmatprep.subr.bf16.mxu1 %v10621_v29 }
 0x577   :  { %5081 = vmatmul.mubr.bf16.gmra.mxu1 %v9744_v7  ;;  %5152 = vmatmul.mubr.bf16.gmra.mxu0 %v9744_v7 }
 0x578   :  { %5179 = vmatpush1.bf16.msra.mxu1 %v6770_v20  ;;  %6041 = vmatprep.mubr.msk.bf16.mxu1 %vm4873_vm1, %v9761_v50 }
 0x579   :  { %5180 = vmatprep.subr.bf16.mxu1 %v10621_v29  ;;  %6045 = vmatprep.mubr.msk.bf16.mxu0 %vm4873_vm1, %v9761_v50 }
 0x57c   :  { %5181 = vmatpush1.bf16.msra.mxu1 %v6771_v5 }
 0x57d   :  { %5182 = vmatprep.subr.bf16.mxu1 %v10621_v29 }
 0x57f   :  { %5091 = vmatmul.mubr.bf16.gmra.mxu1 %v9776_v21  ;;  %5162 = vmatmul.mubr.bf16.gmra.mxu0 %v9776_v21 }
 0x580   :  { %5183 = vmatpush1.bf16.msra.mxu1 %v6772_v54  ;;  %6046 = vmatprep.mubr.msk.bf16.mxu1 %vm4873_vm1, %v9668_v16  ;;  %v6776_v16 = vld [vmem:[%s10610_s6 + $0x2a8] ss:$36 sps:$4 sm:$0xff]  }
 0x581   :  { %5184 = vmatprep.subr.bf16.mxu1 %v10621_v29 }
 0x584   :  { %5185 = vmatpush1.bf16.msra.mxu1 %v6773_v44 }
 0x585   :  { %5194 = vmatprep.subr.bf16.mxu1 %v10621_v29 }
 0x588   :  { %5195 = vmatpush2.bf16.msra.mxu1 %v6774_v36 }
 0x589   :  { %5196 = vmatprep.subr.bf16.mxu1 %v10621_v29 }
 0x58c   :  { %5197 = vmatpush2.bf16.msra.mxu1 %v6775_v11 }
 0x58d   :  { %5198 = vmatprep.subr.bf16.mxu1 %v10621_v29 }
 0x590   :  { %5199 = vmatpush2.bf16.msra.mxu1 %v6776_v16 }
 0x591   :  { %5200 = vmatprep.subr.bf16.mxu1 %v10621_v29 }
 0x594   :  { %5201 = vmatpush2.bf16.msra.mxu1 %v6777_v43 }
 0x597   :  { %5203 = vmatmul.mubr.bf16.vlgmr.msra.gmra.mxu1 %v9676_v40 }
 0x598   :  { %6047 = vmatprep.mubr.msk.bf16.mxu1 %vm4873_vm1, %v9702_v60 }
 0x59f   :  { %5211 = vmatmul.mubr.bf16.gmra.mxu1 %v9710_v22 }
 0x5a0   :  { %6048 = vmatprep.mubr.msk.bf16.mxu1 %vm4873_vm1, %v9736_v28 }
 0x5a7   :  { %5219 = vmatmul.mubr.bf16.gmra.mxu1 %v9744_v7 }
 0x5a8   :  { %6049 = vmatprep.mubr.msk.bf16.mxu1 %vm4873_vm1, %v9761_v50 }
 0x5af   :  { %5227 = vmatmul.mubr.bf16.gmra.mxu1 %v9776_v21 }
 0x5f7   :  { %v4920_v19 = vpop.f32.mrf.mxu1  ;;  %v4991_v33 = vpop.f32.mrf.mxu0 }
 0x5f8   :  { %5298 = vxpose.xlu1.b32.start [1/7] (short) %v4991_v33, 128  ;;  %5234 = vxpose.xlu0.b32.start [1/7] (short) %v4920_v19, 128 }
 0x5f9   :  { %v4922_v40 = vpop.f32.mrf.mxu1  ;;  %v4993_v47 = vpop.f32.mrf.mxu0 }
 0x5fb   :  { %v4924_v52 = vpop.f32.mrf.mxu1  ;;  %v4995_v60 = vpop.f32.mrf.mxu0 }
 0x5fc   :  { %5299 = vxpose.xlu1.b32.cont [2/7] (short) %v4995_v60, 128  ;;  %5235 = vxpose.xlu0.b32.cont [2/7] (short) %v4924_v52, 128 }
 0x5fd   :  { %v4926_v22 = vpop.f32.mrf.mxu1  ;;  %v4997_v56 = vpop.f32.mrf.mxu0 }
 0x5ff   :  { %v4930_v45 = vpop.f32.mrf.mxu1  ;;  %v5001_v9 = vpop.f32.mrf.mxu0 }
 0x600   :  { %5300 = vxpose.xlu1.b32.cont [3/7] (short) %v5001_v9, 128  ;;  %5236 = vxpose.xlu0.b32.cont [3/7] (short) %v4930_v45, 128 }
 0x601   :  { %v4932_v12 = vpop.f32.mrf.mxu1  ;;  %v5003_v24 = vpop.f32.mrf.mxu0 }
 0x603   :  { %v4934_v6 = vpop.f32.mrf.mxu1  ;;  %v5005_v42 = vpop.f32.mrf.mxu0 }
 0x604   :  { %5301 = vxpose.xlu1.b32.cont [4/7] (short) %v5005_v42, 128  ;;  %5237 = vxpose.xlu0.b32.cont [4/7] (short) %v4934_v6, 128 }
 0x605   :  { %v4936_v2 = vpop.f32.mrf.mxu1  ;;  %v5007_v28 = vpop.f32.mrf.mxu0 }
 0x607   :  { %v4940_v58 = vpop.f32.mrf.mxu1  ;;  %v5011_v53 = vpop.f32.mrf.mxu0 }
 0x608   :  { %5302 = vxpose.xlu1.b32.cont [5/7] (short) %v5011_v53, 128  ;;  %5238 = vxpose.xlu0.b32.cont [5/7] (short) %v4940_v58, 128 }
 0x609   :  { %v4942_v7 = vpop.f32.mrf.mxu1  ;;  %v5013_v35 = vpop.f32.mrf.mxu0 }
 0x60b   :  { %v4944_v27 = vpop.f32.mrf.mxu1  ;;  %v5015_v41 = vpop.f32.mrf.mxu0 }
 0x60c   :  { %5303 = vxpose.xlu1.b32.cont [6/7] (short) %v5015_v41, 128  ;;  %5239 = vxpose.xlu0.b32.cont [6/7] (short) %v4944_v27, 128 }
 0x60d   :  { %v4946_v25 = vpop.f32.mrf.mxu1  ;;  %v5017_v50 = vpop.f32.mrf.mxu0 }
 0x60f   :  { %v4950_v4 = vpop.f32.mrf.mxu1  ;;  %v5021_v34 = vpop.f32.mrf.mxu0 }
 0x610   :  { %5304 = vxpose.xlu1.b32.end [7/7] (short) %v5021_v34, 128  ;;  %5240 = vxpose.xlu0.b32.end [7/7] (short) %v4950_v4, 128 }
 0x611   :  { %v4952_v61 = vpop.f32.mrf.mxu1  ;;  %v5023_v49 = vpop.f32.mrf.mxu0 }
 0x613   :  { %v4954_v21 = vpop.f32.mrf.mxu1  ;;  %v5025_v38 = vpop.f32.mrf.mxu0 }
 0x615   :  { %v4955_v32 = vpop.f32.mrf.mxu1  ;;  %v5026_v31 = vpop.f32.mrf.mxu0 }
 0x627   :  { %v5062_v0 = vpop.f32.mrf.mxu1  ;;  %v9930_v39 = vpop.f32.mrf.mxu0 }
 0x629   :  { %v5064_v1 = vpop.f32.mrf.mxu1  ;;  %v9932_v51 = vpop.f32.mrf.mxu0 }
 0x62b   :  { %v9934_v23 = vpop.f32.mrf.mxu1  ;;  %v9936_v26 = vpop.f32.mrf.mxu0 }
 0x62d   :  { %v9938_v57 = vpop.f32.mrf.mxu1  ;;  %v9940_v59 = vpop.f32.mrf.mxu0 }
 0x62f   :  { %v9942_v63 = vpop.f32.mrf.mxu1  ;;  %v9944_v30 = vpop.f32.mrf.mxu0 }
 0x631   :  { %v9946_v18 = vpop.f32.mrf.mxu1  ;;  %v9948_v17 = vpop.f32.mrf.mxu0 }
 0x633   :  { %v9950_v10 = vpop.f32.mrf.mxu1  ;;  %v9952_v37 = vpop.f32.mrf.mxu0 }
 0x635   :  { %5330 = vxpose.xlu1.b32.start [1/7] (short) %v4993_v47, 128  ;;  %5266 = vxpose.xlu0.b32.start [1/7] (short) %v4922_v40, 128  ;;  %v9954_v8 = vpop.f32.mrf.mxu1  ;;  %v9956_v46 = vpop.f32.mrf.mxu0 }
 0x637   :  { %v9958_v15 = vpop.f32.mrf.mxu1  ;;  %v9960_v48 = vpop.f32.mrf.mxu0 }
 0x639   :  { %5331 = vxpose.xlu1.b32.cont [2/7] (short) %v4997_v56, 128  ;;  %5267 = vxpose.xlu0.b32.cont [2/7] (short) %v4926_v22, 128  ;;  %v9962_v55 = vpop.f32.mrf.mxu1  ;;  %v9964_v3 = vpop.f32.mrf.mxu0 }
 0x63b   :  { %v9966_v29 = vpop.f32.mrf.mxu1  ;;  %v9968_v13 = vpop.f32.mrf.mxu0 }
 0x63d   :  { %5332 = vxpose.xlu1.b32.cont [3/7] (short) %v5003_v24, 128  ;;  %5268 = vxpose.xlu0.b32.cont [3/7] (short) %v4932_v12, 128  ;;  %v9970_v14 = vpop.f32.mrf.mxu1  ;;  %v9972_v62 = vpop.f32.mrf.mxu0 }
 0x63f   :  { %v9974_v20 = vpop.f32.mrf.mxu1  ;;  %v9976_v5 = vpop.f32.mrf.mxu0 }
 0x641   :  { %5333 = vxpose.xlu1.b32.cont [4/7] (short) %v5007_v28, 128  ;;  %5269 = vxpose.xlu0.b32.cont [4/7] (short) %v4936_v2, 128  ;;  %v9978_v54 = vpop.f32.mrf.mxu1  ;;  %v9980_v44 = vpop.f32.mrf.mxu0 }
 0x643   :  { %v5096_v36 = vpop.f32.mrf.mxu1  ;;  %v5167_v11 = vpop.f32.mrf.mxu0 }
 0x645   :  { %5334 = vxpose.xlu1.b32.cont [5/7] (short) %v5013_v35, 128  ;;  %5270 = vxpose.xlu0.b32.cont [5/7] (short) %v4942_v7, 128  ;;  %v5097_v16 = vpop.f32.mrf.mxu1  ;;  %v5168_v43 = vpop.f32.mrf.mxu0 }
 0x649   :  { %5335 = vxpose.xlu1.b32.cont [6/7] (short) %v5017_v50, 128  ;;  %5271 = vxpose.xlu0.b32.cont [6/7] (short) %v4946_v25, 128 }
 0x64d   :  { %5336 = vxpose.xlu1.b32.end [7/7] (short) %v5023_v49, 128  ;;  %5272 = vxpose.xlu0.b32.end [7/7] (short) %v4952_v61, 128 }
 0x657   :  { %v9982_v19 = vpop.f32.mrf.mxu1 }
 0x659   :  { %v5206_v33 = vpop.f32.mrf.mxu1 }
 0x65b   :  { %v9984_v40 = vpop.f32.mrf.mxu1 }
 0x65d   :  { %v5209_v47 = vpop.f32.mrf.mxu1 }
 0x65f   :  { %v9986_v52 = vpop.f32.mrf.mxu1 }
 0x661   :  { %v5214_v60 = vpop.f32.mrf.mxu1 }
 0x663   :  { %v9988_v22 = vpop.f32.mrf.mxu1 }
 0x665   :  { %v5217_v56 = vpop.f32.mrf.mxu1 }
 0x667   :  { %v9990_v45 = vpop.f32.mrf.mxu1 }
 0x669   :  { %v5222_v9 = vpop.f32.mrf.mxu1 }
 0x66b   :  { %v9992_v12 = vpop.f32.mrf.mxu1 }
 0x66d   :  { %v5225_v24 = vpop.f32.mrf.mxu1 }
 0x66f   :  { %v9994_v6 = vpop.f32.mrf.mxu1 }
 0x671   :  { %v5230_v42 = vpop.f32.mrf.mxu1 }
 0x672   :  { %5362 = vxpose.xlu0.b32.start [1/7] (short) %v5062_v0, 128  ;;  %5394 = vxpose.xlu1.b32.start [1/7] (short) %v5064_v1, 128 }
 0x673   :  { %v5231_v2 = vpop.f32.mrf.mxu1 }
 0x674   :  { %v5250_v28 = vpop.trf.xlu0  ;;  %v5314_v58 = vpop.trf.xlu1 }
 0x675   :  { %5522 = vst.msk [vmem:[%s10612_s7] sm:$0xff] %vm3432_vm0, %v5250_v28  ;;  %v5232_v53 = vpop.f32.mrf.mxu1  ;;  %5554 = vst.msk [vmem:[%s10612_s7 + $0x100] sm:$0xff] %vm3432_vm0, %v5314_v58 }
 0x676   :  { %5363 = vxpose.xlu0.b32.cont [2/7] (short) %v9934_v23, 128  ;;  %5395 = vxpose.xlu1.b32.cont [2/7] (short) %v9938_v57, 128 }
 0x678   :  { %v5251_v7 = vpop.trf.xlu0  ;;  %v5315_v35 = vpop.trf.xlu1 }
 0x679   :  { %5523 = vst.msk [vmem:[%s10612_s7 + $0x8] sm:$0xff] %vm3432_vm0, %v5251_v7  ;;  %5555 = vst.msk [vmem:[%s10612_s7 + $0x108] sm:$0xff] %vm3432_vm0, %v5315_v35 }
 0x67a   :  { %5364 = vxpose.xlu0.b32.cont [3/7] (short) %v9942_v63, 128  ;;  %5396 = vxpose.xlu1.b32.cont [3/7] (short) %v9946_v18, 128 }
 0x67c   :  { %v5252_v27 = vpop.trf.xlu0  ;;  %v5316_v41 = vpop.trf.xlu1 }
 0x67d   :  { %5524 = vst.msk [vmem:[%s10612_s7 + $0x10] sm:$0xff] %vm3432_vm0, %v5252_v27  ;;  %5556 = vst.msk [vmem:[%s10612_s7 + $0x110] sm:$0xff] %vm3432_vm0, %v5316_v41 }
 0x67e   :  { %5365 = vxpose.xlu0.b32.cont [4/7] (short) %v9950_v10, 128  ;;  %5397 = vxpose.xlu1.b32.cont [4/7] (short) %v9954_v8, 128 }
 0x680   :  { %v5253_v25 = vpop.trf.xlu0  ;;  %v5317_v50 = vpop.trf.xlu1 }
 0x681   :  { %5525 = vst.msk [vmem:[%s10612_s7 + $0x18] sm:$0xff] %vm3432_vm0, %v5253_v25  ;;  %5557 = vst.msk [vmem:[%s10612_s7 + $0x118] sm:$0xff] %vm3432_vm0, %v5317_v50 }
 0x682   :  { %5366 = vxpose.xlu0.b32.cont [5/7] (short) %v9958_v15, 128  ;;  %5398 = vxpose.xlu1.b32.cont [5/7] (short) %v9962_v55, 128 }
 0x684   :  { %v5254_v4 = vpop.trf.xlu0  ;;  %v5318_v34 = vpop.trf.xlu1 }
 0x685   :  { %5526 = vst.msk [vmem:[%s10612_s7 + $0x20] sm:$0xff] %vm3432_vm0, %v5254_v4  ;;  %5558 = vst.msk [vmem:[%s10612_s7 + $0x120] sm:$0xff] %vm3432_vm0, %v5318_v34 }
 0x686   :  { %5367 = vxpose.xlu0.b32.cont [6/7] (short) %v9966_v29, 128  ;;  %5399 = vxpose.xlu1.b32.cont [6/7] (short) %v9970_v14, 128 }
 0x688   :  { %v5255_v61 = vpop.trf.xlu0  ;;  %v5319_v49 = vpop.trf.xlu1 }
 0x689   :  { %5527 = vst.msk [vmem:[%s10612_s7 + $0x28] sm:$0xff] %vm3432_vm0, %v5255_v61  ;;  %5559 = vst.msk [vmem:[%s10612_s7 + $0x128] sm:$0xff] %vm3432_vm0, %v5319_v49 }
 0x68a   :  { %5368 = vxpose.xlu0.b32.end [7/7] (short) %v9974_v20, 128  ;;  %5400 = vxpose.xlu1.b32.end [7/7] (short) %v9978_v54, 128 }
 0x68c   :  { %v5256_v21 = vpop.trf.xlu0  ;;  %v5320_v38 = vpop.trf.xlu1 }
 0x68d   :  { %5528 = vst.msk [vmem:[%s10612_s7 + $0x30] sm:$0xff] %vm3432_vm0, %v5256_v21  ;;  %5560 = vst.msk [vmem:[%s10612_s7 + $0x130] sm:$0xff] %vm3432_vm0, %v5320_v38 }
 0x690   :  { %v5257_v32 = vpop.trf.xlu0  ;;  %v5321_v31 = vpop.trf.xlu1 }
 0x691   :  { %5529 = vst.msk [vmem:[%s10612_s7 + $0x38] sm:$0xff] %vm3432_vm0, %v5257_v32  ;;  %5561 = vst.msk [vmem:[%s10612_s7 + $0x138] sm:$0xff] %vm3432_vm0, %v5321_v31 }
 0x694   :  { %v5258_v0 = vpop.trf.xlu0  ;;  %v5322_v1 = vpop.trf.xlu1 }
 0x695   :  { %5530 = vst.msk [vmem:[%s10612_s7 + $0x40] sm:$0xff] %vm3432_vm0, %v5258_v0  ;;  %5562 = vst.msk [vmem:[%s10612_s7 + $0x140] sm:$0xff] %vm3432_vm0, %v5322_v1 }
 0x698   :  { %v5259_v23 = vpop.trf.xlu0  ;;  %v5323_v57 = vpop.trf.xlu1 }
 0x699   :  { %5531 = vst.msk [vmem:[%s10612_s7 + $0x48] sm:$0xff] %vm3432_vm0, %v5259_v23  ;;  %5563 = vst.msk [vmem:[%s10612_s7 + $0x148] sm:$0xff] %vm3432_vm0, %v5323_v57 }
 0x69c   :  { %v5260_v63 = vpop.trf.xlu0  ;;  %v5324_v18 = vpop.trf.xlu1 }
 0x69d   :  { %5532 = vst.msk [vmem:[%s10612_s7 + $0x50] sm:$0xff] %vm3432_vm0, %v5260_v63  ;;  %5564 = vst.msk [vmem:[%s10612_s7 + $0x150] sm:$0xff] %vm3432_vm0, %v5324_v18 }
 0x6a0   :  { %v5261_v10 = vpop.trf.xlu0  ;;  %v5325_v8 = vpop.trf.xlu1 }
 0x6a1   :  { %5533 = vst.msk [vmem:[%s10612_s7 + $0x58] sm:$0xff] %vm3432_vm0, %v5261_v10  ;;  %5565 = vst.msk [vmem:[%s10612_s7 + $0x158] sm:$0xff] %vm3432_vm0, %v5325_v8 }
 0x6a4   :  { %v5262_v15 = vpop.trf.xlu0  ;;  %v5326_v55 = vpop.trf.xlu1 }
 0x6a5   :  { %5534 = vst.msk [vmem:[%s10612_s7 + $0x60] sm:$0xff] %vm3432_vm0, %v5262_v15  ;;  %5566 = vst.msk [vmem:[%s10612_s7 + $0x160] sm:$0xff] %vm3432_vm0, %v5326_v55 }
 0x6a8   :  { %v5263_v29 = vpop.trf.xlu0  ;;  %v5327_v14 = vpop.trf.xlu1 }
 0x6a9   :  { %5535 = vst.msk [vmem:[%s10612_s7 + $0x68] sm:$0xff] %vm3432_vm0, %v5263_v29  ;;  %5567 = vst.msk [vmem:[%s10612_s7 + $0x168] sm:$0xff] %vm3432_vm0, %v5327_v14 }
 0x6ac   :  { %v5264_v20 = vpop.trf.xlu0  ;;  %v5328_v54 = vpop.trf.xlu1 }
 0x6ad   :  { %5536 = vst.msk [vmem:[%s10612_s7 + $0x70] sm:$0xff] %vm3432_vm0, %v5264_v20  ;;  %5568 = vst.msk [vmem:[%s10612_s7 + $0x170] sm:$0xff] %vm3432_vm0, %v5328_v54 }
 0x6af   :  { %5426 = vxpose.xlu0.b32.start [1/7] (short) %v9930_v39, 128  ;;  %5458 = vxpose.xlu1.b32.start [1/7] (short) %v9932_v51, 128 }
 0x6b0   :  { %v5265_v36 = vpop.trf.xlu0  ;;  %v5329_v11 = vpop.trf.xlu1 }
 0x6b1   :  { %5537 = vst.msk [vmem:[%s10612_s7 + $0x78] sm:$0xff] %vm3432_vm0, %v5265_v36  ;;  %5569 = vst.msk [vmem:[%s10612_s7 + $0x178] sm:$0xff] %vm3432_vm0, %v5329_v11 }
 0x6b3   :  { %5427 = vxpose.xlu0.b32.cont [2/7] (short) %v9936_v26, 128  ;;  %5459 = vxpose.xlu1.b32.cont [2/7] (short) %v9940_v59, 128 }
 0x6b4   :  { %v5282_v16 = vpop.trf.xlu0  ;;  %v5346_v39 = vpop.trf.xlu1 }
 0x6b5   :  { %5538 = vst.msk [vmem:[%s10612_s7 + $0x80] sm:$0xff] %vm3432_vm0, %v5282_v16  ;;  %5570 = vst.msk [vmem:[%s10612_s7 + $0x180] sm:$0xff] %vm3432_vm0, %v5346_v39 }
 0x6b7   :  { %5428 = vxpose.xlu0.b32.cont [3/7] (short) %v9944_v30, 128  ;;  %5460 = vxpose.xlu1.b32.cont [3/7] (short) %v9948_v17, 128 }
 0x6b8   :  { %v5283_v51 = vpop.trf.xlu0  ;;  %v5347_v26 = vpop.trf.xlu1 }
 0x6b9   :  { %5539 = vst.msk [vmem:[%s10612_s7 + $0x88] sm:$0xff] %vm3432_vm0, %v5283_v51  ;;  %5571 = vst.msk [vmem:[%s10612_s7 + $0x188] sm:$0xff] %vm3432_vm0, %v5347_v26 }
 0x6bb   :  { %5429 = vxpose.xlu0.b32.cont [4/7] (short) %v9952_v37, 128  ;;  %5461 = vxpose.xlu1.b32.cont [4/7] (short) %v9956_v46, 128 }
 0x6bc   :  { %v5284_v59 = vpop.trf.xlu0  ;;  %v5348_v30 = vpop.trf.xlu1 }
 0x6bd   :  { %5540 = vst.msk [vmem:[%s10612_s7 + $0x90] sm:$0xff] %vm3432_vm0, %v5284_v59  ;;  %5572 = vst.msk [vmem:[%s10612_s7 + $0x190] sm:$0xff] %vm3432_vm0, %v5348_v30 }
 0x6bf   :  { %5430 = vxpose.xlu0.b32.cont [5/7] (short) %v9960_v48, 128  ;;  %5462 = vxpose.xlu1.b32.cont [5/7] (short) %v9964_v3, 128 }
 0x6c0   :  { %v5285_v17 = vpop.trf.xlu0  ;;  %v5349_v37 = vpop.trf.xlu1 }
 0x6c1   :  { %5541 = vst.msk [vmem:[%s10612_s7 + $0x98] sm:$0xff] %vm3432_vm0, %v5285_v17  ;;  %5573 = vst.msk [vmem:[%s10612_s7 + $0x198] sm:$0xff] %vm3432_vm0, %v5349_v37 }
 0x6c3   :  { %5431 = vxpose.xlu0.b32.cont [6/7] (short) %v9968_v13, 128  ;;  %5463 = vxpose.xlu1.b32.cont [6/7] (short) %v9972_v62, 128 }
 0x6c4   :  { %v5286_v46 = vpop.trf.xlu0  ;;  %v5350_v48 = vpop.trf.xlu1 }
 0x6c5   :  { %5542 = vst.msk [vmem:[%s10612_s7 + $0xa0] sm:$0xff] %vm3432_vm0, %v5286_v46  ;;  %5574 = vst.msk [vmem:[%s10612_s7 + $0x1a0] sm:$0xff] %vm3432_vm0, %v5350_v48 }
 0x6c7   :  { %5432 = vxpose.xlu0.b32.end [7/7] (short) %v9976_v5, 128  ;;  %5464 = vxpose.xlu1.b32.end [7/7] (short) %v9980_v44, 128 }
 0x6c8   :  { %v5287_v3 = vpop.trf.xlu0  ;;  %v5351_v13 = vpop.trf.xlu1 }
 0x6c9   :  { %5543 = vst.msk [vmem:[%s10612_s7 + $0xa8] sm:$0xff] %vm3432_vm0, %v5287_v3  ;;  %5575 = vst.msk [vmem:[%s10612_s7 + $0x1a8] sm:$0xff] %vm3432_vm0, %v5351_v13 }
 0x6cc   :  { %v5288_v62 = vpop.trf.xlu0  ;;  %v5352_v43 = vpop.trf.xlu1 }
 0x6cd   :  { %5544 = vst.msk [vmem:[%s10612_s7 + $0xb0] sm:$0xff] %vm3432_vm0, %v5288_v62  ;;  %5576 = vst.msk [vmem:[%s10612_s7 + $0x1b0] sm:$0xff] %vm3432_vm0, %v5352_v43 }
 0x6d0   :  { %v5289_v5 = vpop.trf.xlu0  ;;  %v5353_v44 = vpop.trf.xlu1 }
 0x6d1   :  { %5545 = vst.msk [vmem:[%s10612_s7 + $0xb8] sm:$0xff] %vm3432_vm0, %v5289_v5  ;;  %5577 = vst.msk [vmem:[%s10612_s7 + $0x1b8] sm:$0xff] %vm3432_vm0, %v5353_v44 }
 0x6d4   :  { %v5290_v33 = vpop.trf.xlu0  ;;  %v5354_v47 = vpop.trf.xlu1 }
 0x6d5   :  { %5546 = vst.msk [vmem:[%s10612_s7 + $0xc0] sm:$0xff] %vm3432_vm0, %v5290_v33  ;;  %5578 = vst.msk [vmem:[%s10612_s7 + $0x1c0] sm:$0xff] %vm3432_vm0, %v5354_v47 }
 0x6d8   :  { %v5291_v60 = vpop.trf.xlu0  ;;  %v5355_v56 = vpop.trf.xlu1 }
 0x6d9   :  { %5547 = vst.msk [vmem:[%s10612_s7 + $0xc8] sm:$0xff] %vm3432_vm0, %v5291_v60  ;;  %5579 = vst.msk [vmem:[%s10612_s7 + $0x1c8] sm:$0xff] %vm3432_vm0, %v5355_v56 }
 0x6dc   :  { %v5292_v9 = vpop.trf.xlu0  ;;  %v5356_v24 = vpop.trf.xlu1 }
 0x6dd   :  { %5548 = vst.msk [vmem:[%s10612_s7 + $0xd0] sm:$0xff] %vm3432_vm0, %v5292_v9  ;;  %5580 = vst.msk [vmem:[%s10612_s7 + $0x1d0] sm:$0xff] %vm3432_vm0, %v5356_v24 }
 0x6e0   :  { %v5293_v42 = vpop.trf.xlu0  ;;  %v5357_v2 = vpop.trf.xlu1 }
 0x6e1   :  { %5549 = vst.msk [vmem:[%s10612_s7 + $0xd8] sm:$0xff] %vm3432_vm0, %v5293_v42  ;;  %5581 = vst.msk [vmem:[%s10612_s7 + $0x1d8] sm:$0xff] %vm3432_vm0, %v5357_v2 }
 0x6e4   :  { %v5294_v28 = vpop.trf.xlu0  ;;  %v5358_v58 = vpop.trf.xlu1 }
 0x6e5   :  { %5550 = vst.msk [vmem:[%s10612_s7 + $0xe0] sm:$0xff] %vm3432_vm0, %v5294_v28  ;;  %5582 = vst.msk [vmem:[%s10612_s7 + $0x1e0] sm:$0xff] %vm3432_vm0, %v5358_v58 }
 0x6e8   :  { %v5295_v53 = vpop.trf.xlu0  ;;  %v5359_v7 = vpop.trf.xlu1 }
 0x6e9   :  { %5551 = vst.msk [vmem:[%s10612_s7 + $0xe8] sm:$0xff] %vm3432_vm0, %v5295_v53  ;;  %5583 = vst.msk [vmem:[%s10612_s7 + $0x1e8] sm:$0xff] %vm3432_vm0, %v5359_v7 }
 0x6ec   :  { %v5296_v35 = vpop.trf.xlu0  ;;  %5490 = vxpose.xlu0.b32.start [1/7] (short) %v9982_v19, 128  ;;  %v5360_v27 = vpop.trf.xlu1 }
 0x6ed   :  { %5552 = vst.msk [vmem:[%s10612_s7 + $0xf0] sm:$0xff] %vm3432_vm0, %v5296_v35  ;;  %5584 = vst.msk [vmem:[%s10612_s7 + $0x1f0] sm:$0xff] %vm3432_vm0, %v5360_v27 }
 0x6f0   :  { %5491 = vxpose.xlu0.b32.cont [2/7] (short) %v9984_v40, 128  ;;  %v5297_v41 = vpop.trf.xlu0  ;;  %v5361_v25 = vpop.trf.xlu1 }
 0x6f1   :  { %5553 = vst.msk [vmem:[%s10612_s7 + $0xf8] sm:$0xff] %vm3432_vm0, %v5297_v41  ;;  %5585 = vst.msk [vmem:[%s10612_s7 + $0x1f8] sm:$0xff] %vm3432_vm0, %v5361_v25 }
 0x6f4   :  { %5492 = vxpose.xlu0.b32.cont [3/7] (short) %v9986_v52, 128  ;;  %v5378_v19 = vpop.trf.xlu0  ;;  %v5410_v50 = vpop.trf.xlu1 }
 0x6f5   :  { %5586 = vst.msk [vmem:[%s10612_s7 + $0x200] sm:$0xff] %vm3432_vm0, %v5378_v19  ;;  %5602 = vst.msk [vmem:[%s10612_s7 + $0x280] sm:$0xff] %vm3432_vm0, %v5410_v50 }
 0x6f8   :  { %5493 = vxpose.xlu0.b32.cont [4/7] (short) %v9988_v22, 128  ;;  %v5379_v40 = vpop.trf.xlu0  ;;  %v5411_v4 = vpop.trf.xlu1 }
 0x6f9   :  { %5587 = vst.msk [vmem:[%s10612_s7 + $0x208] sm:$0xff] %vm3432_vm0, %v5379_v40  ;;  %5603 = vst.msk [vmem:[%s10612_s7 + $0x288] sm:$0xff] %vm3432_vm0, %v5411_v4 }
 0x6fc   :  { %5494 = vxpose.xlu0.b32.cont [5/7] (short) %v9990_v45, 128  ;;  %v5380_v52 = vpop.trf.xlu0  ;;  %v5412_v34 = vpop.trf.xlu1 }
 0x6fd   :  { %5588 = vst.msk [vmem:[%s10612_s7 + $0x210] sm:$0xff] %vm3432_vm0, %v5380_v52  ;;  %5604 = vst.msk [vmem:[%s10612_s7 + $0x290] sm:$0xff] %vm3432_vm0, %v5412_v34 }
 0x700   :  { %5495 = vxpose.xlu0.b32.cont [6/7] (short) %v9992_v12, 128  ;;  %v5381_v22 = vpop.trf.xlu0  ;;  %v5413_v61 = vpop.trf.xlu1 }
 0x701   :  { %5589 = vst.msk [vmem:[%s10612_s7 + $0x218] sm:$0xff] %vm3432_vm0, %v5381_v22  ;;  %5605 = vst.msk [vmem:[%s10612_s7 + $0x298] sm:$0xff] %vm3432_vm0, %v5413_v61 }
 0x704   :  { %5496 = vxpose.xlu0.b32.end [7/7] (short) %v9994_v6, 128  ;;  %v5382_v45 = vpop.trf.xlu0  ;;  %v5414_v49 = vpop.trf.xlu1 }
 0x705   :  { %5590 = vst.msk [vmem:[%s10612_s7 + $0x220] sm:$0xff] %vm3432_vm0, %v5382_v45  ;;  %5606 = vst.msk [vmem:[%s10612_s7 + $0x2a0] sm:$0xff] %vm3432_vm0, %v5414_v49 }
 0x708   :  { %v5383_v12 = vpop.trf.xlu0  ;;  %v5415_v21 = vpop.trf.xlu1 }
 0x709   :  { %5591 = vst.msk [vmem:[%s10612_s7 + $0x228] sm:$0xff] %vm3432_vm0, %v5383_v12  ;;  %5607 = vst.msk [vmem:[%s10612_s7 + $0x2a8] sm:$0xff] %vm3432_vm0, %v5415_v21 }
 0x70c   :  { %v5384_v6 = vpop.trf.xlu0  ;;  %v5416_v38 = vpop.trf.xlu1 }
 0x70d   :  { %5592 = vst.msk [vmem:[%s10612_s7 + $0x230] sm:$0xff] %vm3432_vm0, %v5384_v6  ;;  %5608 = vst.msk [vmem:[%s10612_s7 + $0x2b0] sm:$0xff] %vm3432_vm0, %v5416_v38 }
 0x710   :  { %v5385_v32 = vpop.trf.xlu0  ;;  %v5417_v31 = vpop.trf.xlu1 }
 0x711   :  { %5593 = vst.msk [vmem:[%s10612_s7 + $0x238] sm:$0xff] %vm3432_vm0, %v5385_v32  ;;  %5609 = vst.msk [vmem:[%s10612_s7 + $0x2b8] sm:$0xff] %vm3432_vm0, %v5417_v31 }
 0x714   :  { %v5386_v0 = vpop.trf.xlu0  ;;  %v5418_v1 = vpop.trf.xlu1 }
 0x715   :  { %5594 = vst.msk [vmem:[%s10612_s7 + $0x240] sm:$0xff] %vm3432_vm0, %v5386_v0  ;;  %5610 = vst.msk [vmem:[%s10612_s7 + $0x2c0] sm:$0xff] %vm3432_vm0, %v5418_v1 }
 0x718   :  { %v5387_v23 = vpop.trf.xlu0  ;;  %v5419_v57 = vpop.trf.xlu1 }
 0x719   :  { %5595 = vst.msk [vmem:[%s10612_s7 + $0x248] sm:$0xff] %vm3432_vm0, %v5387_v23  ;;  %5611 = vst.msk [vmem:[%s10612_s7 + $0x2c8] sm:$0xff] %vm3432_vm0, %v5419_v57 }
 0x71c   :  { %v5388_v63 = vpop.trf.xlu0  ;;  %v5420_v18 = vpop.trf.xlu1 }
 0x71d   :  { %5596 = vst.msk [vmem:[%s10612_s7 + $0x250] sm:$0xff] %vm3432_vm0, %v5388_v63  ;;  %5612 = vst.msk [vmem:[%s10612_s7 + $0x2d0] sm:$0xff] %vm3432_vm0, %v5420_v18 }
 0x720   :  { %v5389_v10 = vpop.trf.xlu0  ;;  %v5421_v8 = vpop.trf.xlu1 }
 0x721   :  { %5597 = vst.msk [vmem:[%s10612_s7 + $0x258] sm:$0xff] %vm3432_vm0, %v5389_v10  ;;  %5613 = vst.msk [vmem:[%s10612_s7 + $0x2d8] sm:$0xff] %vm3432_vm0, %v5421_v8 }
 0x724   :  { %v5390_v15 = vpop.trf.xlu0  ;;  %v5422_v55 = vpop.trf.xlu1 }
 0x725   :  { %5598 = vst.msk [vmem:[%s10612_s7 + $0x260] sm:$0xff] %vm3432_vm0, %v5390_v15  ;;  %5614 = vst.msk [vmem:[%s10612_s7 + $0x2e0] sm:$0xff] %vm3432_vm0, %v5422_v55 }
 0x728   :  { %v5391_v29 = vpop.trf.xlu0  ;;  %v5423_v14 = vpop.trf.xlu1 }
 0x729   :  { %5599 = vst.msk [vmem:[%s10612_s7 + $0x268] sm:$0xff] %vm3432_vm0, %v5391_v29  ;;  %5615 = vst.msk [vmem:[%s10612_s7 + $0x2e8] sm:$0xff] %vm3432_vm0, %v5423_v14 }
 0x72c   :  { %v5392_v20 = vpop.trf.xlu0  ;;  %v5424_v54 = vpop.trf.xlu1 }
 0x72d   :  { %5600 = vst.msk [vmem:[%s10612_s7 + $0x270] sm:$0xff] %vm3432_vm0, %v5392_v20  ;;  %5616 = vst.msk [vmem:[%s10612_s7 + $0x2f0] sm:$0xff] %vm3432_vm0, %v5424_v54 }
 0x730   :  { %v5393_v36 = vpop.trf.xlu0  ;;  %v5425_v11 = vpop.trf.xlu1 }
 0x731   :  { %5601 = vst.msk [vmem:[%s10612_s7 + $0x278] sm:$0xff] %vm3432_vm0, %v5393_v36  ;;  %5617 = vst.msk [vmem:[%s10612_s7 + $0x2f8] sm:$0xff] %vm3432_vm0, %v5425_v11 }
 0x734   :  { %v5442_v16 = vpop.trf.xlu0  ;;  %v5474_v39 = vpop.trf.xlu1 }
 0x735   :  { %5618 = vst.msk [vmem:[%s10612_s7 + $0x300] sm:$0xff] %vm3432_vm0, %v5442_v16  ;;  %5634 = vst.msk [vmem:[%s10612_s7 + $0x380] sm:$0xff] %vm3432_vm0, %v5474_v39 }
 0x738   :  { %v5443_v51 = vpop.trf.xlu0  ;;  %v5475_v26 = vpop.trf.xlu1 }
 0x739   :  { %5619 = vst.msk [vmem:[%s10612_s7 + $0x308] sm:$0xff] %vm3432_vm0, %v5443_v51  ;;  %5635 = vst.msk [vmem:[%s10612_s7 + $0x388] sm:$0xff] %vm3432_vm0, %v5475_v26 }
 0x73c   :  { %v5444_v59 = vpop.trf.xlu0  ;;  %v5476_v30 = vpop.trf.xlu1 }
 0x73d   :  { %5620 = vst.msk [vmem:[%s10612_s7 + $0x310] sm:$0xff] %vm3432_vm0, %v5444_v59  ;;  %5636 = vst.msk [vmem:[%s10612_s7 + $0x390] sm:$0xff] %vm3432_vm0, %v5476_v30 }
 0x740   :  { %v5445_v17 = vpop.trf.xlu0  ;;  %v5477_v37 = vpop.trf.xlu1 }
 0x741   :  { %5621 = vst.msk [vmem:[%s10612_s7 + $0x318] sm:$0xff] %vm3432_vm0, %v5445_v17  ;;  %5637 = vst.msk [vmem:[%s10612_s7 + $0x398] sm:$0xff] %vm3432_vm0, %v5477_v37 }
 0x744   :  { %v5446_v46 = vpop.trf.xlu0  ;;  %v5478_v48 = vpop.trf.xlu1 }
 0x745   :  { %5622 = vst.msk [vmem:[%s10612_s7 + $0x320] sm:$0xff] %vm3432_vm0, %v5446_v46  ;;  %5638 = vst.msk [vmem:[%s10612_s7 + $0x3a0] sm:$0xff] %vm3432_vm0, %v5478_v48 }
 0x748   :  { %v5447_v3 = vpop.trf.xlu0  ;;  %v5479_v13 = vpop.trf.xlu1 }
 0x749   :  { %5623 = vst.msk [vmem:[%s10612_s7 + $0x328] sm:$0xff] %vm3432_vm0, %v5447_v3  ;;  %5639 = vst.msk [vmem:[%s10612_s7 + $0x3a8] sm:$0xff] %vm3432_vm0, %v5479_v13 }
 0x74c   :  { %v5448_v62 = vpop.trf.xlu0  ;;  %v5480_v43 = vpop.trf.xlu1 }
 0x74d   :  { %5624 = vst.msk [vmem:[%s10612_s7 + $0x330] sm:$0xff] %vm3432_vm0, %v5448_v62  ;;  %5640 = vst.msk [vmem:[%s10612_s7 + $0x3b0] sm:$0xff] %vm3432_vm0, %v5480_v43 }
 0x750   :  { %v5449_v5 = vpop.trf.xlu0  ;;  %v5481_v44 = vpop.trf.xlu1 }
 0x751   :  { %5625 = vst.msk [vmem:[%s10612_s7 + $0x338] sm:$0xff] %vm3432_vm0, %v5449_v5  ;;  %5641 = vst.msk [vmem:[%s10612_s7 + $0x3b8] sm:$0xff] %vm3432_vm0, %v5481_v44 }
 0x754   :  { %v5450_v33 = vpop.trf.xlu0  ;;  %v5482_v47 = vpop.trf.xlu1 }
 0x755   :  { %5626 = vst.msk [vmem:[%s10612_s7 + $0x340] sm:$0xff] %vm3432_vm0, %v5450_v33  ;;  %5642 = vst.msk [vmem:[%s10612_s7 + $0x3c0] sm:$0xff] %vm3432_vm0, %v5482_v47 }
 0x758   :  { %v5451_v60 = vpop.trf.xlu0  ;;  %v5483_v56 = vpop.trf.xlu1 }
 0x759   :  { %5627 = vst.msk [vmem:[%s10612_s7 + $0x348] sm:$0xff] %vm3432_vm0, %v5451_v60  ;;  %5643 = vst.msk [vmem:[%s10612_s7 + $0x3c8] sm:$0xff] %vm3432_vm0, %v5483_v56 }
 0x75c   :  { %v5452_v9 = vpop.trf.xlu0  ;;  %v5484_v24 = vpop.trf.xlu1 }
 0x75d   :  { %5628 = vst.msk [vmem:[%s10612_s7 + $0x350] sm:$0xff] %vm3432_vm0, %v5452_v9  ;;  %5644 = vst.msk [vmem:[%s10612_s7 + $0x3d0] sm:$0xff] %vm3432_vm0, %v5484_v24 }
 0x760   :  { %v5453_v42 = vpop.trf.xlu0  ;;  %v5485_v2 = vpop.trf.xlu1 }
 0x761   :  { %5629 = vst.msk [vmem:[%s10612_s7 + $0x358] sm:$0xff] %vm3432_vm0, %v5453_v42  ;;  %5645 = vst.msk [vmem:[%s10612_s7 + $0x3d8] sm:$0xff] %vm3432_vm0, %v5485_v2 }
 0x764   :  { %v5454_v28 = vpop.trf.xlu0  ;;  %v5486_v58 = vpop.trf.xlu1 }
 0x765   :  { %5630 = vst.msk [vmem:[%s10612_s7 + $0x360] sm:$0xff] %vm3432_vm0, %v5454_v28  ;;  %5646 = vst.msk [vmem:[%s10612_s7 + $0x3e0] sm:$0xff] %vm3432_vm0, %v5486_v58 }
 0x768   :  { %v5455_v53 = vpop.trf.xlu0  ;;  %v5487_v7 = vpop.trf.xlu1 }
 0x769   :  { %5631 = vst.msk [vmem:[%s10612_s7 + $0x368] sm:$0xff] %vm3432_vm0, %v5455_v53  ;;  %5647 = vst.msk [vmem:[%s10612_s7 + $0x3e8] sm:$0xff] %vm3432_vm0, %v5487_v7 }
 0x76c   :  { %v5456_v35 = vpop.trf.xlu0  ;;  %v5488_v27 = vpop.trf.xlu1 }
 0x76d   :  { %5632 = vst.msk [vmem:[%s10612_s7 + $0x370] sm:$0xff] %vm3432_vm0, %v5456_v35  ;;  %5648 = vst.msk [vmem:[%s10612_s7 + $0x3f0] sm:$0xff] %vm3432_vm0, %v5488_v27 }
 0x770   :  { %v5457_v41 = vpop.trf.xlu0  ;;  %v5489_v25 = vpop.trf.xlu1 }
 0x771   :  { %5633 = vst.msk [vmem:[%s10612_s7 + $0x378] sm:$0xff] %vm3432_vm0, %v5457_v41  ;;  %5649 = vst.msk [vmem:[%s10612_s7 + $0x3f8] sm:$0xff] %vm3432_vm0, %v5489_v25 }
 0x774   :  { %v5506_v19 = vpop.trf.xlu0 }
 0x775   :  { %5650 = vst.msk [vmem:[%s10612_s7 + $0x400] sm:$0xff] %vm3432_vm0, %v5506_v19 }
 0x778   :  { %v5507_v50 = vpop.trf.xlu0 }
 0x779   :  { %5651 = vst.msk [vmem:[%s10612_s7 + $0x408] sm:$0xff] %vm3432_vm0, %v5507_v50 }
 0x77c   :  { %v5508_v40 = vpop.trf.xlu0 }
 0x77d   :  { %5652 = vst.msk [vmem:[%s10612_s7 + $0x410] sm:$0xff] %vm3432_vm0, %v5508_v40 }
 0x780   :  { %v5509_v4 = vpop.trf.xlu0 }
 0x781   :  { %5653 = vst.msk [vmem:[%s10612_s7 + $0x418] sm:$0xff] %vm3432_vm0, %v5509_v4 }
 0x784   :  { %v5510_v52 = vpop.trf.xlu0 }
 0x785   :  { %5654 = vst.msk [vmem:[%s10612_s7 + $0x420] sm:$0xff] %vm3432_vm0, %v5510_v52 }
 0x788   :  { %v5511_v34 = vpop.trf.xlu0 }
 0x789   :  { %5655 = vst.msk [vmem:[%s10612_s7 + $0x428] sm:$0xff] %vm3432_vm0, %v5511_v34 }
 0x78c   :  { %v5512_v22 = vpop.trf.xlu0 }
 0x78d   :  { %5656 = vst.msk [vmem:[%s10612_s7 + $0x430] sm:$0xff] %vm3432_vm0, %v5512_v22 }
 0x790   :  { %v5513_v61 = vpop.trf.xlu0 }
 0x791   :  { %5657 = vst.msk [vmem:[%s10612_s7 + $0x438] sm:$0xff] %vm3432_vm0, %v5513_v61 }
 0x794   :  { %v5514_v45 = vpop.trf.xlu0 }
 0x795   :  { %5658 = vst.msk [vmem:[%s10612_s7 + $0x440] sm:$0xff] %vm3432_vm0, %v5514_v45 }
 0x798   :  { %v5515_v49 = vpop.trf.xlu0 }
 0x799   :  { %5659 = vst.msk [vmem:[%s10612_s7 + $0x448] sm:$0xff] %vm3432_vm0, %v5515_v49 }
 0x79c   :  { %v5516_v12 = vpop.trf.xlu0 }
 0x79d   :  { %5660 = vst.msk [vmem:[%s10612_s7 + $0x450] sm:$0xff] %vm3432_vm0, %v5516_v12 }
 0x7a0   :  { %v5517_v21 = vpop.trf.xlu0 }
 0x7a1   :  { %5661 = vst.msk [vmem:[%s10612_s7 + $0x458] sm:$0xff] %vm3432_vm0, %v5517_v21 }
 0x7a4   :  { %v5518_v6 = vpop.trf.xlu0 }
 0x7a5   :  { %5662 = vst.msk [vmem:[%s10612_s7 + $0x460] sm:$0xff] %vm3432_vm0, %v5518_v6 }
 0x7a8   :  { %v5519_v38 = vpop.trf.xlu0 }
 0x7a9   :  { %5663 = vst.msk [vmem:[%s10612_s7 + $0x468] sm:$0xff] %vm3432_vm0, %v5519_v38 }
 0x7ac   :  { %v5520_v32 = vpop.trf.xlu0 }
 0x7ad   :  { %5664 = vst.msk [vmem:[%s10612_s7 + $0x470] sm:$0xff] %vm3432_vm0, %v5520_v32 }
 0x7b0   :  { %v5521_v31 = vpop.trf.xlu0 }
 0x7b1   :  { %5665 = vst.msk [vmem:[%s10612_s7 + $0x478] sm:$0xff] %vm3432_vm0, %v5521_v31 }

</bundles_post_ra>
